<compile_context>
chip_gen: v5e
topology: v5e:2x2
jax: 0.10.0
libtpu: 0.0.40
codegen_flags: <defaults>
</compile_context>

<pallas_src>
import functools

import jax
import jax.numpy as jnp
from jax.experimental import pallas as pl
from jax.experimental.pallas import tpu as pltpu

IN_DIM = 2      # fc1 input
FC1_DIM = 64    # fc1 output / lstm input
HID = 128       # lstm hidden
OUT_DIM = 2     # fc2 output


def _lstm_chunk_kernel(a1_ref, len_ref, wih_ref, bg_ref, whh_ref,
                       out_ref, hn_ref, cn_ref, xg_ref):
    """One time-chunk of the LSTM recurrence (PyTorch gate order i, f, g, o).

    a1_ref:  (Tc, Bp, FC1_DIM) fc1+ReLU activations for this chunk (streamed)
    len_ref: (Bp, 1)  int32 sequence lengths (loop-invariant)
    wih_ref: (FC1_DIM, 4*HID) input weight (pre-transposed)
    bg_ref:  (1, 4*HID)       combined LSTM biases
    whh_ref: (HID, 4*HID)     recurrent weight (pre-transposed)
    out_ref: (Tc, Bp, HID)    masked hidden-state sequence chunk
    hn_ref:  (Bp, HID)        running/final hidden state (resident accumulator)
    cn_ref:  (Bp, HID)        running/final cell state   (resident accumulator)
    xg_ref:  VMEM scratch (Tc, Bp, 4*HID) for this chunk's input-gate term
    """
    chunk = pl.program_id(0)
    Tc, Bp, F = a1_ref.shape

    @pl.when(chunk == 0)
    def _():
        hn_ref[...] = jnp.zeros_like(hn_ref)
        cn_ref[...] = jnp.zeros_like(cn_ref)

    # Input-gate contribution for the whole chunk: one GEMM, no sequential
    # dependency, so it overlaps nothing on the serial h/c path.
    a1_2d = a1_ref[...].reshape(Tc * Bp, F)
    xg = jnp.dot(a1_2d, wih_ref[...], preferred_element_type=jnp.float32)
    xg_ref[...] = (xg + bg_ref[...]).reshape(Tc, Bp, 4 * HID)

    whh = whh_ref[...]          # loop-invariant, hoisted
    lengths = len_ref[...]      # (Bp, 1) int32, loop-invariant
    t0 = chunk * Tc

    def step(t, carry):
        h_prev, c_prev = carry
        gates = xg_ref[t] + jnp.dot(h_prev, whh,
                                    preferred_element_type=jnp.float32)
        i_g = jax.nn.sigmoid(gates[:, 0 * HID:1 * HID])
        f_g = jax.nn.sigmoid(gates[:, 1 * HID:2 * HID])
        g_g = jnp.tanh(gates[:, 2 * HID:3 * HID])
        o_g = jax.nn.sigmoid(gates[:, 3 * HID:4 * HID])
        c_new = f_g * c_prev + i_g * g_g
        h_new = o_g * jnp.tanh(c_new)

        valid = (t0 + t) < lengths                     # (Bp, 1) bool
        out_ref[t] = jnp.where(valid, h_new, 0.0)      # lane-dense (Bp,128) store
        h_next = jnp.where(valid, h_new, h_prev)       # freeze past sequence end
        c_next = jnp.where(valid, c_new, c_prev)
        return h_next, c_next

    h_f, c_f = jax.lax.fori_loop(0, Tc, step, (hn_ref[...], cn_ref[...]),
                                 unroll=min(8, Tc))
    hn_ref[...] = h_f
    cn_ref[...] = c_f


@functools.partial(jax.jit, static_argnames=("tc",))
def _drqn_core(params, x, lengths_pad, tc=None):
    """x: (B, T, IN_DIM) f32 batch-first; lengths_pad: (Bp,) int32 (Bp >= B)."""
    w1, b1, wih, whh, bg, w2, b2 = params
    B, T, _ = x.shape
    Bp = lengths_pad.shape[0]

    # Time-chunk size: bounds per-invocation VMEM (~32 KiB/step at Bp=8) so the
    # chunked pipeline fits comfortably inside even v5e's 16 MiB default scoped
    # VMEM / v7x's 32 MiB, regardless of T.
    Tc = min(128 if tc is None else int(tc), T)
    num_chunks = pl.cdiv(T, Tc)
    T_pad = num_chunks * Tc

    # Transpose + pad only the *narrow* (2-lane) input, so fc1 output is
    # produced time-major directly (no 512-wide transposes, no zeros buffer).
    x_tm = jnp.transpose(x, (1, 0, 2))                                # (T, B, 2)
    x_tm = jnp.pad(x_tm, ((0, T_pad - T), (0, Bp - B), (0, 0)))       # (T_pad, Bp, 2)

    # fc1 + ReLU: one GEMM over all T_pad*Bp rows (hoisted out of the kernel).
    a1 = jnp.maximum(x_tm.reshape(T_pad * Bp, IN_DIM) @ w1 + b1, 0.0)
    a1 = a1.reshape(T_pad, Bp, FC1_DIM)                               # (T_pad, Bp, 64)

    lengths2d = lengths_pad.reshape(Bp, 1)

    grid_spec = pltpu.PrefetchScalarGridSpec(
        num_scalar_prefetch=0,
        grid=(num_chunks,),
        in_specs=[
            pl.BlockSpec((Tc, Bp, FC1_DIM), lambda i: (i, 0, 0)),     # a1 chunk
            pl.BlockSpec((Bp, 1), lambda i: (0, 0)),                  # lengths
            pl.BlockSpec((FC1_DIM, 4 * HID), lambda i: (0, 0)),       # W_ih^T
            pl.BlockSpec((1, 4 * HID), lambda i: (0, 0)),             # bias
            pl.BlockSpec((HID, 4 * HID), lambda i: (0, 0)),           # W_hh^T
        ],
        out_specs=[
            pl.BlockSpec((Tc, Bp, HID), lambda i: (i, 0, 0)),         # lstm_out chunk
            pl.BlockSpec((Bp, HID), lambda i: (0, 0)),                # h_n (resident)
            pl.BlockSpec((Bp, HID), lambda i: (0, 0)),                # c_n (resident)
        ],
        scratch_shapes=[pltpu.VMEM((Tc, Bp, 4 * HID), jnp.float32)],  # xg chunk
    )
    lstm_out_tm, h_n, c_n = pl.pallas_call(
        _lstm_chunk_kernel,
        grid_spec=grid_spec,
        out_shape=(
            jax.ShapeDtypeStruct((T_pad, Bp, HID), jnp.float32),
            jax.ShapeDtypeStruct((Bp, HID), jnp.float32),
            jax.ShapeDtypeStruct((Bp, HID), jnp.float32),
        ),
        compiler_params=pltpu.CompilerParams(
            dimension_semantics=("arbitrary",)),                      # sequential recurrence
    )(a1, lengths2d, wih, bg, whh)

    # fc2 on the time-major hidden sequence; transpose only the tiny 2-wide result.
    y_tm = lstm_out_tm.reshape(T_pad * Bp, HID) @ w2 + b2             # (T_pad*Bp, 2)
    y = jnp.transpose(y_tm.reshape(T_pad, Bp, OUT_DIM), (1, 0, 2))[:B, :T]
    return y, h_n[:B][None], c_n[:B][None]


def drqn_forward(params, x, episode_size=None, time_chunk=None):
    """x: (B, T, 2) float32 batch_first; episode_size: python list of lengths
    (sorted descending, as pack_padded_sequence requires).
    Returns (y, (h_n, c_n)) matching the PyTorch module."""
    B, T, _ = x.shape
    if episode_size is None:
        episode_size = [1] * B
    assert max(episode_size) <= T, "episode_size entries must be <= x.shape[1]"
    Bp = max(8, ((B + 7) // 8) * 8)
    lengths_pad = jnp.zeros((Bp,), jnp.int32).at[:B].set(
        jnp.asarray(episode_size, dtype=jnp.int32))
    y_full, h_n, c_n = _drqn_core(params, x.astype(jnp.float32), lengths_pad,
                                  tc=time_chunk)
    t_out = int(max(episode_size))             # pad_packed pads to max length
    return y_full[:, :t_out], (h_n, c_n)


def init_params(key):
    """Deterministic PyTorch-style uniform init. Weights stored pre-transposed
    so all matmuls are x @ W (+ b)."""
    ks = jax.random.split(key, 8)
    u = lambda k, shape, fan: jax.random.uniform(
        k, shape, jnp.float32, -1.0 / jnp.sqrt(fan), 1.0 / jnp.sqrt(fan))
    w1 = u(ks[0], (IN_DIM, FC1_DIM), IN_DIM)          # fc1.weight^T
    b1 = u(ks[1], (1, FC1_DIM), IN_DIM)               # fc1.bias
    wih = u(ks[2], (FC1_DIM, 4 * HID), HID)           # lstm.weight_ih_l0^T
    whh = u(ks[3], (HID, 4 * HID), HID)                # lstm.weight_hh_l0^T
    bih = u(ks[4], (1, 4 * HID), HID)
    bhh = u(ks[5], (1, 4 * HID), HID)
    bg = bih + bhh                                     # combined lstm biases
    w2 = u(ks[6], (HID, OUT_DIM), HID)                 # fc2.weight^T
    b2 = u(ks[7], (1, OUT_DIM), HID)                   # fc2.bias
    return (w1, b1, wih, whh, bg, w2, b2)


def _reference_forward(params, x, episode_size):
    """Pure-JAX reference of the PyTorch forward (for correctness check)."""
    w1, b1, wih, whh, bg, w2, b2 = params
    B, T, _ = x.shape
    a1 = jnp.maximum(x @ w1 + b1, 0.0)                                # (B, T, 64)
    h = jnp.zeros((B, HID), jnp.float32)
    c = jnp.zeros((B, HID), jnp.float32)
    lengths = jnp.asarray(episode_size, jnp.int32)
    outs = []
    for t in range(T):
        gates = a1[:, t, :] @ wih + h @ whh + bg
        i_g = jax.nn.sigmoid(gates[:, 0 * HID:1 * HID])
        f_g = jax.nn.sigmoid(gates[:, 1 * HID:2 * HID])
        g_g = jnp.tanh(gates[:, 2 * HID:3 * HID])
        o_g = jax.nn.sigmoid(gates[:, 3 * HID:4 * HID])
        c_new = f_g * c + i_g * g_g
        h_new = o_g * jnp.tanh(c_new)
        valid = (t < lengths)[:, None]
        h = jnp.where(valid, h_new, h)
        c = jnp.where(valid, c_new, c)
        outs.append(jnp.where(valid, h_new, 0.0))
    lstm_out = jnp.stack(outs, axis=1)                                # (B, T, 128)
    t_out = int(max(episode_size))
    y = lstm_out[:, :t_out, :] @ w2 + b2
    return y, (h[None], c[None])


def _check(params, x, episode_size, time_chunk=None):
    y, (h_n, c_n) = drqn_forward(params, x, episode_size, time_chunk=time_chunk)
    jax.block_until_ready((y, h_n, c_n))
    y_ref, (h_ref, c_ref) = _reference_forward(params, x, episode_size)
    B = x.shape[0]
    assert y.shape == (B, max(episode_size), OUT_DIM)
    assert h_n.shape == (1, B, HID) and c_n.shape == (1, B, HID)
    assert jnp.allclose(y, y_ref, atol=1e-4, rtol=1e-4)
    assert jnp.allclose(h_n, h_ref, atol=1e-4, rtol=1e-4)
    assert jnp.allclose(c_n, c_ref, atol=1e-4, rtol=1e-4)


if __name__ == "__main__":
    key = jax.random.PRNGKey(0)
    pkey, xkey1, xkey2 = jax.random.split(key, 3)
    params = init_params(pkey)

    # Single-chunk path (Tc == T, grid = (1,)).
    B, T = 2, 8
    x = jax.random.normal(xkey1, (B, T, IN_DIM), dtype=jnp.float32)
    _check(params, x, episode_size=[8, 5])

    # Multi-chunk path: T=10, Tc=4 -> 3 chunks with time padding; sequence
    # boundaries cross chunk boundaries, exercising the resident h/c carry.
    B2, T2 = 2, 10
    x2 = jax.random.normal(xkey2, (B2, T2, IN_DIM), dtype=jnp.float32)
    _check(params, x2, episode_size=[10, 7], time_chunk=4)

    print("KERNEL_OK")
</pallas_src>

<mosaic_0001>
module attributes {stable_mosaic.version = 11 : i64} {
  func.func @_lstm_chunk_kernel(%arg0: i32, %arg1: memref<8x8x64xf32, #tpu.memory_space<vmem>>, %arg2: memref<8x1xi32, #tpu.memory_space<vmem>>, %arg3: memref<64x512xf32, #tpu.memory_space<vmem>>, %arg4: memref<1x512xf32, #tpu.memory_space<vmem>>, %arg5: memref<128x512xf32, #tpu.memory_space<vmem>>, %arg6: memref<8x8x128xf32, #tpu.memory_space<vmem>>, %arg7: memref<8x128xf32, #tpu.memory_space<vmem>>, %arg8: memref<8x128xf32, #tpu.memory_space<vmem>>, %arg9: memref<8x8x512xf32, #tpu.memory_space<vmem>>) attributes {dimension_semantics = [#tpu.dimension_semantics<arbitrary>], iteration_bounds = array<i64: 1>, scalar_prefetch = 0 : i64, scratch_operands = 1 : i64, tpu.core_type = #tpu.core_type<tc>, window_params = [{transform_indices = @transform_0, window_bounds = array<i64: 8, 8, 64>}, {pipeline_mode = #tpu.pipeline_mode<synchronous>, transform_indices = @transform_1, window_bounds = array<i64: 8, 1>}, {pipeline_mode = #tpu.pipeline_mode<synchronous>, transform_indices = @transform_2, window_bounds = array<i64: 64, 512>}, {pipeline_mode = #tpu.pipeline_mode<synchronous>, transform_indices = @transform_3, window_bounds = array<i64: 1, 512>}, {pipeline_mode = #tpu.pipeline_mode<synchronous>, transform_indices = @transform_4, window_bounds = array<i64: 128, 512>}, {transform_indices = @transform_5, window_bounds = array<i64: 8, 8, 128>}, {pipeline_mode = #tpu.pipeline_mode<synchronous>, transform_indices = @transform_6, window_bounds = array<i64: 8, 128>}, {pipeline_mode = #tpu.pipeline_mode<synchronous>, transform_indices = @transform_7, window_bounds = array<i64: 8, 128>}]} {
    %c0_i32 = arith.constant 0 : i32
    %0 = arith.cmpi eq, %arg0, %c0_i32 : i32
    %1 = arith.extui %0 : i1 to i32
    %c0_i32_0 = arith.constant 0 : i32
    %2 = arith.cmpi ne, %1, %c0_i32_0 : i32
    scf.if %2 {
      %cst_96 = arith.constant 0.000000e+00 : f32
      %395 = vector.broadcast %cst_96 : f32 to vector<8x128xf32>
      %c0_97 = arith.constant 0 : index
      %c0_98 = arith.constant 0 : index
      %396 = vector.load %arg7[%c0_97, %c0_98] : memref<8x128xf32, #tpu.memory_space<vmem>>, vector<8x128xf32>
      tpu.vector_store %arg7[%c0_97, %c0_98], %395 {strides = array<i32>} : memref<8x128xf32, #tpu.memory_space<vmem>>, vector<8x128xf32>,
      %cst_99 = arith.constant 0.000000e+00 : f32
      %397 = vector.broadcast %cst_99 : f32 to vector<8x128xf32>
      %c0_100 = arith.constant 0 : index
      %c0_101 = arith.constant 0 : index
      %398 = vector.load %arg8[%c0_100, %c0_101] : memref<8x128xf32, #tpu.memory_space<vmem>>, vector<8x128xf32>
      tpu.vector_store %arg8[%c0_100, %c0_101], %397 {strides = array<i32>} : memref<8x128xf32, #tpu.memory_space<vmem>>, vector<8x128xf32>,
    } else {
    }
    %c0 = arith.constant 0 : index
    %c0_1 = arith.constant 0 : index
    %c0_2 = arith.constant 0 : index
    %3 = vector.load %arg1[%c0, %c0_1, %c0_2] : memref<8x8x64xf32, #tpu.memory_space<vmem>>, vector<8x8x64xf32>
    %4 = vector.shape_cast %3 : vector<8x8x64xf32> to vector<64x64xf32>
    %c0_3 = arith.constant 0 : index
    %c0_4 = arith.constant 0 : index
    %5 = vector.load %arg3[%c0_3, %c0_4] : memref<64x512xf32, #tpu.memory_space<vmem>>, vector<64x512xf32>
    %cst = arith.constant dense<0.000000e+00> : vector<64x512xf32>
    %6 = tpu.matmul %4, %5, %cst {dimension_numbers = #tpu.dot_dimension_numbers<[1], [0], [0], [1], [0, 0, 1, 1], [], []>} : vector<64x64xf32>, vector<64x512xf32>, vector<64x512xf32> -> vector<64x512xf32>
    %c0_5 = arith.constant 0 : index
    %c0_6 = arith.constant 0 : index
    %7 = vector.load %arg4[%c0_5, %c0_6] : memref<1x512xf32, #tpu.memory_space<vmem>>, vector<1x512xf32>
    %8 = vector.broadcast %7 : vector<1x512xf32> to vector<64x512xf32>
    %9 = arith.addf %6, %8 : vector<64x512xf32>
    %10 = vector.shape_cast %9 : vector<64x512xf32> to vector<8x8x512xf32>
    %c0_7 = arith.constant 0 : index
    %c0_8 = arith.constant 0 : index
    %c0_9 = arith.constant 0 : index
    %11 = vector.load %arg9[%c0_7, %c0_8, %c0_9] : memref<8x8x512xf32, #tpu.memory_space<vmem>>, vector<8x8x512xf32>
    tpu.vector_store %arg9[%c0_7, %c0_8, %c0_9], %10 {strides = array<i32>} : memref<8x8x512xf32, #tpu.memory_space<vmem>>, vector<8x8x512xf32>,
    %c0_10 = arith.constant 0 : index
    %c0_11 = arith.constant 0 : index
    %12 = vector.load %arg5[%c0_10, %c0_11] : memref<128x512xf32, #tpu.memory_space<vmem>>, vector<128x512xf32>
    %c0_12 = arith.constant 0 : index
    %c0_13 = arith.constant 0 : index
    %13 = vector.load %arg2[%c0_12, %c0_13] : memref<8x1xi32, #tpu.memory_space<vmem>>, vector<8x1xi32>
    %c8_i32 = arith.constant 8 : i32
    %14 = arith.muli %arg0, %c8_i32 : i32
    %c0_14 = arith.constant 0 : index
    %c0_15 = arith.constant 0 : index
    %15 = vector.load %arg7[%c0_14, %c0_15] : memref<8x128xf32, #tpu.memory_space<vmem>>, vector<8x128xf32>
    %c0_16 = arith.constant 0 : index
    %c0_17 = arith.constant 0 : index
    %16 = vector.load %arg8[%c0_16, %c0_17] : memref<8x128xf32, #tpu.memory_space<vmem>>, vector<8x128xf32>
    %c0_i32_18 = arith.constant 0 : i32
    %17 = arith.index_cast %c0_i32_18 : i32 to index
    %c0_19 = arith.constant 0 : index
    %c0_20 = arith.constant 0 : index
    %18 = vector.load %arg9[%17, %c0_19, %c0_20] : memref<8x8x512xf32, #tpu.memory_space<vmem>>, vector<1x8x512xf32>
    %19 = vector.shape_cast %18 : vector<1x8x512xf32> to vector<8x512xf32>
    %cst_21 = arith.constant dense<0.000000e+00> : vector<8x512xf32>
    %20 = tpu.matmul %15, %12, %cst_21 {dimension_numbers = #tpu.dot_dimension_numbers<[1], [0], [0], [1], [0, 0, 1, 1], [], []>} : vector<8x128xf32>, vector<128x512xf32>, vector<8x512xf32> -> vector<8x512xf32>
    %21 = arith.addf %19, %20 : vector<8x512xf32>
    %22 = vector.extract_strided_slice %21 {offsets = [0, 0], sizes = [8, 128], strides = [1, 1]} : vector<8x512xf32> to vector<8x128xf32>
    %23 = arith.negf %22 : vector<8x128xf32>
    %24 = math.exp %23 : vector<8x128xf32>
    %cst_22 = arith.constant 1.000000e+00 : f32
    %25 = vector.broadcast %cst_22 : f32 to vector<8x128xf32>
    %26 = arith.addf %25, %24 : vector<8x128xf32>
    %27 = arith.divf %25, %26 : vector<8x128xf32>
    %28 = vector.extract_strided_slice %21 {offsets = [0, 128], sizes = [8, 128], strides = [1, 1]} : vector<8x512xf32> to vector<8x128xf32>
    %29 = arith.negf %28 : vector<8x128xf32>
    %30 = math.exp %29 : vector<8x128xf32>
    %cst_23 = arith.constant 1.000000e+00 : f32
    %31 = vector.broadcast %cst_23 : f32 to vector<8x128xf32>
    %32 = arith.addf %31, %30 : vector<8x128xf32>
    %33 = arith.divf %31, %32 : vector<8x128xf32>
    %34 = vector.extract_strided_slice %21 {offsets = [0, 256], sizes = [8, 128], strides = [1, 1]} : vector<8x512xf32> to vector<8x128xf32>
    %35 = math.tanh %34 : vector<8x128xf32>
    %36 = vector.extract_strided_slice %21 {offsets = [0, 384], sizes = [8, 128], strides = [1, 1]} : vector<8x512xf32> to vector<8x128xf32>
    %37 = arith.negf %36 : vector<8x128xf32>
    %38 = math.exp %37 : vector<8x128xf32>
    %cst_24 = arith.constant 1.000000e+00 : f32
    %39 = vector.broadcast %cst_24 : f32 to vector<8x128xf32>
    %40 = arith.addf %39, %38 : vector<8x128xf32>
    %41 = arith.divf %39, %40 : vector<8x128xf32>
    %42 = arith.mulf %33, %16 : vector<8x128xf32>
    %43 = arith.mulf %27, %35 : vector<8x128xf32>
    %44 = arith.addf %42, %43 : vector<8x128xf32>
    %45 = math.tanh %44 : vector<8x128xf32>
    %46 = arith.mulf %41, %45 : vector<8x128xf32>
    %47 = arith.addi %14, %c0_i32_18 : i32
    %48 = vector.broadcast %47 : i32 to vector<8x1xi32>
    %49 = arith.cmpi slt, %48, %13 : vector<8x1xi32>
    %cst_25 = arith.constant 0.000000e+00 : f32
    %50 = vector.shape_cast %49 : vector<8x1xi1> to vector<8x1xi1>
    %51 = vector.broadcast %50 : vector<8x1xi1> to vector<8x128xi1>
    %52 = vector.broadcast %cst_25 : f32 to vector<8x128xf32>
    %53 = arith.select %51, %46, %52 : vector<8x128xi1>, vector<8x128xf32>
    %54 = arith.index_cast %c0_i32_18 : i32 to index
    %c0_26 = arith.constant 0 : index
    %c0_27 = arith.constant 0 : index
    %55 = vector.load %arg6[%54, %c0_26, %c0_27] : memref<8x8x128xf32, #tpu.memory_space<vmem>>, vector<1x8x128xf32>
    %56 = vector.shape_cast %55 : vector<1x8x128xf32> to vector<8x128xf32>
    %57 = vector.shape_cast %53 : vector<8x128xf32> to vector<1x8x128xf32>
    tpu.vector_store %arg6[%54, %c0_26, %c0_27], %57 {strides = array<i32>} : memref<8x8x128xf32, #tpu.memory_space<vmem>>, vector<1x8x128xf32>,
    %58 = vector.shape_cast %49 : vector<8x1xi1> to vector<8x1xi1>
    %59 = vector.broadcast %58 : vector<8x1xi1> to vector<8x128xi1>
    %60 = arith.select %59, %46, %15 : vector<8x128xi1>, vector<8x128xf32>
    %61 = vector.shape_cast %49 : vector<8x1xi1> to vector<8x1xi1>
    %62 = vector.broadcast %61 : vector<8x1xi1> to vector<8x128xi1>
    %63 = arith.select %62, %44, %16 : vector<8x128xi1>, vector<8x128xf32>
    %c1_i32 = arith.constant 1 : i32
    %64 = arith.index_cast %c1_i32 : i32 to index
    %c0_28 = arith.constant 0 : index
    %c0_29 = arith.constant 0 : index
    %65 = vector.load %arg9[%64, %c0_28, %c0_29] : memref<8x8x512xf32, #tpu.memory_space<vmem>>, vector<1x8x512xf32>
    %66 = vector.shape_cast %65 : vector<1x8x512xf32> to vector<8x512xf32>
    %cst_30 = arith.constant dense<0.000000e+00> : vector<8x512xf32>
    %67 = tpu.matmul %60, %12, %cst_30 {dimension_numbers = #tpu.dot_dimension_numbers<[1], [0], [0], [1], [0, 0, 1, 1], [], []>} : vector<8x128xf32>, vector<128x512xf32>, vector<8x512xf32> -> vector<8x512xf32>
    %68 = arith.addf %66, %67 : vector<8x512xf32>
    %69 = vector.extract_strided_slice %68 {offsets = [0, 0], sizes = [8, 128], strides = [1, 1]} : vector<8x512xf32> to vector<8x128xf32>
    %70 = arith.negf %69 : vector<8x128xf32>
    %71 = math.exp %70 : vector<8x128xf32>
    %cst_31 = arith.constant 1.000000e+00 : f32
    %72 = vector.broadcast %cst_31 : f32 to vector<8x128xf32>
    %73 = arith.addf %72, %71 : vector<8x128xf32>
    %74 = arith.divf %72, %73 : vector<8x128xf32>
    %75 = vector.extract_strided_slice %68 {offsets = [0, 128], sizes = [8, 128], strides = [1, 1]} : vector<8x512xf32> to vector<8x128xf32>
    %76 = arith.negf %75 : vector<8x128xf32>
    %77 = math.exp %76 : vector<8x128xf32>
    %cst_32 = arith.constant 1.000000e+00 : f32
    %78 = vector.broadcast %cst_32 : f32 to vector<8x128xf32>
    %79 = arith.addf %78, %77 : vector<8x128xf32>
    %80 = arith.divf %78, %79 : vector<8x128xf32>
    %81 = vector.extract_strided_slice %68 {offsets = [0, 256], sizes = [8, 128], strides = [1, 1]} : vector<8x512xf32> to vector<8x128xf32>
    %82 = math.tanh %81 : vector<8x128xf32>
    %83 = vector.extract_strided_slice %68 {offsets = [0, 384], sizes = [8, 128], strides = [1, 1]} : vector<8x512xf32> to vector<8x128xf32>
    %84 = arith.negf %83 : vector<8x128xf32>
    %85 = math.exp %84 : vector<8x128xf32>
    %cst_33 = arith.constant 1.000000e+00 : f32
    %86 = vector.broadcast %cst_33 : f32 to vector<8x128xf32>
    %87 = arith.addf %86, %85 : vector<8x128xf32>
    %88 = arith.divf %86, %87 : vector<8x128xf32>
    %89 = arith.mulf %80, %63 : vector<8x128xf32>
    %90 = arith.mulf %74, %82 : vector<8x128xf32>
    %91 = arith.addf %89, %90 : vector<8x128xf32>
    %92 = math.tanh %91 : vector<8x128xf32>
    %93 = arith.mulf %88, %92 : vector<8x128xf32>
    %94 = arith.addi %14, %c1_i32 : i32
    %95 = vector.broadcast %94 : i32 to vector<8x1xi32>
    %96 = arith.cmpi slt, %95, %13 : vector<8x1xi32>
    %cst_34 = arith.constant 0.000000e+00 : f32
    %97 = vector.shape_cast %96 : vector<8x1xi1> to vector<8x1xi1>
    %98 = vector.broadcast %97 : vector<8x1xi1> to vector<8x128xi1>
    %99 = vector.broadcast %cst_34 : f32 to vector<8x128xf32>
    %100 = arith.select %98, %93, %99 : vector<8x128xi1>, vector<8x128xf32>
    %101 = arith.index_cast %c1_i32 : i32 to index
    %c0_35 = arith.constant 0 : index
    %c0_36 = arith.constant 0 : index
    %102 = vector.load %arg6[%101, %c0_35, %c0_36] : memref<8x8x128xf32, #tpu.memory_space<vmem>>, vector<1x8x128xf32>
    %103 = vector.shape_cast %102 : vector<1x8x128xf32> to vector<8x128xf32>
    %104 = vector.shape_cast %100 : vector<8x128xf32> to vector<1x8x128xf32>
    tpu.vector_store %arg6[%101, %c0_35, %c0_36], %104 {strides = array<i32>} : memref<8x8x128xf32, #tpu.memory_space<vmem>>, vector<1x8x128xf32>,
    %105 = vector.shape_cast %96 : vector<8x1xi1> to vector<8x1xi1>
    %106 = vector.broadcast %105 : vector<8x1xi1> to vector<8x128xi1>
    %107 = arith.select %106, %93, %60 : vector<8x128xi1>, vector<8x128xf32>
    %108 = vector.shape_cast %96 : vector<8x1xi1> to vector<8x1xi1>
    %109 = vector.broadcast %108 : vector<8x1xi1> to vector<8x128xi1>
    %110 = arith.select %109, %91, %63 : vector<8x128xi1>, vector<8x128xf32>
    %c2_i32 = arith.constant 2 : i32
    %111 = arith.index_cast %c2_i32 : i32 to index
    %c0_37 = arith.constant 0 : index
    %c0_38 = arith.constant 0 : index
    %112 = vector.load %arg9[%111, %c0_37, %c0_38] : memref<8x8x512xf32, #tpu.memory_space<vmem>>, vector<1x8x512xf32>
    %113 = vector.shape_cast %112 : vector<1x8x512xf32> to vector<8x512xf32>
    %cst_39 = arith.constant dense<0.000000e+00> : vector<8x512xf32>
    %114 = tpu.matmul %107, %12, %cst_39 {dimension_numbers = #tpu.dot_dimension_numbers<[1], [0], [0], [1], [0, 0, 1, 1], [], []>} : vector<8x128xf32>, vector<128x512xf32>, vector<8x512xf32> -> vector<8x512xf32>
    %115 = arith.addf %113, %114 : vector<8x512xf32>
    %116 = vector.extract_strided_slice %115 {offsets = [0, 0], sizes = [8, 128], strides = [1, 1]} : vector<8x512xf32> to vector<8x128xf32>
    %117 = arith.negf %116 : vector<8x128xf32>
    %118 = math.exp %117 : vector<8x128xf32>
    %cst_40 = arith.constant 1.000000e+00 : f32
    %119 = vector.broadcast %cst_40 : f32 to vector<8x128xf32>
    %120 = arith.addf %119, %118 : vector<8x128xf32>
    %121 = arith.divf %119, %120 : vector<8x128xf32>
    %122 = vector.extract_strided_slice %115 {offsets = [0, 128], sizes = [8, 128], strides = [1, 1]} : vector<8x512xf32> to vector<8x128xf32>
    %123 = arith.negf %122 : vector<8x128xf32>
    %124 = math.exp %123 : vector<8x128xf32>
    %cst_41 = arith.constant 1.000000e+00 : f32
    %125 = vector.broadcast %cst_41 : f32 to vector<8x128xf32>
    %126 = arith.addf %125, %124 : vector<8x128xf32>
    %127 = arith.divf %125, %126 : vector<8x128xf32>
    %128 = vector.extract_strided_slice %115 {offsets = [0, 256], sizes = [8, 128], strides = [1, 1]} : vector<8x512xf32> to vector<8x128xf32>
    %129 = math.tanh %128 : vector<8x128xf32>
    %130 = vector.extract_strided_slice %115 {offsets = [0, 384], sizes = [8, 128], strides = [1, 1]} : vector<8x512xf32> to vector<8x128xf32>
    %131 = arith.negf %130 : vector<8x128xf32>
    %132 = math.exp %131 : vector<8x128xf32>
    %cst_42 = arith.constant 1.000000e+00 : f32
    %133 = vector.broadcast %cst_42 : f32 to vector<8x128xf32>
    %134 = arith.addf %133, %132 : vector<8x128xf32>
    %135 = arith.divf %133, %134 : vector<8x128xf32>
    %136 = arith.mulf %127, %110 : vector<8x128xf32>
    %137 = arith.mulf %121, %129 : vector<8x128xf32>
    %138 = arith.addf %136, %137 : vector<8x128xf32>
    %139 = math.tanh %138 : vector<8x128xf32>
    %140 = arith.mulf %135, %139 : vector<8x128xf32>
    %141 = arith.addi %14, %c2_i32 : i32
    %142 = vector.broadcast %141 : i32 to vector<8x1xi32>
    %143 = arith.cmpi slt, %142, %13 : vector<8x1xi32>
    %cst_43 = arith.constant 0.000000e+00 : f32
    %144 = vector.shape_cast %143 : vector<8x1xi1> to vector<8x1xi1>
    %145 = vector.broadcast %144 : vector<8x1xi1> to vector<8x128xi1>
    %146 = vector.broadcast %cst_43 : f32 to vector<8x128xf32>
    %147 = arith.select %145, %140, %146 : vector<8x128xi1>, vector<8x128xf32>
    %148 = arith.index_cast %c2_i32 : i32 to index
    %c0_44 = arith.constant 0 : index
    %c0_45 = arith.constant 0 : index
    %149 = vector.load %arg6[%148, %c0_44, %c0_45] : memref<8x8x128xf32, #tpu.memory_space<vmem>>, vector<1x8x128xf32>
    %150 = vector.shape_cast %149 : vector<1x8x128xf32> to vector<8x128xf32>
    %151 = vector.shape_cast %147 : vector<8x128xf32> to vector<1x8x128xf32>
    tpu.vector_store %arg6[%148, %c0_44, %c0_45], %151 {strides = array<i32>} : memref<8x8x128xf32, #tpu.memory_space<vmem>>, vector<1x8x128xf32>,
    %152 = vector.shape_cast %143 : vector<8x1xi1> to vector<8x1xi1>
    %153 = vector.broadcast %152 : vector<8x1xi1> to vector<8x128xi1>
    %154 = arith.select %153, %140, %107 : vector<8x128xi1>, vector<8x128xf32>
    %155 = vector.shape_cast %143 : vector<8x1xi1> to vector<8x1xi1>
    %156 = vector.broadcast %155 : vector<8x1xi1> to vector<8x128xi1>
    %157 = arith.select %156, %138, %110 : vector<8x128xi1>, vector<8x128xf32>
    %c3_i32 = arith.constant 3 : i32
    %158 = arith.index_cast %c3_i32 : i32 to index
    %c0_46 = arith.constant 0 : index
    %c0_47 = arith.constant 0 : index
    %159 = vector.load %arg9[%158, %c0_46, %c0_47] : memref<8x8x512xf32, #tpu.memory_space<vmem>>, vector<1x8x512xf32>
    %160 = vector.shape_cast %159 : vector<1x8x512xf32> to vector<8x512xf32>
    %cst_48 = arith.constant dense<0.000000e+00> : vector<8x512xf32>
    %161 = tpu.matmul %154, %12, %cst_48 {dimension_numbers = #tpu.dot_dimension_numbers<[1], [0], [0], [1], [0, 0, 1, 1], [], []>} : vector<8x128xf32>, vector<128x512xf32>, vector<8x512xf32> -> vector<8x512xf32>
    %162 = arith.addf %160, %161 : vector<8x512xf32>
    %163 = vector.extract_strided_slice %162 {offsets = [0, 0], sizes = [8, 128], strides = [1, 1]} : vector<8x512xf32> to vector<8x128xf32>
    %164 = arith.negf %163 : vector<8x128xf32>
    %165 = math.exp %164 : vector<8x128xf32>
    %cst_49 = arith.constant 1.000000e+00 : f32
    %166 = vector.broadcast %cst_49 : f32 to vector<8x128xf32>
    %167 = arith.addf %166, %165 : vector<8x128xf32>
    %168 = arith.divf %166, %167 : vector<8x128xf32>
    %169 = vector.extract_strided_slice %162 {offsets = [0, 128], sizes = [8, 128], strides = [1, 1]} : vector<8x512xf32> to vector<8x128xf32>
    %170 = arith.negf %169 : vector<8x128xf32>
    %171 = math.exp %170 : vector<8x128xf32>
    %cst_50 = arith.constant 1.000000e+00 : f32
    %172 = vector.broadcast %cst_50 : f32 to vector<8x128xf32>
    %173 = arith.addf %172, %171 : vector<8x128xf32>
    %174 = arith.divf %172, %173 : vector<8x128xf32>
    %175 = vector.extract_strided_slice %162 {offsets = [0, 256], sizes = [8, 128], strides = [1, 1]} : vector<8x512xf32> to vector<8x128xf32>
    %176 = math.tanh %175 : vector<8x128xf32>
    %177 = vector.extract_strided_slice %162 {offsets = [0, 384], sizes = [8, 128], strides = [1, 1]} : vector<8x512xf32> to vector<8x128xf32>
    %178 = arith.negf %177 : vector<8x128xf32>
    %179 = math.exp %178 : vector<8x128xf32>
    %cst_51 = arith.constant 1.000000e+00 : f32
    %180 = vector.broadcast %cst_51 : f32 to vector<8x128xf32>
    %181 = arith.addf %180, %179 : vector<8x128xf32>
    %182 = arith.divf %180, %181 : vector<8x128xf32>
    %183 = arith.mulf %174, %157 : vector<8x128xf32>
    %184 = arith.mulf %168, %176 : vector<8x128xf32>
    %185 = arith.addf %183, %184 : vector<8x128xf32>
    %186 = math.tanh %185 : vector<8x128xf32>
    %187 = arith.mulf %182, %186 : vector<8x128xf32>
    %188 = arith.addi %14, %c3_i32 : i32
    %189 = vector.broadcast %188 : i32 to vector<8x1xi32>
    %190 = arith.cmpi slt, %189, %13 : vector<8x1xi32>
    %cst_52 = arith.constant 0.000000e+00 : f32
    %191 = vector.shape_cast %190 : vector<8x1xi1> to vector<8x1xi1>
    %192 = vector.broadcast %191 : vector<8x1xi1> to vector<8x128xi1>
    %193 = vector.broadcast %cst_52 : f32 to vector<8x128xf32>
    %194 = arith.select %192, %187, %193 : vector<8x128xi1>, vector<8x128xf32>
    %195 = arith.index_cast %c3_i32 : i32 to index
    %c0_53 = arith.constant 0 : index
    %c0_54 = arith.constant 0 : index
    %196 = vector.load %arg6[%195, %c0_53, %c0_54] : memref<8x8x128xf32, #tpu.memory_space<vmem>>, vector<1x8x128xf32>
    %197 = vector.shape_cast %196 : vector<1x8x128xf32> to vector<8x128xf32>
    %198 = vector.shape_cast %194 : vector<8x128xf32> to vector<1x8x128xf32>
    tpu.vector_store %arg6[%195, %c0_53, %c0_54], %198 {strides = array<i32>} : memref<8x8x128xf32, #tpu.memory_space<vmem>>, vector<1x8x128xf32>,
    %199 = vector.shape_cast %190 : vector<8x1xi1> to vector<8x1xi1>
    %200 = vector.broadcast %199 : vector<8x1xi1> to vector<8x128xi1>
    %201 = arith.select %200, %187, %154 : vector<8x128xi1>, vector<8x128xf32>
    %202 = vector.shape_cast %190 : vector<8x1xi1> to vector<8x1xi1>
    %203 = vector.broadcast %202 : vector<8x1xi1> to vector<8x128xi1>
    %204 = arith.select %203, %185, %157 : vector<8x128xi1>, vector<8x128xf32>
    %c4_i32 = arith.constant 4 : i32
    %205 = arith.index_cast %c4_i32 : i32 to index
    %c0_55 = arith.constant 0 : index
    %c0_56 = arith.constant 0 : index
    %206 = vector.load %arg9[%205, %c0_55, %c0_56] : memref<8x8x512xf32, #tpu.memory_space<vmem>>, vector<1x8x512xf32>
    %207 = vector.shape_cast %206 : vector<1x8x512xf32> to vector<8x512xf32>
    %cst_57 = arith.constant dense<0.000000e+00> : vector<8x512xf32>
    %208 = tpu.matmul %201, %12, %cst_57 {dimension_numbers = #tpu.dot_dimension_numbers<[1], [0], [0], [1], [0, 0, 1, 1], [], []>} : vector<8x128xf32>, vector<128x512xf32>, vector<8x512xf32> -> vector<8x512xf32>
    %209 = arith.addf %207, %208 : vector<8x512xf32>
    %210 = vector.extract_strided_slice %209 {offsets = [0, 0], sizes = [8, 128], strides = [1, 1]} : vector<8x512xf32> to vector<8x128xf32>
    %211 = arith.negf %210 : vector<8x128xf32>
    %212 = math.exp %211 : vector<8x128xf32>
    %cst_58 = arith.constant 1.000000e+00 : f32
    %213 = vector.broadcast %cst_58 : f32 to vector<8x128xf32>
    %214 = arith.addf %213, %212 : vector<8x128xf32>
    %215 = arith.divf %213, %214 : vector<8x128xf32>
    %216 = vector.extract_strided_slice %209 {offsets = [0, 128], sizes = [8, 128], strides = [1, 1]} : vector<8x512xf32> to vector<8x128xf32>
    %217 = arith.negf %216 : vector<8x128xf32>
    %218 = math.exp %217 : vector<8x128xf32>
    %cst_59 = arith.constant 1.000000e+00 : f32
    %219 = vector.broadcast %cst_59 : f32 to vector<8x128xf32>
    %220 = arith.addf %219, %218 : vector<8x128xf32>
    %221 = arith.divf %219, %220 : vector<8x128xf32>
    %222 = vector.extract_strided_slice %209 {offsets = [0, 256], sizes = [8, 128], strides = [1, 1]} : vector<8x512xf32> to vector<8x128xf32>
    %223 = math.tanh %222 : vector<8x128xf32>
    %224 = vector.extract_strided_slice %209 {offsets = [0, 384], sizes = [8, 128], strides = [1, 1]} : vector<8x512xf32> to vector<8x128xf32>
    %225 = arith.negf %224 : vector<8x128xf32>
    %226 = math.exp %225 : vector<8x128xf32>
    %cst_60 = arith.constant 1.000000e+00 : f32
    %227 = vector.broadcast %cst_60 : f32 to vector<8x128xf32>
    %228 = arith.addf %227, %226 : vector<8x128xf32>
    %229 = arith.divf %227, %228 : vector<8x128xf32>
    %230 = arith.mulf %221, %204 : vector<8x128xf32>
    %231 = arith.mulf %215, %223 : vector<8x128xf32>
    %232 = arith.addf %230, %231 : vector<8x128xf32>
    %233 = math.tanh %232 : vector<8x128xf32>
    %234 = arith.mulf %229, %233 : vector<8x128xf32>
    %235 = arith.addi %14, %c4_i32 : i32
    %236 = vector.broadcast %235 : i32 to vector<8x1xi32>
    %237 = arith.cmpi slt, %236, %13 : vector<8x1xi32>
    %cst_61 = arith.constant 0.000000e+00 : f32
    %238 = vector.shape_cast %237 : vector<8x1xi1> to vector<8x1xi1>
    %239 = vector.broadcast %238 : vector<8x1xi1> to vector<8x128xi1>
    %240 = vector.broadcast %cst_61 : f32 to vector<8x128xf32>
    %241 = arith.select %239, %234, %240 : vector<8x128xi1>, vector<8x128xf32>
    %242 = arith.index_cast %c4_i32 : i32 to index
    %c0_62 = arith.constant 0 : index
    %c0_63 = arith.constant 0 : index
    %243 = vector.load %arg6[%242, %c0_62, %c0_63] : memref<8x8x128xf32, #tpu.memory_space<vmem>>, vector<1x8x128xf32>
    %244 = vector.shape_cast %243 : vector<1x8x128xf32> to vector<8x128xf32>
    %245 = vector.shape_cast %241 : vector<8x128xf32> to vector<1x8x128xf32>
    tpu.vector_store %arg6[%242, %c0_62, %c0_63], %245 {strides = array<i32>} : memref<8x8x128xf32, #tpu.memory_space<vmem>>, vector<1x8x128xf32>,
    %246 = vector.shape_cast %237 : vector<8x1xi1> to vector<8x1xi1>
    %247 = vector.broadcast %246 : vector<8x1xi1> to vector<8x128xi1>
    %248 = arith.select %247, %234, %201 : vector<8x128xi1>, vector<8x128xf32>
    %249 = vector.shape_cast %237 : vector<8x1xi1> to vector<8x1xi1>
    %250 = vector.broadcast %249 : vector<8x1xi1> to vector<8x128xi1>
    %251 = arith.select %250, %232, %204 : vector<8x128xi1>, vector<8x128xf32>
    %c5_i32 = arith.constant 5 : i32
    %252 = arith.index_cast %c5_i32 : i32 to index
    %c0_64 = arith.constant 0 : index
    %c0_65 = arith.constant 0 : index
    %253 = vector.load %arg9[%252, %c0_64, %c0_65] : memref<8x8x512xf32, #tpu.memory_space<vmem>>, vector<1x8x512xf32>
    %254 = vector.shape_cast %253 : vector<1x8x512xf32> to vector<8x512xf32>
    %cst_66 = arith.constant dense<0.000000e+00> : vector<8x512xf32>
    %255 = tpu.matmul %248, %12, %cst_66 {dimension_numbers = #tpu.dot_dimension_numbers<[1], [0], [0], [1], [0, 0, 1, 1], [], []>} : vector<8x128xf32>, vector<128x512xf32>, vector<8x512xf32> -> vector<8x512xf32>
    %256 = arith.addf %254, %255 : vector<8x512xf32>
    %257 = vector.extract_strided_slice %256 {offsets = [0, 0], sizes = [8, 128], strides = [1, 1]} : vector<8x512xf32> to vector<8x128xf32>
    %258 = arith.negf %257 : vector<8x128xf32>
    %259 = math.exp %258 : vector<8x128xf32>
    %cst_67 = arith.constant 1.000000e+00 : f32
    %260 = vector.broadcast %cst_67 : f32 to vector<8x128xf32>
    %261 = arith.addf %260, %259 : vector<8x128xf32>
    %262 = arith.divf %260, %261 : vector<8x128xf32>
    %263 = vector.extract_strided_slice %256 {offsets = [0, 128], sizes = [8, 128], strides = [1, 1]} : vector<8x512xf32> to vector<8x128xf32>
    %264 = arith.negf %263 : vector<8x128xf32>
    %265 = math.exp %264 : vector<8x128xf32>
    %cst_68 = arith.constant 1.000000e+00 : f32
    %266 = vector.broadcast %cst_68 : f32 to vector<8x128xf32>
    %267 = arith.addf %266, %265 : vector<8x128xf32>
    %268 = arith.divf %266, %267 : vector<8x128xf32>
    %269 = vector.extract_strided_slice %256 {offsets = [0, 256], sizes = [8, 128], strides = [1, 1]} : vector<8x512xf32> to vector<8x128xf32>
    %270 = math.tanh %269 : vector<8x128xf32>
    %271 = vector.extract_strided_slice %256 {offsets = [0, 384], sizes = [8, 128], strides = [1, 1]} : vector<8x512xf32> to vector<8x128xf32>
    %272 = arith.negf %271 : vector<8x128xf32>
    %273 = math.exp %272 : vector<8x128xf32>
    %cst_69 = arith.constant 1.000000e+00 : f32
    %274 = vector.broadcast %cst_69 : f32 to vector<8x128xf32>
    %275 = arith.addf %274, %273 : vector<8x128xf32>
    %276 = arith.divf %274, %275 : vector<8x128xf32>
    %277 = arith.mulf %268, %251 : vector<8x128xf32>
    %278 = arith.mulf %262, %270 : vector<8x128xf32>
    %279 = arith.addf %277, %278 : vector<8x128xf32>
    %280 = math.tanh %279 : vector<8x128xf32>
    %281 = arith.mulf %276, %280 : vector<8x128xf32>
    %282 = arith.addi %14, %c5_i32 : i32
    %283 = vector.broadcast %282 : i32 to vector<8x1xi32>
    %284 = arith.cmpi slt, %283, %13 : vector<8x1xi32>
    %cst_70 = arith.constant 0.000000e+00 : f32
    %285 = vector.shape_cast %284 : vector<8x1xi1> to vector<8x1xi1>
    %286 = vector.broadcast %285 : vector<8x1xi1> to vector<8x128xi1>
    %287 = vector.broadcast %cst_70 : f32 to vector<8x128xf32>
    %288 = arith.select %286, %281, %287 : vector<8x128xi1>, vector<8x128xf32>
    %289 = arith.index_cast %c5_i32 : i32 to index
    %c0_71 = arith.constant 0 : index
    %c0_72 = arith.constant 0 : index
    %290 = vector.load %arg6[%289, %c0_71, %c0_72] : memref<8x8x128xf32, #tpu.memory_space<vmem>>, vector<1x8x128xf32>
    %291 = vector.shape_cast %290 : vector<1x8x128xf32> to vector<8x128xf32>
    %292 = vector.shape_cast %288 : vector<8x128xf32> to vector<1x8x128xf32>
    tpu.vector_store %arg6[%289, %c0_71, %c0_72], %292 {strides = array<i32>} : memref<8x8x128xf32, #tpu.memory_space<vmem>>, vector<1x8x128xf32>,
    %293 = vector.shape_cast %284 : vector<8x1xi1> to vector<8x1xi1>
    %294 = vector.broadcast %293 : vector<8x1xi1> to vector<8x128xi1>
    %295 = arith.select %294, %281, %248 : vector<8x128xi1>, vector<8x128xf32>
    %296 = vector.shape_cast %284 : vector<8x1xi1> to vector<8x1xi1>
    %297 = vector.broadcast %296 : vector<8x1xi1> to vector<8x128xi1>
    %298 = arith.select %297, %279, %251 : vector<8x128xi1>, vector<8x128xf32>
    %c6_i32 = arith.constant 6 : i32
    %299 = arith.index_cast %c6_i32 : i32 to index
    %c0_73 = arith.constant 0 : index
    %c0_74 = arith.constant 0 : index
    %300 = vector.load %arg9[%299, %c0_73, %c0_74] : memref<8x8x512xf32, #tpu.memory_space<vmem>>, vector<1x8x512xf32>
    %301 = vector.shape_cast %300 : vector<1x8x512xf32> to vector<8x512xf32>
    %cst_75 = arith.constant dense<0.000000e+00> : vector<8x512xf32>
    %302 = tpu.matmul %295, %12, %cst_75 {dimension_numbers = #tpu.dot_dimension_numbers<[1], [0], [0], [1], [0, 0, 1, 1], [], []>} : vector<8x128xf32>, vector<128x512xf32>, vector<8x512xf32> -> vector<8x512xf32>
    %303 = arith.addf %301, %302 : vector<8x512xf32>
    %304 = vector.extract_strided_slice %303 {offsets = [0, 0], sizes = [8, 128], strides = [1, 1]} : vector<8x512xf32> to vector<8x128xf32>
    %305 = arith.negf %304 : vector<8x128xf32>
    %306 = math.exp %305 : vector<8x128xf32>
    %cst_76 = arith.constant 1.000000e+00 : f32
    %307 = vector.broadcast %cst_76 : f32 to vector<8x128xf32>
    %308 = arith.addf %307, %306 : vector<8x128xf32>
    %309 = arith.divf %307, %308 : vector<8x128xf32>
    %310 = vector.extract_strided_slice %303 {offsets = [0, 128], sizes = [8, 128], strides = [1, 1]} : vector<8x512xf32> to vector<8x128xf32>
    %311 = arith.negf %310 : vector<8x128xf32>
    %312 = math.exp %311 : vector<8x128xf32>
    %cst_77 = arith.constant 1.000000e+00 : f32
    %313 = vector.broadcast %cst_77 : f32 to vector<8x128xf32>
    %314 = arith.addf %313, %312 : vector<8x128xf32>
    %315 = arith.divf %313, %314 : vector<8x128xf32>
    %316 = vector.extract_strided_slice %303 {offsets = [0, 256], sizes = [8, 128], strides = [1, 1]} : vector<8x512xf32> to vector<8x128xf32>
    %317 = math.tanh %316 : vector<8x128xf32>
    %318 = vector.extract_strided_slice %303 {offsets = [0, 384], sizes = [8, 128], strides = [1, 1]} : vector<8x512xf32> to vector<8x128xf32>
    %319 = arith.negf %318 : vector<8x128xf32>
    %320 = math.exp %319 : vector<8x128xf32>
    %cst_78 = arith.constant 1.000000e+00 : f32
    %321 = vector.broadcast %cst_78 : f32 to vector<8x128xf32>
    %322 = arith.addf %321, %320 : vector<8x128xf32>
    %323 = arith.divf %321, %322 : vector<8x128xf32>
    %324 = arith.mulf %315, %298 : vector<8x128xf32>
    %325 = arith.mulf %309, %317 : vector<8x128xf32>
    %326 = arith.addf %324, %325 : vector<8x128xf32>
    %327 = math.tanh %326 : vector<8x128xf32>
    %328 = arith.mulf %323, %327 : vector<8x128xf32>
    %329 = arith.addi %14, %c6_i32 : i32
    %330 = vector.broadcast %329 : i32 to vector<8x1xi32>
    %331 = arith.cmpi slt, %330, %13 : vector<8x1xi32>
    %cst_79 = arith.constant 0.000000e+00 : f32
    %332 = vector.shape_cast %331 : vector<8x1xi1> to vector<8x1xi1>
    %333 = vector.broadcast %332 : vector<8x1xi1> to vector<8x128xi1>
    %334 = vector.broadcast %cst_79 : f32 to vector<8x128xf32>
    %335 = arith.select %333, %328, %334 : vector<8x128xi1>, vector<8x128xf32>
    %336 = arith.index_cast %c6_i32 : i32 to index
    %c0_80 = arith.constant 0 : index
    %c0_81 = arith.constant 0 : index
    %337 = vector.load %arg6[%336, %c0_80, %c0_81] : memref<8x8x128xf32, #tpu.memory_space<vmem>>, vector<1x8x128xf32>
    %338 = vector.shape_cast %337 : vector<1x8x128xf32> to vector<8x128xf32>
    %339 = vector.shape_cast %335 : vector<8x128xf32> to vector<1x8x128xf32>
    tpu.vector_store %arg6[%336, %c0_80, %c0_81], %339 {strides = array<i32>} : memref<8x8x128xf32, #tpu.memory_space<vmem>>, vector<1x8x128xf32>,
    %340 = vector.shape_cast %331 : vector<8x1xi1> to vector<8x1xi1>
    %341 = vector.broadcast %340 : vector<8x1xi1> to vector<8x128xi1>
    %342 = arith.select %341, %328, %295 : vector<8x128xi1>, vector<8x128xf32>
    %343 = vector.shape_cast %331 : vector<8x1xi1> to vector<8x1xi1>
    %344 = vector.broadcast %343 : vector<8x1xi1> to vector<8x128xi1>
    %345 = arith.select %344, %326, %298 : vector<8x128xi1>, vector<8x128xf32>
    %c7_i32 = arith.constant 7 : i32
    %346 = arith.index_cast %c7_i32 : i32 to index
    %c0_82 = arith.constant 0 : index
    %c0_83 = arith.constant 0 : index
    %347 = vector.load %arg9[%346, %c0_82, %c0_83] : memref<8x8x512xf32, #tpu.memory_space<vmem>>, vector<1x8x512xf32>
    %348 = vector.shape_cast %347 : vector<1x8x512xf32> to vector<8x512xf32>
    %cst_84 = arith.constant dense<0.000000e+00> : vector<8x512xf32>
    %349 = tpu.matmul %342, %12, %cst_84 {dimension_numbers = #tpu.dot_dimension_numbers<[1], [0], [0], [1], [0, 0, 1, 1], [], []>} : vector<8x128xf32>, vector<128x512xf32>, vector<8x512xf32> -> vector<8x512xf32>
    %350 = arith.addf %348, %349 : vector<8x512xf32>
    %351 = vector.extract_strided_slice %350 {offsets = [0, 0], sizes = [8, 128], strides = [1, 1]} : vector<8x512xf32> to vector<8x128xf32>
    %352 = arith.negf %351 : vector<8x128xf32>
    %353 = math.exp %352 : vector<8x128xf32>
    %cst_85 = arith.constant 1.000000e+00 : f32
    %354 = vector.broadcast %cst_85 : f32 to vector<8x128xf32>
    %355 = arith.addf %354, %353 : vector<8x128xf32>
    %356 = arith.divf %354, %355 : vector<8x128xf32>
    %357 = vector.extract_strided_slice %350 {offsets = [0, 128], sizes = [8, 128], strides = [1, 1]} : vector<8x512xf32> to vector<8x128xf32>
    %358 = arith.negf %357 : vector<8x128xf32>
    %359 = math.exp %358 : vector<8x128xf32>
    %cst_86 = arith.constant 1.000000e+00 : f32
    %360 = vector.broadcast %cst_86 : f32 to vector<8x128xf32>
    %361 = arith.addf %360, %359 : vector<8x128xf32>
    %362 = arith.divf %360, %361 : vector<8x128xf32>
    %363 = vector.extract_strided_slice %350 {offsets = [0, 256], sizes = [8, 128], strides = [1, 1]} : vector<8x512xf32> to vector<8x128xf32>
    %364 = math.tanh %363 : vector<8x128xf32>
    %365 = vector.extract_strided_slice %350 {offsets = [0, 384], sizes = [8, 128], strides = [1, 1]} : vector<8x512xf32> to vector<8x128xf32>
    %366 = arith.negf %365 : vector<8x128xf32>
    %367 = math.exp %366 : vector<8x128xf32>
    %cst_87 = arith.constant 1.000000e+00 : f32
    %368 = vector.broadcast %cst_87 : f32 to vector<8x128xf32>
    %369 = arith.addf %368, %367 : vector<8x128xf32>
    %370 = arith.divf %368, %369 : vector<8x128xf32>
    %371 = arith.mulf %362, %345 : vector<8x128xf32>
    %372 = arith.mulf %356, %364 : vector<8x128xf32>
    %373 = arith.addf %371, %372 : vector<8x128xf32>
    %374 = math.tanh %373 : vector<8x128xf32>
    %375 = arith.mulf %370, %374 : vector<8x128xf32>
    %376 = arith.addi %14, %c7_i32 : i32
    %377 = vector.broadcast %376 : i32 to vector<8x1xi32>
    %378 = arith.cmpi slt, %377, %13 : vector<8x1xi32>
    %cst_88 = arith.constant 0.000000e+00 : f32
    %379 = vector.shape_cast %378 : vector<8x1xi1> to vector<8x1xi1>
    %380 = vector.broadcast %379 : vector<8x1xi1> to vector<8x128xi1>
    %381 = vector.broadcast %cst_88 : f32 to vector<8x128xf32>
    %382 = arith.select %380, %375, %381 : vector<8x128xi1>, vector<8x128xf32>
    %383 = arith.index_cast %c7_i32 : i32 to index
    %c0_89 = arith.constant 0 : index
    %c0_90 = arith.constant 0 : index
    %384 = vector.load %arg6[%383, %c0_89, %c0_90] : memref<8x8x128xf32, #tpu.memory_space<vmem>>, vector<1x8x128xf32>
    %385 = vector.shape_cast %384 : vector<1x8x128xf32> to vector<8x128xf32>
    %386 = vector.shape_cast %382 : vector<8x128xf32> to vector<1x8x128xf32>
    tpu.vector_store %arg6[%383, %c0_89, %c0_90], %386 {strides = array<i32>} : memref<8x8x128xf32, #tpu.memory_space<vmem>>, vector<1x8x128xf32>,
    %387 = vector.shape_cast %378 : vector<8x1xi1> to vector<8x1xi1>
    %388 = vector.broadcast %387 : vector<8x1xi1> to vector<8x128xi1>
    %389 = arith.select %388, %375, %342 : vector<8x128xi1>, vector<8x128xf32>
    %390 = vector.shape_cast %378 : vector<8x1xi1> to vector<8x1xi1>
    %391 = vector.broadcast %390 : vector<8x1xi1> to vector<8x128xi1>
    %392 = arith.select %391, %373, %345 : vector<8x128xi1>, vector<8x128xf32>
    %c8_i32_91 = arith.constant 8 : i32
    %c0_92 = arith.constant 0 : index
    %c0_93 = arith.constant 0 : index
    %393 = vector.load %arg7[%c0_92, %c0_93] : memref<8x128xf32, #tpu.memory_space<vmem>>, vector<8x128xf32>
    tpu.vector_store %arg7[%c0_92, %c0_93], %389 {strides = array<i32>} : memref<8x128xf32, #tpu.memory_space<vmem>>, vector<8x128xf32>,
    %c0_94 = arith.constant 0 : index
    %c0_95 = arith.constant 0 : index
    %394 = vector.load %arg8[%c0_94, %c0_95] : memref<8x128xf32, #tpu.memory_space<vmem>>, vector<8x128xf32>
    tpu.vector_store %arg8[%c0_94, %c0_95], %392 {strides = array<i32>} : memref<8x128xf32, #tpu.memory_space<vmem>>, vector<8x128xf32>,
    return
  }
  func.func @transform_0(%arg0: i32) -> (i32, i32, i32) {
    %c0_i32 = arith.constant 0 : i32
    %c0_i32_0 = arith.constant 0 : i32
    %c0_i32_1 = arith.constant 0 : i32
    return %arg0, %c0_i32, %c0_i32_0 : i32, i32, i32
  }
  func.func @transform_1(%arg0: i32) -> (i32, i32) {
    %c0_i32 = arith.constant 0 : i32
    %c0_i32_0 = arith.constant 0 : i32
    %c0_i32_1 = arith.constant 0 : i32
    return %c0_i32, %c0_i32_0 : i32, i32
  }
  func.func @transform_2(%arg0: i32) -> (i32, i32) {
    %c0_i32 = arith.constant 0 : i32
    %c0_i32_0 = arith.constant 0 : i32
    %c0_i32_1 = arith.constant 0 : i32
    return %c0_i32, %c0_i32_0 : i32, i32
  }
  func.func @transform_3(%arg0: i32) -> (i32, i32) {
    %c0_i32 = arith.constant 0 : i32
    %c0_i32_0 = arith.constant 0 : i32
    %c0_i32_1 = arith.constant 0 : i32
    return %c0_i32, %c0_i32_0 : i32, i32
  }
  func.func @transform_4(%arg0: i32) -> (i32, i32) {
    %c0_i32 = arith.constant 0 : i32
    %c0_i32_0 = arith.constant 0 : i32
    %c0_i32_1 = arith.constant 0 : i32
    return %c0_i32, %c0_i32_0 : i32, i32
  }
  func.func @transform_5(%arg0: i32) -> (i32, i32, i32) {
    %c0_i32 = arith.constant 0 : i32
    %c0_i32_0 = arith.constant 0 : i32
    %c0_i32_1 = arith.constant 0 : i32
    return %arg0, %c0_i32, %c0_i32_0 : i32, i32, i32
  }
  func.func @transform_6(%arg0: i32) -> (i32, i32) {
    %c0_i32 = arith.constant 0 : i32
    %c0_i32_0 = arith.constant 0 : i32
    %c0_i32_1 = arith.constant 0 : i32
    return %c0_i32, %c0_i32_0 : i32, i32
  }
  func.func @transform_7(%arg0: i32) -> (i32, i32) {
    %c0_i32 = arith.constant 0 : i32
    %c0_i32_0 = arith.constant 0 : i32
    %c0_i32_1 = arith.constant 0 : i32
    return %c0_i32, %c0_i32_0 : i32, i32
  }
}

</mosaic_0001>

<bundles_post_ra>
// kernel: _drqn_core.1
= control target key start
LH: loop header
LB: loop body
LE: loop exit
PB: predicated region body
PF: predicated region fallthrough
CT: control target
= control target key end

     0   :  { %13 = vsyncpa [#allocation4], 0  ;;  %s3197_s0 = inlined_call_operand.vmem [shape: f32[8,8,64], index: 0, kind: input, shape index: {}]   ;;  %s3198_s1 = inlined_call_operand.vmem [shape: s32[8,1], index: 1, kind: input, shape index: {}]   ;;  %s3199_s2 = inlined_call_operand.hbm [shape: f32[64,512], index: 2, kind: input, shape index: {}]   ;;  %s3200_s3 = inlined_call_operand.vmem [shape: f32[1,512], index: 3, kind: input, shape index: {}]   ;;  %s3201_s4 = inlined_call_operand.hbm [shape: f32[128,512], index: 4, kind: input, shape index: {}]   ;;  %s3202_s5 = inlined_call_operand.vmem [shape: f32[8,8,128], index: 5, kind: output, shape index: {0}]   ;;  %s3203_s6 = inlined_call_operand.vmem [shape: f32[8,128], index: 6, kind: output, shape index: {1}]   ;;  %s3204_s7 = inlined_call_operand.vmem [shape: f32[8,128], index: 7, kind: output, shape index: {2}]  }
   0x1   :  { %s23_s26 = sshll.u32 %s3199_s2, 4  ;;  %s24_s26 = int_to_ptr.hbm [resolvable:$true] %s23_s26 }
   0x2   :  { %14 = vsyncpa [#allocation6], 0  ;;  %s2062_s27 = smov [#allocation3]   ;;  %s38_s8 = sshll.u32 %s3201_s4, 4  ;;  %s39_s8 = int_to_ptr.hbm [resolvable:$true] %s38_s8 }
   0x3   :  { %s25_s28 = sshll.u32 %s2062_s27, 4  ;;  %s2063_s9 = smov 512   ;;  %s26_s28 = int_to_ptr.vmem [resolvable:$true] %s25_s28 }
   0x4   :  { %s2064_s10 = smov 32   ;;  %s2065_s11 = smov [#allocation5]  }
   0x5   :  { %31 = dma.hbm_to_vmem [thread:$0]  %s24_s26, 4096, %s26_s28, [#allocation4], %s2063_s9, %s2063_s9, %s2064_s10  }
   0x6   :  { %s40_s12 = sshll.u32 %s2065_s11, 4  ;;  %s41_s12 = int_to_ptr.vmem [resolvable:$true] %s40_s12 }
   0x7   :  { %46 = dma.hbm_to_vmem [thread:$0]  %s39_s8, 8192, %s41_s12, [#allocation6], %s2063_s9, %s2063_s9, %s2064_s10  }
   0x8   :  { %2058 = dma.done.wait [#allocation4], 4096  }
   0x9   :  { %2059 = vsyncadd [#allocation4], 4294963200 }
   0xa   :  { %2060 = dma.done.wait [#allocation6], 8192  }
   0xb   :  { %2061 = vsyncadd [#allocation6], 4294959104  ;;  %v97_v0 = vld [vmem:[#allocation3 + $0xe0] sm:$0xff]  ;;  %v98_v1 = vld [vmem:[#allocation3 + $0xe8] sm:$0xff]  ;;  %vm111_vm0 = vcmask 523264  }
   0xc   :  { %v99_v2 = vld [vmem:[#allocation3 + $0xf0] sm:$0xff]  ;;  %144 = vmatpush.msra.mxu0 %v97_v0  ;;  %185 = vmatpush.msra.mxu1 %v98_v1  ;;  %v100_v3 = vld [vmem:[#allocation3 + $0xf8] sm:$0xff]  ;;  %v93_v4 = vld [vmem:[#allocation3 + $0xc0] sm:$0xff] }
   0xd   :  { %v94_v5 = vld [vmem:[#allocation3 + $0xc8] sm:$0xff]  ;;  %226 = vmatpush.msra.mxu2 %v99_v2  ;;  %267 = vmatpush.msra.mxu3 %v100_v3  ;;  %v95_v6 = vld [vmem:[#allocation3 + $0xd0] sm:$0xff]  ;;  %v96_v7 = vld [vmem:[#allocation3 + $0xd8] sm:$0xff] }
   0xe   :  { %v89_v8 = vld [vmem:[#allocation3 + $0xa0] sm:$0xff]  ;;  %145 = vmatpush.msra.mxu0 %v93_v4  ;;  %186 = vmatpush.msra.mxu1 %v94_v5  ;;  %v90_v9 = vld [vmem:[#allocation3 + $0xa8] sm:$0xff]  ;;  %v91_v10 = vld [vmem:[#allocation3 + $0xb0] sm:$0xff] }
   0xf   :  { %v92_v11 = vld [vmem:[#allocation3 + $0xb8] sm:$0xff]  ;;  %227 = vmatpush.msra.mxu2 %v95_v6  ;;  %268 = vmatpush.msra.mxu3 %v96_v7  ;;  %v85_v12 = vld [vmem:[#allocation3 + $0x80] sm:$0xff]  ;;  %v86_v13 = vld [vmem:[#allocation3 + $0x88] sm:$0xff] }
  0x10   :  { %146 = vmatpush.msra.mxu0 %v89_v8  ;;  %187 = vmatpush.msra.mxu1 %v90_v9  ;;  %v87_v14 = vld [vmem:[#allocation3 + $0x90] sm:$0xff]  ;;  %v88_v15 = vld [vmem:[#allocation3 + $0x98] sm:$0xff]  ;;  %v81_v16 = vld [vmem:[#allocation3 + $0x60] sm:$0xff] }
  0x11   :  { %228 = vmatpush.msra.mxu2 %v91_v10  ;;  %269 = vmatpush.msra.mxu3 %v92_v11  ;;  %v82_v17 = vld [vmem:[#allocation3 + $0x68] sm:$0xff]  ;;  %v83_v18 = vld [vmem:[#allocation3 + $0x70] sm:$0xff]  ;;  %v84_v19 = vld [vmem:[#allocation3 + $0x78] sm:$0xff] }
  0x12   :  { %147 = vmatpush.msra.mxu0 %v85_v12  ;;  %188 = vmatpush.msra.mxu1 %v86_v13  ;;  %v77_v20 = vld [vmem:[#allocation3 + $0x40] sm:$0xff]  ;;  %v78_v21 = vld [vmem:[#allocation3 + $0x48] sm:$0xff]  ;;  %v79_v22 = vld [vmem:[#allocation3 + $0x50] sm:$0xff] }
  0x13   :  { %229 = vmatpush.msra.mxu2 %v87_v14  ;;  %270 = vmatpush.msra.mxu3 %v88_v15  ;;  %v80_v23 = vld [vmem:[#allocation3 + $0x58] sm:$0xff]  ;;  %v73_v24 = vld [vmem:[#allocation3 + $0x20] sm:$0xff]  ;;  %v74_v25 = vld [vmem:[#allocation3 + $0x28] sm:$0xff] }
  0x14   :  { %148 = vmatpush.msra.mxu0 %v81_v16  ;;  %189 = vmatpush.msra.mxu1 %v82_v17  ;;  %v75_v26 = vld [vmem:[#allocation3 + $0x30] sm:$0xff]  ;;  %v76_v27 = vld [vmem:[#allocation3 + $0x38] sm:$0xff]  ;;  %v69_v28 = vld [vmem:[#allocation3] sm:$0xff] }
  0x15   :  { %230 = vmatpush.msra.mxu2 %v83_v18  ;;  %271 = vmatpush.msra.mxu3 %v84_v19  ;;  %v70_v29 = vld [vmem:[#allocation3 + $0x8] sm:$0xff]  ;;  %v71_v30 = vld [vmem:[#allocation3 + $0x10] sm:$0xff]  ;;  %v72_v31 = vld [vmem:[#allocation3 + $0x18] sm:$0xff] }
  0x16   :  { %149 = vmatpush.msra.mxu0 %v77_v20  ;;  %190 = vmatpush.msra.mxu1 %v78_v21  ;;  %v61_v32 = vld [vmem:[%s3197_s0] sm:$0xff]  ;;  %v2119_v34 = vld [vmem:[#allocation5 + $0x1e8] sm:$0xff]  ;;  %v2123_v35 = vld [vmem:[#allocation5 + $0x1f8] sm:$0xff] }
  0x17   :  { %231 = vmatpush.msra.mxu2 %v79_v22  ;;  %272 = vmatpush.msra.mxu3 %v80_v23  ;;  %v2117_v33 = vld [vmem:[#allocation5 + $0x1e0] sm:$0xff]  ;;  %v2125_v36 = vld [vmem:[#allocation5 + $0x1f0] sm:$0xff]  ;;  %v2131_v38 = vld [vmem:[#allocation5 + $0x1c8] sm:$0xff] }
  0x18   :  { %150 = vmatpush.msra.mxu0 %v73_v24  ;;  %191 = vmatpush.msra.mxu1 %v74_v25  ;;  %v2129_v37 = vld [vmem:[#allocation5 + $0x1c0] sm:$0xff]  ;;  %v2135_v39 = vld [vmem:[#allocation5 + $0x1d8] sm:$0xff]  ;;  %v2137_v40 = vld [vmem:[#allocation5 + $0x1d0] sm:$0xff] }
  0x19   :  { %232 = vmatpush.msra.mxu2 %v75_v26  ;;  %273 = vmatpush.msra.mxu3 %v76_v27  ;;  %v2140_v41 = vld [vmem:[#allocation5 + $0x1a0] sm:$0xff]  ;;  %v2142_v42 = vld [vmem:[#allocation5 + $0x1a8] sm:$0xff]  ;;  %v2147_v43 = vld [vmem:[#allocation5 + $0x1b8] sm:$0xff] }
  0x1a   :  { %151 = vmatpush.msra.mxu0 %v69_v28  ;;  %192 = vmatpush.msra.mxu1 %v70_v29  ;;  %v2149_v44 = vld [vmem:[#allocation5 + $0x1b0] sm:$0xff]  ;;  %v62_v45 = vld [vmem:[%s3197_s0 + $0x8] sm:$0xff]  ;;  %v2158_v46 = vld [vmem:[#allocation5 + $0x180] sm:$0xff] }
  0x1b   :  { %233 = vmatpush.msra.mxu2 %v71_v30  ;;  %274 = vmatpush.msra.mxu3 %v72_v31  ;;  %v2160_v47 = vld [vmem:[#allocation5 + $0x188] sm:$0xff]  ;;  %v2166_v48 = vld [vmem:[#allocation5 + $0x198] sm:$0xff]  ;;  %v2168_v49 = vld [vmem:[#allocation5 + $0x190] sm:$0xff] }
  0x1c   :  { %1733 = vmatmul.msk.f32.vlgmr.msra.gmra.mxu0 %vm111_vm0, %v61_v32  ;;  %1741 = vmatmul.msk.f32.vlgmr.msra.gmra.mxu1 %vm111_vm0, %v61_v32  ;;  %v2172_v50 = vld [vmem:[#allocation5 + $0x160] sm:$0xff]  ;;  %v2174_v51 = vld [vmem:[#allocation5 + $0x168] sm:$0xff]  ;;  %v2178_v52 = vld [vmem:[#allocation5 + $0x178] sm:$0xff] }
  0x1d   :  { %1749 = vmatmul.msk.f32.vlgmr.msra.gmra.mxu2 %vm111_vm0, %v61_v32  ;;  %1757 = vmatmul.msk.f32.vlgmr.msra.gmra.mxu3 %vm111_vm0, %v61_v32  ;;  %v2180_v53 = vld [vmem:[#allocation5 + $0x170] sm:$0xff]  ;;  %v2183_v54 = vld [vmem:[#allocation5 + $0x140] sm:$0xff]  ;;  %v2185_v55 = vld [vmem:[#allocation5 + $0x148] sm:$0xff] }
  0x1e   :  { %404 = vmatpush.msrb.mxu0 %v2117_v33  ;;  %424 = vmatpush.msrb.mxu1 %v2119_v34  ;;  %v2190_v56 = vld [vmem:[#allocation5 + $0x158] sm:$0xff]  ;;  %v2192_v57 = vld [vmem:[#allocation5 + $0x150] sm:$0xff]  ;;  %v2201_v59 = vld [vmem:[#allocation5 + $0x120] sm:$0xff] }
  0x1f   :  { %464 = vmatpush.msrb.mxu3 %v2123_v35  ;;  %444 = vmatpush.msrb.mxu2 %v2125_v36  ;;  %v63_v58 = vld [vmem:[%s3197_s0 + $0x10] sm:$0xff]  ;;  %v2203_v60 = vld [vmem:[#allocation5 + $0x128] sm:$0xff]  ;;  %v2209_v61 = vld [vmem:[#allocation5 + $0x138] sm:$0xff] }
  0x20   :  { %405 = vmatpush.msrb.mxu0 %v2129_v37  ;;  %425 = vmatpush.msrb.mxu1 %v2131_v38  ;;  %v2211_v62 = vld [vmem:[#allocation5 + $0x130] sm:$0xff]  ;;  %v2215_v63 = vld [vmem:[#allocation5 + $0x100] sm:$0xff]  ;;  %v2217_v0 = vld [vmem:[#allocation5 + $0x108] sm:$0xff] }
  0x21   :  { %465 = vmatpush.msrb.mxu3 %v2135_v39  ;;  %445 = vmatpush.msrb.mxu2 %v2137_v40  ;;  %v2221_v1 = vld [vmem:[#allocation5 + $0x118] sm:$0xff]  ;;  %v2223_v2 = vld [vmem:[#allocation5 + $0x110] sm:$0xff]  ;;  %v2226_v3 = vld [vmem:[#allocation5 + $0xe0] sm:$0xff] }
  0x22   :  { %406 = vmatpush.msrb.mxu0 %v2140_v41  ;;  %426 = vmatpush.msrb.mxu1 %v2142_v42  ;;  %v2228_v4 = vld [vmem:[#allocation5 + $0xe8] sm:$0xff]  ;;  %v2233_v5 = vld [vmem:[#allocation5 + $0xf8] sm:$0xff]  ;;  %v2235_v6 = vld [vmem:[#allocation5 + $0xf0] sm:$0xff] }
  0x23   :  { %466 = vmatpush.msrb.mxu3 %v2147_v43  ;;  %446 = vmatpush.msrb.mxu2 %v2149_v44  ;;  %v64_v7 = vld [vmem:[%s3197_s0 + $0x18] sm:$0xff]  ;;  %v2244_v8 = vld [vmem:[#allocation5 + $0xc0] sm:$0xff]  ;;  %v2246_v9 = vld [vmem:[#allocation5 + $0xc8] sm:$0xff] }
  0x24   :  { %1734 = vmatmul.msk.f32.gmra.mxu0 %vm111_vm0, %v62_v45  ;;  %1742 = vmatmul.msk.f32.gmra.mxu1 %vm111_vm0, %v62_v45  ;;  %v2252_v10 = vld [vmem:[#allocation5 + $0xd8] sm:$0xff]  ;;  %v2254_v11 = vld [vmem:[#allocation5 + $0xd0] sm:$0xff]  ;;  %v2258_v12 = vld [vmem:[#allocation5 + $0xa0] sm:$0xff] }
  0x25   :  { %1750 = vmatmul.msk.f32.gmra.mxu2 %vm111_vm0, %v62_v45  ;;  %1758 = vmatmul.msk.f32.gmra.mxu3 %vm111_vm0, %v62_v45  ;;  %3304 = vst [vmem:[#allocation9_spill] sm:$0xff] %v2252_v10  ;;  %v2260_v13 = vld [vmem:[#allocation5 + $0xa8] sm:$0xff]  ;;  %v2264_v14 = vld [vmem:[#allocation5 + $0xb8] sm:$0xff]  ;;  %v2266_v15 = vld [vmem:[#allocation5 + $0xb0] sm:$0xff] }
  0x26   :  { %407 = vmatpush.msrb.mxu0 %v2158_v46  ;;  %427 = vmatpush.msrb.mxu1 %v2160_v47  ;;  %3305 = vst [vmem:[#allocation10_spill] sm:$0xff] %v2254_v11  ;;  %v2269_v16 = vld [vmem:[#allocation5 + $0x80] sm:$0xff]  ;;  %v2271_v17 = vld [vmem:[#allocation5 + $0x88] sm:$0xff]  ;;  %v2276_v18 = vld [vmem:[#allocation5 + $0x98] sm:$0xff] }
  0x27   :  { %467 = vmatpush.msrb.mxu3 %v2166_v48  ;;  %447 = vmatpush.msrb.mxu2 %v2168_v49  ;;  %3306 = vst [vmem:[#allocation11_spill] sm:$0xff] %v2258_v12  ;;  %v2278_v19 = vld [vmem:[#allocation5 + $0x90] sm:$0xff]  ;;  %v65_v20 = vld [vmem:[%s3197_s0 + $0x20] sm:$0xff]  ;;  %v2289_v22 = vld [vmem:[#allocation5 + $0x68] sm:$0xff] }
  0x28   :  { %408 = vmatpush.msrb.mxu0 %v2172_v50  ;;  %428 = vmatpush.msrb.mxu1 %v2174_v51  ;;  %3307 = vst [vmem:[#allocation12_spill] sm:$0xff] %v2260_v13  ;;  %v2287_v21 = vld [vmem:[#allocation5 + $0x60] sm:$0xff]  ;;  %v2295_v23 = vld [vmem:[#allocation5 + $0x78] sm:$0xff]  ;;  %v2297_v24 = vld [vmem:[#allocation5 + $0x70] sm:$0xff] }
  0x29   :  { %468 = vmatpush.msrb.mxu3 %v2178_v52  ;;  %448 = vmatpush.msrb.mxu2 %v2180_v53  ;;  %3308 = vst [vmem:[#allocation13_spill] sm:$0xff] %v2264_v14  ;;  %v2301_v25 = vld [vmem:[#allocation5 + $0x40] sm:$0xff]  ;;  %v2303_v26 = vld [vmem:[#allocation5 + $0x48] sm:$0xff]  ;;  %v2307_v27 = vld [vmem:[#allocation5 + $0x58] sm:$0xff] }
  0x2a   :  { %409 = vmatpush.msrb.mxu0 %v2183_v54  ;;  %429 = vmatpush.msrb.mxu1 %v2185_v55  ;;  %3309 = vst [vmem:[#allocation14_spill] sm:$0xff] %v2266_v15  ;;  %v2309_v28 = vld [vmem:[#allocation5 + $0x50] sm:$0xff]  ;;  %v2312_v29 = vld [vmem:[#allocation5 + $0x20] sm:$0xff]  ;;  %v2314_v30 = vld [vmem:[#allocation5 + $0x28] sm:$0xff] }
  0x2b   :  { %469 = vmatpush.msrb.mxu3 %v2190_v56  ;;  %449 = vmatpush.msrb.mxu2 %v2192_v57  ;;  %3310 = vst [vmem:[#allocation15_spill] sm:$0xff] %v2269_v16  ;;  %v2319_v31 = vld [vmem:[#allocation5 + $0x30] sm:$0xff]  ;;  %v2321_v32 = vld [vmem:[#allocation5 + $0x38] sm:$0xff]  ;;  %v2326_v45 = vld [vmem:[%s3198_s1] sm:$0xff] }
  0x2c   :  { %1735 = vmatmul.msk.f32.gmra.mxu0 %vm111_vm0, %v63_v58  ;;  %1743 = vmatmul.msk.f32.gmra.mxu1 %vm111_vm0, %v63_v58  ;;  %3311 = vst [vmem:[#allocation16_spill] sm:$0xff] %v2271_v17  ;;  %vm1768_vm1 = vcmp.gt.s32.totalorder %v2326_v45, 0  ;;  %vm1772_vm2 = vcmp.gt.s32.totalorder %v2326_v45, 1  ;;  %vm1797_vm3 = vcmp.gt.s32.totalorder %v2326_v45, 6 }
  0x2d   :  { %1751 = vmatmul.msk.f32.gmra.mxu2 %vm111_vm0, %v63_v58  ;;  %1759 = vmatmul.msk.f32.gmra.mxu3 %vm111_vm0, %v63_v58  ;;  %3312 = vst [vmem:[#allocation17_spill] sm:$0xff] %v2276_v18  ;;  %v66_v58 = vld [vmem:[%s3197_s0 + $0x28] sm:$0xff] }
  0x2e   :  { %410 = vmatpush.msrb.mxu0 %v2201_v59  ;;  %430 = vmatpush.msrb.mxu1 %v2203_v60  ;;  %3313 = vst [vmem:[#allocation18_spill] sm:$0xff] %v2278_v19 }
  0x2f   :  { %470 = vmatpush.msrb.mxu3 %v2209_v61  ;;  %450 = vmatpush.msrb.mxu2 %v2211_v62  ;;  %3314 = vst [vmem:[#allocation19_spill] sm:$0xff] %v2287_v21 }
  0x30   :  { %411 = vmatpush.msrb.mxu0 %v2215_v63  ;;  %431 = vmatpush.msrb.mxu1 %v2217_v0  ;;  %3315 = vst [vmem:[#allocation20_spill] sm:$0xff] %v2289_v22 }
  0x31   :  { %471 = vmatpush.msrb.mxu3 %v2221_v1  ;;  %451 = vmatpush.msrb.mxu2 %v2223_v2  ;;  %3316 = vst [vmem:[#allocation21_spill] sm:$0xff] %v2295_v23 }
  0x32   :  { %412 = vmatpush.msrb.mxu0 %v2226_v3  ;;  %432 = vmatpush.msrb.mxu1 %v2228_v4  ;;  %3317 = vst [vmem:[#allocation22_spill] sm:$0xff] %v2297_v24 }
  0x33   :  { %472 = vmatpush.msrb.mxu3 %v2233_v5  ;;  %452 = vmatpush.msrb.mxu2 %v2235_v6  ;;  %3318 = vst [vmem:[#allocation23_spill] sm:$0xff] %v2301_v25 }
  0x34   :  { %1736 = vmatmul.msk.f32.gmra.mxu0 %vm111_vm0, %v64_v7  ;;  %1744 = vmatmul.msk.f32.gmra.mxu1 %vm111_vm0, %v64_v7  ;;  %3319 = vst [vmem:[#allocation24_spill] sm:$0xff] %v2303_v26 }
  0x35   :  { %1752 = vmatmul.msk.f32.gmra.mxu2 %vm111_vm0, %v64_v7  ;;  %1760 = vmatmul.msk.f32.gmra.mxu3 %vm111_vm0, %v64_v7  ;;  %3320 = vst [vmem:[#allocation25_spill] sm:$0xff] %v2307_v27  ;;  %v2335_v7 = vld [vmem:[#allocation5] sm:$0xff] }
  0x36   :  { %413 = vmatpush.msrb.mxu0 %v2244_v8  ;;  %433 = vmatpush.msrb.mxu1 %v2246_v9  ;;  %3321 = vst [vmem:[#allocation26_spill] sm:$0xff] %v2309_v28 }
  0x37   :  { %473 = vmatpush.msrb.mxu3 %v2252_v10  ;;  %453 = vmatpush.msrb.mxu2 %v2254_v11  ;;  %3322 = vst [vmem:[#allocation27_spill] sm:$0xff] %v2312_v29 }
  0x38   :  { %414 = vmatpush.msrb.mxu0 %v2258_v12  ;;  %434 = vmatpush.msrb.mxu1 %v2260_v13  ;;  %3323 = vst [vmem:[#allocation28_spill] sm:$0xff] %v2314_v30 }
  0x39   :  { %474 = vmatpush.msrb.mxu3 %v2264_v14  ;;  %454 = vmatpush.msrb.mxu2 %v2266_v15  ;;  %3324 = vst [vmem:[#allocation29_spill] sm:$0xff] %v2319_v31 }
  0x3a   :  { %415 = vmatpush.msrb.mxu0 %v2269_v16  ;;  %435 = vmatpush.msrb.mxu1 %v2271_v17  ;;  %3325 = vst [vmem:[#allocation30_spill] sm:$0xff] %v2321_v32 }
  0x3b   :  { %475 = vmatpush.msrb.mxu3 %v2276_v18  ;;  %455 = vmatpush.msrb.mxu2 %v2278_v19  ;;  %3326 = vst [vmem:[#allocation31_spill] sm:$0xff] %v2326_v45 }
  0x3c   :  { %1737 = vmatmul.msk.f32.gmra.mxu0 %vm111_vm0, %v65_v20  ;;  %1745 = vmatmul.msk.f32.gmra.mxu1 %vm111_vm0, %v65_v20  ;;  %3327 = vst [vmem:[#allocation32_spill] sm:$0xff] %v2335_v7 }
  0x3d   :  { %1753 = vmatmul.msk.f32.gmra.mxu2 %vm111_vm0, %v65_v20  ;;  %1761 = vmatmul.msk.f32.gmra.mxu3 %vm111_vm0, %v65_v20  ;;  %v2337_v20 = vld [vmem:[#allocation5 + $0x8] sm:$0xff] }
  0x3e   :  { %416 = vmatpush.msrb.mxu0 %v2287_v21  ;;  %436 = vmatpush.msrb.mxu1 %v2289_v22  ;;  %3328 = vst [vmem:[#allocation33_spill] sm:$0xff] %v2337_v20 }
  0x3f   :  { %476 = vmatpush.msrb.mxu3 %v2295_v23  ;;  %456 = vmatpush.msrb.mxu2 %v2297_v24 }
  0x40   :  { %417 = vmatpush.msrb.mxu0 %v2301_v25  ;;  %437 = vmatpush.msrb.mxu1 %v2303_v26 }
  0x41   :  { %477 = vmatpush.msrb.mxu3 %v2307_v27  ;;  %457 = vmatpush.msrb.mxu2 %v2309_v28  ;;  %v2344_v27 = vld [vmem:[#allocation5 + $0x10] sm:$0xff]  ;;  %v2346_v28 = vld [vmem:[#allocation5 + $0x18] sm:$0xff]  ;;  %v3335_v45 = vld [vmem:[#allocation30_spill] sm:$0xff] }
  0x42   :  { %418 = vmatpush.msrb.mxu0 %v2312_v29  ;;  %438 = vmatpush.msrb.mxu1 %v2314_v30  ;;  %3329 = vst [vmem:[#allocation34_spill] sm:$0xff] %v2344_v27  ;;  %v67_v30 = vld [vmem:[%s3197_s0 + $0x30] sm:$0xff] }
  0x43   :  { %458 = vmatpush.msrb.mxu2 %v2319_v31  ;;  %478 = vmatpush.msrb.mxu3 %v2321_v32  ;;  %3330 = vst [vmem:[#allocation35_spill] sm:$0xff] %v2346_v28  ;;  %v3215_v31 = vmov 0  }
  0x44   :  { %1738 = vmatmul.msk.f32.gmra.mxu0 %vm111_vm0, %v66_v58  ;;  %1746 = vmatmul.msk.f32.gmra.mxu1 %vm111_vm0, %v66_v58  ;;  %v553_v32 = vsel %vm1768_vm1, 1, %v3215_v31 }
  0x45   :  { %1754 = vmatmul.msk.f32.gmra.mxu2 %vm111_vm0, %v66_v58  ;;  %1762 = vmatmul.msk.f32.gmra.mxu3 %vm111_vm0, %v66_v58  ;;  %v68_v58 = vld [vmem:[%s3197_s0 + $0x38] sm:$0xff] }
  0x46   :  { %419 = vmatpush.msrb.mxu0 %v2335_v7  ;;  %439 = vmatpush.msrb.mxu1 %v2337_v20 }
  0x47   :  { %459 = vmatpush.msrb.mxu2 %v2344_v27  ;;  %479 = vmatpush.msrb.mxu3 %v2346_v28 }
  0x48   :  { %1810 = vset.pattern.permute.xlu0 %v3215_v31  ;;  %567 = vmatpush.msra.mxu0 %v2117_v33 }
  0x49   :  { %555 = vperm.xlu0 %1810, %v553_v32   ;;  %587 = vmatpush.msra.mxu1 %v2119_v34  ;;  %v717_v32 = vsel %vm1772_vm2, 1, %v3215_v31 }
  0x4a   :  { %607 = vmatpush.msra.mxu2 %v2125_v36  ;;  %627 = vmatpush.msra.mxu3 %v2123_v35 }
  0x4b   :  { %568 = vmatpush.msra.mxu0 %v2129_v37  ;;  %588 = vmatpush.msra.mxu1 %v2131_v38 }
  0x4c   :  { %1739 = vmatmul.msk.f32.gmra.mxu0 %vm111_vm0, %v67_v30  ;;  %1747 = vmatmul.msk.f32.gmra.mxu1 %vm111_vm0, %v67_v30 }
  0x4d   :  { %1755 = vmatmul.msk.f32.gmra.mxu2 %vm111_vm0, %v67_v30  ;;  %1763 = vmatmul.msk.f32.gmra.mxu3 %vm111_vm0, %v67_v30  ;;  %v1542_v30 = vsel %vm1797_vm3, 1, %v3215_v31  ;;  %v3334_v31 = vld [vmem:[#allocation29_spill] sm:$0xff] }
  0x4e   :  { %608 = vmatpush.msra.mxu2 %v2137_v40  ;;  %628 = vmatpush.msra.mxu3 %v2135_v39 }
  0x4f   :  { %569 = vmatpush.msra.mxu0 %v2140_v41  ;;  %589 = vmatpush.msra.mxu1 %v2142_v42 }
  0x50   :  { %609 = vmatpush.msra.mxu2 %v2149_v44  ;;  %629 = vmatpush.msra.mxu3 %v2147_v43 }
  0x51   :  { %719 = vperm.xlu0 %1810, %v717_v32   ;;  %570 = vmatpush.msra.mxu0 %v2158_v46  ;;  %v2067_v32 = vmov 0.0  }
  0x52   :  { %590 = vmatpush.msra.mxu1 %v2160_v47  ;;  %610 = vmatpush.msra.mxu2 %v2168_v49 }
  0x53   :  { %630 = vmatpush.msra.mxu3 %v2166_v48  ;;  %571 = vmatpush.msra.mxu0 %v2172_v50 }
  0x54   :  { %1740 = vmatmul.msk.f32.gmra.mxu0 %vm111_vm0, %v68_v58  ;;  %1748 = vmatmul.msk.f32.gmra.mxu1 %vm111_vm0, %v68_v58 }
  0x55   :  { %1756 = vmatmul.msk.f32.gmra.mxu2 %vm111_vm0, %v68_v58  ;;  %1764 = vmatmul.msk.f32.gmra.mxu3 %vm111_vm0, %v68_v58  ;;  %v3331_v58 = vld [vmem:[#allocation26_spill] sm:$0xff] }
  0x56   :  { %591 = vmatpush.msra.mxu1 %v2174_v51  ;;  %611 = vmatpush.msra.mxu2 %v2180_v53 }
  0x57   :  { %631 = vmatpush.msra.mxu3 %v2178_v52  ;;  %572 = vmatpush.msra.mxu0 %v2183_v54 }
  0x58   :  { %592 = vmatpush.msra.mxu1 %v2185_v55  ;;  %612 = vmatpush.msra.mxu2 %v2192_v57 }
  0x59   :  { %1544 = vperm.xlu0 %1810, %v1542_v30   ;;  %632 = vmatpush.msra.mxu3 %v2190_v56  ;;  %v3332_v30 = vld [vmem:[#allocation25_spill] sm:$0xff] }
  0x5a   :  { %573 = vmatpush.msra.mxu0 %v2201_v59  ;;  %593 = vmatpush.msra.mxu1 %v2203_v60 }
  0x5b   :  { %613 = vmatpush.msra.mxu2 %v2211_v62  ;;  %633 = vmatpush.msra.mxu3 %v2209_v61 }
  0x5c   :  { %420 = vmatmul.f32.vlgmr.msrb.gmra.mxu0 %v2067_v32  ;;  %440 = vmatmul.f32.vlgmr.msrb.gmra.mxu1 %v2067_v32 }
  0x5d   :  { %460 = vmatmul.f32.vlgmr.msrb.gmra.mxu2 %v2067_v32  ;;  %480 = vmatmul.f32.vlgmr.msrb.gmra.mxu3 %v2067_v32  ;;  %v3333_v32 = vld [vmem:[#allocation28_spill] sm:$0xff] }
  0x5e   :  { %574 = vmatpush.msra.mxu0 %v2215_v63  ;;  %594 = vmatpush.msra.mxu1 %v2217_v0 }
  0x5f   :  { %614 = vmatpush.msra.mxu2 %v2223_v2  ;;  %634 = vmatpush.msra.mxu3 %v2221_v1 }
  0x60   :  { %575 = vmatpush.msra.mxu0 %v2226_v3  ;;  %595 = vmatpush.msra.mxu1 %v2228_v4 }
  0x61   :  { %615 = vmatpush.msra.mxu2 %v2235_v6  ;;  %635 = vmatpush.msra.mxu3 %v2233_v5 }
  0x62   :  { %576 = vmatpush.msra.mxu0 %v2244_v8  ;;  %596 = vmatpush.msra.mxu1 %v2246_v9 }
  0x63   :  { %616 = vmatpush.msra.mxu2 %v2254_v11  ;;  %636 = vmatpush.msra.mxu3 %v2252_v10 }
  0x64   :  { %577 = vmatpush.msra.mxu0 %v2258_v12  ;;  %597 = vmatpush.msra.mxu1 %v2260_v13 }
  0x65   :  { %617 = vmatpush.msra.mxu2 %v2266_v15  ;;  %637 = vmatpush.msra.mxu3 %v2264_v14 }
  0x66   :  { %578 = vmatpush.msra.mxu0 %v2269_v16  ;;  %598 = vmatpush.msra.mxu1 %v2271_v17 }
  0x67   :  { %618 = vmatpush.msra.mxu2 %v2278_v19  ;;  %638 = vmatpush.msra.mxu3 %v2276_v18 }
  0x68   :  { %579 = vmatpush.msra.mxu0 %v2287_v21  ;;  %599 = vmatpush.msra.mxu1 %v2289_v22 }
  0x69   :  { %619 = vmatpush.msra.mxu2 %v2297_v24  ;;  %639 = vmatpush.msra.mxu3 %v2295_v23 }
  0x6a   :  { %580 = vmatpush.msra.mxu0 %v2301_v25  ;;  %600 = vmatpush.msra.mxu1 %v2303_v26 }
  0x6b   :  { %620 = vmatpush.msra.mxu2 %v3331_v58  ;;  %640 = vmatpush.msra.mxu3 %v3332_v30 }
  0x6c   :  { %581 = vmatpush.msra.mxu0 %v2312_v29  ;;  %601 = vmatpush.msra.mxu1 %v3333_v32 }
  0x6d   :  { %621 = vmatpush.msra.mxu2 %v3334_v31  ;;  %641 = vmatpush.msra.mxu3 %v3335_v45 }
  0x6e   :  { %582 = vmatpush.msra.mxu0 %v2335_v7  ;;  %602 = vmatpush.msra.mxu1 %v2337_v20 }
  0x6f   :  { %622 = vmatpush.msra.mxu2 %v2344_v27  ;;  %642 = vmatpush.msra.mxu3 %v2346_v28 }
  0x70   :  { %732 = vmatpush.msrb.mxu0 %v2117_v33  ;;  %752 = vmatpush.msrb.mxu1 %v2119_v34 }
  0x71   :  { %772 = vmatpush.msrb.mxu2 %v2125_v36  ;;  %792 = vmatpush.msrb.mxu3 %v2123_v35 }
  0x72   :  { %733 = vmatpush.msrb.mxu0 %v2129_v37  ;;  %753 = vmatpush.msrb.mxu1 %v2131_v38 }
  0x73   :  { %773 = vmatpush.msrb.mxu2 %v2137_v40  ;;  %793 = vmatpush.msrb.mxu3 %v2135_v39 }
  0x74   :  { %734 = vmatpush.msrb.mxu0 %v2140_v41  ;;  %754 = vmatpush.msrb.mxu1 %v2142_v42 }
  0x75   :  { %774 = vmatpush.msrb.mxu2 %v2149_v44  ;;  %794 = vmatpush.msrb.mxu3 %v2147_v43 }
  0x76   :  { %735 = vmatpush.msrb.mxu0 %v2158_v46  ;;  %755 = vmatpush.msrb.mxu1 %v2160_v47 }
  0x77   :  { %775 = vmatpush.msrb.mxu2 %v2168_v49  ;;  %795 = vmatpush.msrb.mxu3 %v2166_v48 }
  0x78   :  { %736 = vmatpush.msrb.mxu0 %v2172_v50  ;;  %756 = vmatpush.msrb.mxu1 %v2174_v51 }
  0x79   :  { %776 = vmatpush.msrb.mxu2 %v2180_v53  ;;  %796 = vmatpush.msrb.mxu3 %v2178_v52 }
  0x7a   :  { %737 = vmatpush.msrb.mxu0 %v2183_v54  ;;  %757 = vmatpush.msrb.mxu1 %v2185_v55 }
  0x7b   :  { %777 = vmatpush.msrb.mxu2 %v2192_v57  ;;  %797 = vmatpush.msrb.mxu3 %v2190_v56 }
  0x7c   :  { %738 = vmatpush.msrb.mxu0 %v2201_v59  ;;  %758 = vmatpush.msrb.mxu1 %v2203_v60 }
  0x7d   :  { %778 = vmatpush.msrb.mxu2 %v2211_v62  ;;  %798 = vmatpush.msrb.mxu3 %v2209_v61 }
  0x7e   :  { %739 = vmatpush.msrb.mxu0 %v2215_v63  ;;  %759 = vmatpush.msrb.mxu1 %v2217_v0 }
  0x7f   :  { %779 = vmatpush.msrb.mxu2 %v2223_v2  ;;  %799 = vmatpush.msrb.mxu3 %v2221_v1 }
  0x80   :  { %740 = vmatpush.msrb.mxu0 %v2226_v3  ;;  %760 = vmatpush.msrb.mxu1 %v2228_v4 }
  0x81   :  { %780 = vmatpush.msrb.mxu2 %v2235_v6  ;;  %800 = vmatpush.msrb.mxu3 %v2233_v5 }
  0x82   :  { %741 = vmatpush.msrb.mxu0 %v2244_v8  ;;  %761 = vmatpush.msrb.mxu1 %v2246_v9 }
  0x83   :  { %781 = vmatpush.msrb.mxu2 %v2254_v11  ;;  %801 = vmatpush.msrb.mxu3 %v2252_v10 }
  0x84   :  { %742 = vmatpush.msrb.mxu0 %v2258_v12  ;;  %762 = vmatpush.msrb.mxu1 %v2260_v13 }
  0x85   :  { %782 = vmatpush.msrb.mxu2 %v2266_v15  ;;  %802 = vmatpush.msrb.mxu3 %v2264_v14 }
  0x86   :  { %743 = vmatpush.msrb.mxu0 %v2269_v16  ;;  %763 = vmatpush.msrb.mxu1 %v2271_v17 }
  0x87   :  { %783 = vmatpush.msrb.mxu2 %v2278_v19  ;;  %803 = vmatpush.msrb.mxu3 %v2276_v18 }
  0x88   :  { %744 = vmatpush.msrb.mxu0 %v2287_v21  ;;  %764 = vmatpush.msrb.mxu1 %v2289_v22 }
  0x89   :  { %784 = vmatpush.msrb.mxu2 %v2297_v24  ;;  %804 = vmatpush.msrb.mxu3 %v2295_v23 }
  0x8a   :  { %745 = vmatpush.msrb.mxu0 %v2301_v25  ;;  %765 = vmatpush.msrb.mxu1 %v2303_v26  ;;  %v3336_v26 = vmov 0  }
  0x8b   :  { %785 = vmatpush.msrb.mxu2 %v3331_v58  ;;  %805 = vmatpush.msrb.mxu3 %v3332_v30 }
  0x8c   :  { %746 = vmatpush.msrb.mxu0 %v2312_v29  ;;  %766 = vmatpush.msrb.mxu1 %v3333_v32 }
  0x8d   :  { %786 = vmatpush.msrb.mxu2 %v3334_v31  ;;  %806 = vmatpush.msrb.mxu3 %v3335_v45  ;;  %v101_v31 = vld [vmem:[%s3200_s3] sm:$0xf] }
  0x8e   :  { %747 = vmatpush.msrb.mxu0 %v2335_v7  ;;  %767 = vmatpush.msrb.mxu1 %v2337_v20  ;;  %v103_v32 = vperm.slane %v101_v31, 0  ;;  %v104_v45 = vperm.slane %v101_v31, 1  ;;  %v2515_v23 = vperm.slane %v101_v31, 2 }
  0x8f   :  { %787 = vmatpush.msrb.mxu2 %v2344_v27  ;;  %807 = vmatpush.msrb.mxu3 %v2346_v28 }
  0x90   :  { %1811 = vset.pattern.permute.xlu1 %v3336_v26  ;;  %1812 = vset.pattern.permute.xlu2 %v3336_v26  ;;  %v106_v26 = vperm.slane %v101_v31, 3 }
  0x99   :  { %v153_v30 = vpop.f32.mrf.mxu0  ;;  %v194_v29 = vpop.f32.mrf.mxu1 }
  0xa0   :  { %v2507_v58 = vpop.f32.mrf.mxu2  ;;  %v2509_v7 = vpop.f32.mrf.mxu3 }
  0xa1   :  { %v156_v20 = vpop.f32.mrf.mxu0  ;;  %v197_v27 = vpop.f32.mrf.mxu1 }
  0xa2   :  { %v2511_v25 = vadd.f32 %v156_v20, %v103_v32  ;;  %v2513_v28 = vadd.f32 %v197_v27, %v104_v45 }
  0xa4   :  { %3337 = vst [vmem:[#allocation36_spill] sm:$0xff] %v2511_v25 }
  0xa5   :  { %3338 = vst [vmem:[#allocation37_spill] sm:$0xff] %v2513_v28 }
  0xa8   :  { %v238_v24 = vpop.f32.mrf.mxu2  ;;  %v279_v22 = vpop.f32.mrf.mxu3 }
  0xa9   :  { %v2518_v21 = vadd.f32 %v238_v24, %v2515_v23  ;;  %v2520_v18 = vadd.f32 %v279_v22, %v106_v26  ;;  %v159_v19 = vpop.f32.mrf.mxu0  ;;  %v200_v17 = vpop.f32.mrf.mxu1 }
  0xaa   :  { %v2522_v16 = vadd.f32 %v159_v19, %v103_v32  ;;  %v2524_v14 = vadd.f32 %v200_v17, %v104_v45 }
  0xab   :  { %3339 = vst [vmem:[#allocation38_spill] sm:$0xff] %v2518_v21 }
  0xac   :  { %3340 = vst [vmem:[#allocation39_spill] sm:$0xff] %v2520_v18 }
  0xad   :  { %3341 = vst [vmem:[#allocation40_spill] sm:$0xff] %v2522_v16 }
  0xae   :  { %3342 = vst [vmem:[#allocation41_spill] sm:$0xff] %v2524_v14 }
  0xb0   :  { %v241_v20 = vpop.f32.mrf.mxu2  ;;  %v282_v25 = vpop.f32.mrf.mxu3 }
  0xb1   :  { %v2527_v27 = vadd.f32 %v241_v20, %v2515_v23  ;;  %v2529_v28 = vadd.f32 %v282_v25, %v106_v26  ;;  %v162_v31 = vpop.f32.mrf.mxu0  ;;  %v203_v15 = vpop.f32.mrf.mxu1 }
  0xb2   :  { %v2531_v13 = vadd.f32 %v162_v31, %v103_v32  ;;  %v2533_v24 = vadd.f32 %v203_v15, %v104_v45 }
  0xb3   :  { %3343 = vst [vmem:[#allocation42_spill] sm:$0xff] %v2527_v27 }
  0xb4   :  { %3344 = vst [vmem:[#allocation43_spill] sm:$0xff] %v2529_v28 }
  0xb5   :  { %3345 = vst [vmem:[#allocation44_spill] sm:$0xff] %v2531_v13 }
  0xb6   :  { %3346 = vst [vmem:[#allocation45_spill] sm:$0xff] %v2533_v24 }
  0xb8   :  { %v244_v22 = vpop.f32.mrf.mxu2  ;;  %v285_v21 = vpop.f32.mrf.mxu3 }
  0xb9   :  { %v2536_v19 = vadd.f32 %v244_v22, %v2515_v23  ;;  %v2538_v17 = vadd.f32 %v285_v21, %v106_v26  ;;  %v165_v14 = vpop.f32.mrf.mxu0  ;;  %v206_v16 = vpop.f32.mrf.mxu1 }
  0xba   :  { %v2540_v18 = vadd.f32 %v165_v14, %v103_v32  ;;  %v2542_v20 = vadd.f32 %v206_v16, %v104_v45 }
  0xbb   :  { %3347 = vst [vmem:[#allocation46_spill] sm:$0xff] %v2536_v19  ;;  %v556_v10 = vpop.permute.xlu0 %555 }
  0xbc   :  { %3348 = vst [vmem:[#allocation47_spill] sm:$0xff] %v2538_v17  ;;  %vm557_vm12 = vcmp.eq.s32.totalorder %v556_v10, 1 }
  0xbd   :  { %3349 = vst [vmem:[#allocation48_spill] sm:$0xff] %v2540_v18 }
  0xbe   :  { %3350 = vst [vmem:[#allocation49_spill] sm:$0xff] %v2542_v20 }
  0xc0   :  { %v247_v25 = vpop.f32.mrf.mxu2  ;;  %v288_v27 = vpop.f32.mrf.mxu3 }
  0xc1   :  { %v2545_v31 = vadd.f32 %v247_v25, %v2515_v23  ;;  %v2547_v15 = vadd.f32 %v288_v27, %v106_v26  ;;  %v168_v24 = vpop.f32.mrf.mxu0  ;;  %v209_v13 = vpop.f32.mrf.mxu1 }
  0xc2   :  { %v2549_v28 = vadd.f32 %v168_v24, %v103_v32  ;;  %v2551_v22 = vadd.f32 %v209_v13, %v104_v45 }
  0xc3   :  { %3351 = vst [vmem:[#allocation50_spill] sm:$0xff] %v2545_v31 }
  0xc4   :  { %3352 = vst [vmem:[#allocation51_spill] sm:$0xff] %v2547_v15 }
  0xc5   :  { %3353 = vst [vmem:[#allocation52_spill] sm:$0xff] %v2549_v28 }
  0xc6   :  { %3354 = vst [vmem:[#allocation53_spill] sm:$0xff] %v2551_v22 }
  0xc8   :  { %v250_v21 = vpop.f32.mrf.mxu2  ;;  %v291_v19 = vpop.f32.mrf.mxu3 }
  0xc9   :  { %v2554_v14 = vadd.f32 %v250_v21, %v2515_v23  ;;  %v2556_v16 = vadd.f32 %v291_v19, %v106_v26  ;;  %v171_v20 = vpop.f32.mrf.mxu0  ;;  %v212_v18 = vpop.f32.mrf.mxu1  ;;  %v154_v19 = vadd.f32 %v153_v30, %v103_v32 }
  0xca   :  { %v2558_v17 = vadd.f32 %v171_v20, %v103_v32  ;;  %v2560_v25 = vadd.f32 %v212_v18, %v104_v45 }
  0xcb   :  { %3355 = vst [vmem:[#allocation54_spill] sm:$0xff] %v2554_v14  ;;  %v195_v14 = vadd.f32 %v194_v29, %v104_v45 }
  0xcc   :  { %3356 = vst [vmem:[#allocation55_spill] sm:$0xff] %v2556_v16 }
  0xcd   :  { %3357 = vst [vmem:[#allocation56_spill] sm:$0xff] %v2558_v17 }
  0xce   :  { %3358 = vst [vmem:[#allocation57_spill] sm:$0xff] %v2560_v25 }
  0xd0   :  { %v253_v27 = vpop.f32.mrf.mxu2  ;;  %v294_v31 = vpop.f32.mrf.mxu3 }
  0xd1   :  { %v2563_v24 = vadd.f32 %v253_v27, %v2515_v23  ;;  %v2565_v13 = vadd.f32 %v294_v31, %v106_v26  ;;  %v174_v22 = vpop.f32.mrf.mxu0  ;;  %v215_v28 = vpop.f32.mrf.mxu1 }
  0xd2   :  { %v2567_v15 = vadd.f32 %v174_v22, %v103_v32  ;;  %v2569_v21 = vadd.f32 %v215_v28, %v104_v45  ;;  %v277_v22 = vadd.f32 %v2509_v7, %v106_v26 }
  0xd3   :  { %3359 = vst [vmem:[#allocation58_spill] sm:$0xff] %v2563_v24 }
  0xd4   :  { %3360 = vst [vmem:[#allocation59_spill] sm:$0xff] %v2565_v13 }
  0xd5   :  { %3361 = vst [vmem:[#allocation60_spill] sm:$0xff] %v2567_v15 }
  0xd6   :  { %3362 = vst [vmem:[#allocation61_spill] sm:$0xff] %v2569_v21 }
  0xd8   :  { %v256_v16 = vpop.f32.mrf.mxu2  ;;  %v297_v20 = vpop.f32.mrf.mxu3 }
  0xd9   :  { %v2572_v18 = vadd.f32 %v256_v16, %v2515_v23  ;;  %v2574_v25 = vadd.f32 %v297_v20, %v106_v26  ;;  %v421_v17 = vpop.f32.mrf.mxu0  ;;  %v441_v27 = vpop.f32.mrf.mxu1 }
  0xda   :  { %v484_v24 = vadd.f32 %v421_v17, %v154_v19  ;;  %v485_v31 = vadd.f32 %v441_v27, %v195_v14  ;;  %v236_v17 = vadd.f32 %v2507_v58, %v2515_v23 }
  0xdb   :  { %3363 = vst [vmem:[#allocation62_spill] sm:$0xff] %v2572_v18 }
  0xdc   :  { %3364 = vst [vmem:[#allocation63_spill] sm:$0xff] %v2574_v25  ;;  %v1765_v13 = vmul.f32 -1.442695, %v484_v24  ;;  %v1766_v12 = vmul.f32 -1.442695, %v485_v31 }
  0xde   :  { %1813 = vpow2.f32 %v1765_v13 }
  0xdf   :  { %1815 = vpow2.f32 %v1766_v12 }
  0xe0   :  { %v481_v28 = vpop.f32.mrf.mxu3  ;;  %v461_v20 = vpop.f32.mrf.mxu2 }
  0xe1   :  { %v487_v30 = vadd.f32 %v481_v28, %v277_v22  ;;  %v486_v13 = vadd.f32 %v461_v20, %v236_v17 }
  0xe3   :  { %v1767_v29 = vmul.f32 -1.442695, %v487_v30 }
  0xe4   :  { %v1814_v45 = vpop.eup %1813 }
  0xe5   :  { %v1816_v32 = vpop.eup %1815  ;;  %v491_v21 = vadd.f32 1.0, %v1814_v45  ;;  %1817 = vpow2.f32 %v1767_v29 }
  0xe6   :  { %v510_v16 = vadd.f32 1.0, %v1816_v32 }
  0xe7   :  { %1819 = vrcp.f32 %v491_v21  ;;  %v503_v31 = vand.u32 2147483648, %v491_v21  ;;  %v501_v28 = vand.u32 2147483647, %v491_v21  ;;  %vm497_vm6 = vweird.f32 %v491_v21 }
  0xe8   :  { %1821 = vrcp.f32 %v510_v16  ;;  %v522_v30 = vand.u32 2147483648, %v510_v16  ;;  %v520_v45 = vand.u32 2147483647, %v510_v16  ;;  %vm516_vm8 = vweird.f32 %v510_v16 }
  0xe9   :  { %v504_v58 = vor.u32 1.1754944e-38, %v503_v31  ;;  %vm502_vm9 = vcmp.eq.f32.partialorder %v501_v28, 8.507059e+37 }
  0xea   :  { %vm521_vm11 = vcmp.eq.f32.partialorder %v520_v45, 8.507059e+37 }
  0xeb   :  { %v1818_v18 = vpop.eup %1817 }
  0xec   :  { %v530_v14 = vadd.f32 1.0, %v1818_v18 }
  0xed   :  { %v1820_v24 = vpop.eup %1819 }
  0xee   :  { %v1822_v26 = vpop.eup %1821  ;;  %v493_v12 = vmul.f32 %v1820_v24, %v491_v21  ;;  %1823 = vrcp.f32 %v530_v14  ;;  %vm498_vm4 = vweird.f32 %v1820_v24  ;;  %vm536_vm14 = vweird.f32 %v530_v14 }
  0xef   :  { %v512_v7 = vmul.f32 %v1822_v26, %v510_v16  ;;  %1825 = vtanh.f32 %v486_v13  ;;  %vm517_vm5 = vweird.f32 %v1822_v26  ;;  %vm499_vm7 = vmor %vm497_vm6, %vm498_vm4 }
  0xf0   :  { %v494_v19 = vsub.f32 1.0, %v493_v12  ;;  %vm518_vm10 = vmor %vm516_vm8, %vm517_vm5  ;;  %v523_v12 = vor.u32 1.1754944e-38, %v522_v30 }
  0xf1   :  { %v513_v27 = vsub.f32 1.0, %v512_v7 }
  0xf2   :  { %v495_v22 = vmul.f32 %v1820_v24, %v494_v19 }
  0xf3   :  { %v514_v29 = vmul.f32 %v1822_v26, %v513_v27 }
  0xf4   :  { %v1824_v32 = vpop.eup %1823  ;;  %v496_v23 = vadd.f32 %v1820_v24, %v495_v22 }
  0xf5   :  { %v532_v18 = vmul.f32 %v1824_v32, %v530_v14  ;;  %v515_v20 = vadd.f32 %v1822_v26, %v514_v29  ;;  %v1826_v13 = vpop.eup %1825  ;;  %vm537_vm13 = vweird.f32 %v1824_v32  ;;  %v542_v29 = vand.u32 2147483648, %v530_v14 }
  0xf6   :  { %v500_v17 = vsel %vm499_vm7, %v1820_v24, %v496_v23  ;;  %v540_v24 = vand.u32 2147483647, %v530_v14  ;;  %vm538_vm15 = vmor %vm536_vm14, %vm537_vm13  ;;  %v3394_v23 = vld [vmem:[#allocation31_spill] sm:$0xff] }
  0xf7   :  { %v505_v7 = vsel %vm502_vm9, %v504_v58, %v500_v17  ;;  %v533_v19 = vsub.f32 1.0, %v532_v18  ;;  %v519_v25 = vsel %vm518_vm10, %v1822_v26, %v515_v20  ;;  %v543_v26 = vor.u32 1.1754944e-38, %v542_v29 }
  0xf8   :  { %v547_v27 = vmul.f32 %v1826_v13, %v505_v7  ;;  %v524_v15 = vsel %vm521_vm11, %v523_v12, %v519_v25  ;;  %vm541_vm0 = vcmp.eq.f32.partialorder %v540_v24, 8.507059e+37  ;;  %vm1777_vm1 = vcmp.gt.s32.totalorder %v3394_v23, 2  ;;  %v3396_v7 = vld [vmem:[#allocation38_spill] sm:$0xff] }
  0xf9   :  { %v534_v11 = vmul.f32 %v1824_v32, %v533_v19  ;;  %v546_v22 = vmul.f32 0.0, %v524_v15  ;;  %v3395_v18 = vmov 0   ;;  %vm1782_vm2 = vcmp.gt.s32.totalorder %v3394_v23, 3 }
  0xfa   :  { %v882_v20 = vsel %vm1777_vm1, 1, %v3395_v18  ;;  %v1047_v29 = vsel %vm1782_vm2, 1, %v3395_v18  ;;  %vm1802_vm8 = vcmp.gt.s32.totalorder %v3394_v23, 7  ;;  %v2726_v23 = vld [vmem:[#allocation5 + $0x190] sm:$0xff] }
  0xfb   :  { %v548_v21 = vadd.f32 %v547_v27, %v546_v22  ;;  %v535_v31 = vadd.f32 %v1824_v32, %v534_v11  ;;  %884 = vperm.xlu1 %1811, %v882_v20   ;;  %v2732_v20 = vld [vmem:[#allocation5 + $0x160] sm:$0xff] }
  0xfd   :  { %1827 = vtanh.f32 %v548_v21  ;;  %v2580_v16 = vsel %vm557_vm12, %v548_v21, 0.0  ;;  %v539_v28 = vsel %vm538_vm15, %v1824_v32, %v535_v31 }
  0xfe   :  { %v544_v25 = vsel %vm541_vm0, %v543_v26, %v539_v28 }
 0x103   :  { %v1828_v30 = vpop.eup %1827  ;;  %1049 = vperm.xlu1 %1811, %v1047_v29   ;;  %v2762_v29 = vld [vmem:[#allocation5 + $0x130] sm:$0xff] }
 0x104   :  { %v550_v45 = vmul.f32 %v1828_v30, %v544_v25 }
 0x106   :  { %v2583_v15 = vsel %vm557_vm12, %v550_v45, 0.0  ;;  %2006 = vmatmul.msk.f32.vlgmr.msra.gmra.mxu0 %vm557_vm12, %v550_v45  ;;  %2007 = vmatmul.msk.f32.vlgmr.msra.gmra.mxu1 %vm557_vm12, %v550_v45 }
 0x107   :  { %559 = vst [vmem:[%s3202_s5] sm:$0xff] %v2583_v15  ;;  %2008 = vmatmul.msk.f32.vlgmr.msra.gmra.mxu2 %vm557_vm12, %v550_v45  ;;  %2009 = vmatmul.msk.f32.vlgmr.msra.gmra.mxu3 %vm557_vm12, %v550_v45 }
 0x108   :  { %897 = vmatpush.msra.mxu0 %v2117_v33  ;;  %917 = vmatpush.msra.mxu1 %v2119_v34  ;;  %v3365_v33 = vld [vmem:[#allocation10_spill] sm:$0xff]  ;;  %v3366_v34 = vld [vmem:[#allocation9_spill] sm:$0xff] }
 0x109   :  { %937 = vmatpush.msra.mxu2 %v2125_v36  ;;  %957 = vmatpush.msra.mxu3 %v2123_v35  ;;  %v3367_v35 = vld [vmem:[#allocation11_spill] sm:$0xff]  ;;  %v3368_v36 = vld [vmem:[#allocation12_spill] sm:$0xff] }
 0x10a   :  { %898 = vmatpush.msra.mxu0 %v2129_v37  ;;  %918 = vmatpush.msra.mxu1 %v2131_v38  ;;  %v3369_v37 = vld [vmem:[#allocation14_spill] sm:$0xff]  ;;  %v3370_v38 = vld [vmem:[#allocation13_spill] sm:$0xff] }
 0x10b   :  { %938 = vmatpush.msra.mxu2 %v2137_v40  ;;  %958 = vmatpush.msra.mxu3 %v2135_v39  ;;  %v3371_v39 = vld [vmem:[#allocation15_spill] sm:$0xff]  ;;  %v3372_v40 = vld [vmem:[#allocation16_spill] sm:$0xff] }
 0x10c   :  { %899 = vmatpush.msra.mxu0 %v2140_v41  ;;  %919 = vmatpush.msra.mxu1 %v2142_v42  ;;  %v3373_v41 = vld [vmem:[#allocation18_spill] sm:$0xff]  ;;  %v3374_v42 = vld [vmem:[#allocation17_spill] sm:$0xff] }
 0x10d   :  { %939 = vmatpush.msra.mxu2 %v2149_v44  ;;  %959 = vmatpush.msra.mxu3 %v2147_v43  ;;  %v3375_v43 = vld [vmem:[#allocation19_spill] sm:$0xff]  ;;  %v3376_v44 = vld [vmem:[#allocation20_spill] sm:$0xff] }
 0x10e   :  { %900 = vmatpush.msra.mxu0 %v2158_v46  ;;  %920 = vmatpush.msra.mxu1 %v2160_v47  ;;  %v3377_v46 = vld [vmem:[#allocation22_spill] sm:$0xff]  ;;  %v3378_v47 = vld [vmem:[#allocation21_spill] sm:$0xff] }
 0x10f   :  { %940 = vmatpush.msra.mxu2 %v2168_v49  ;;  %960 = vmatpush.msra.mxu3 %v2166_v48  ;;  %v3379_v48 = vld [vmem:[#allocation23_spill] sm:$0xff]  ;;  %v3380_v49 = vld [vmem:[#allocation24_spill] sm:$0xff] }
 0x110   :  { %901 = vmatpush.msra.mxu0 %v2172_v50  ;;  %921 = vmatpush.msra.mxu1 %v2174_v51  ;;  %v3381_v50 = vld [vmem:[#allocation26_spill] sm:$0xff]  ;;  %v3382_v51 = vld [vmem:[#allocation25_spill] sm:$0xff] }
 0x111   :  { %941 = vmatpush.msra.mxu2 %v2180_v53  ;;  %961 = vmatpush.msra.mxu3 %v2178_v52  ;;  %v3383_v52 = vld [vmem:[#allocation27_spill] sm:$0xff]  ;;  %v3384_v53 = vld [vmem:[#allocation28_spill] sm:$0xff] }
 0x112   :  { %902 = vmatpush.msra.mxu0 %v2183_v54  ;;  %922 = vmatpush.msra.mxu1 %v2185_v55  ;;  %v3385_v54 = vld [vmem:[#allocation29_spill] sm:$0xff]  ;;  %v3386_v55 = vld [vmem:[#allocation30_spill] sm:$0xff] }
 0x113   :  { %942 = vmatpush.msra.mxu2 %v2192_v57  ;;  %962 = vmatpush.msra.mxu3 %v2190_v56  ;;  %v3387_v56 = vld [vmem:[#allocation32_spill] sm:$0xff]  ;;  %v3388_v57 = vld [vmem:[#allocation33_spill] sm:$0xff] }
 0x114   :  { %903 = vmatpush.msra.mxu0 %v2201_v59  ;;  %923 = vmatpush.msra.mxu1 %v2203_v60  ;;  %v3389_v59 = vld [vmem:[#allocation34_spill] sm:$0xff]  ;;  %v3390_v60 = vld [vmem:[#allocation35_spill] sm:$0xff] }
 0x115   :  { %943 = vmatpush.msra.mxu2 %v2211_v62  ;;  %963 = vmatpush.msra.mxu3 %v2209_v61 }
 0x116   :  { %904 = vmatpush.msra.mxu0 %v2215_v63  ;;  %924 = vmatpush.msra.mxu1 %v2217_v0  ;;  %v3391_v63 = vld [vmem:[#allocation36_spill] sm:$0xff] }
 0x117   :  { %944 = vmatpush.msra.mxu2 %v2223_v2  ;;  %964 = vmatpush.msra.mxu3 %v2221_v1  ;;  %v3392_v1 = vld [vmem:[#allocation37_spill] sm:$0xff] }
 0x118   :  { %905 = vmatpush.msra.mxu0 %v2226_v3  ;;  %925 = vmatpush.msra.mxu1 %v2228_v4 }
 0x119   :  { %945 = vmatpush.msra.mxu2 %v2235_v6  ;;  %965 = vmatpush.msra.mxu3 %v2233_v5  ;;  %v3393_v6 = vld [vmem:[#allocation39_spill] sm:$0xff] }
 0x11a   :  { %906 = vmatpush.msra.mxu0 %v2244_v8  ;;  %926 = vmatpush.msra.mxu1 %v2246_v9 }
 0x11b   :  { %946 = vmatpush.msra.mxu2 %v3365_v33  ;;  %966 = vmatpush.msra.mxu3 %v3366_v34 }
 0x11c   :  { %907 = vmatpush.msra.mxu0 %v3367_v35  ;;  %927 = vmatpush.msra.mxu1 %v3368_v36 }
 0x11d   :  { %947 = vmatpush.msra.mxu2 %v3369_v37  ;;  %967 = vmatpush.msra.mxu3 %v3370_v38 }
 0x11e   :  { %908 = vmatpush.msra.mxu0 %v3371_v39  ;;  %928 = vmatpush.msra.mxu1 %v3372_v40 }
 0x11f   :  { %948 = vmatpush.msra.mxu2 %v3373_v41  ;;  %968 = vmatpush.msra.mxu3 %v3374_v42 }
 0x120   :  { %909 = vmatpush.msra.mxu0 %v3375_v43  ;;  %929 = vmatpush.msra.mxu1 %v3376_v44 }
 0x121   :  { %949 = vmatpush.msra.mxu2 %v3377_v46  ;;  %969 = vmatpush.msra.mxu3 %v3378_v47 }
 0x122   :  { %910 = vmatpush.msra.mxu0 %v3379_v48  ;;  %930 = vmatpush.msra.mxu1 %v3380_v49  ;;  %v1707_v48 = vsel %vm1802_vm8, 1, %v3395_v18  ;;  %v2867_v18 = vld [vmem:[#allocation5 + $0x8] sm:$0xff] }
 0x123   :  { %950 = vmatpush.msra.mxu2 %v3381_v50  ;;  %970 = vmatpush.msra.mxu3 %v3382_v51  ;;  %v720_v51 = vpop.permute.xlu0 %719  ;;  %3422 = vst [vmem:[#allocation35_spill] sm:$0xff] %v2867_v18 }
 0x124   :  { %911 = vmatpush.msra.mxu0 %v3383_v52  ;;  %931 = vmatpush.msra.mxu1 %v3384_v53  ;;  %vm721_vm12 = vcmp.eq.s32.totalorder %v720_v51, 1  ;;  %v2834_v51 = vld [vmem:[#allocation5 + $0x70] sm:$0xff] }
 0x125   :  { %951 = vmatpush.msra.mxu2 %v3385_v54  ;;  %971 = vmatpush.msra.mxu3 %v3386_v55  ;;  %3411 = vst [vmem:[#allocation23_spill] sm:$0xff] %v2834_v51 }
 0x126   :  { %912 = vmatpush.msra.mxu0 %v3387_v56  ;;  %932 = vmatpush.msra.mxu1 %v3388_v57 }
 0x127   :  { %952 = vmatpush.msra.mxu2 %v3389_v59  ;;  %972 = vmatpush.msra.mxu3 %v3390_v60 }
 0x128   :  { %1709 = vperm.xlu1 %1811, %v1707_v48   ;;  %v2825_v48 = vld [vmem:[#allocation5 + $0x98] sm:$0xff] }
 0x129   :  { %3408 = vst [vmem:[#allocation20_spill] sm:$0xff] %v2825_v48 }
 0x183   :  { %v584_v61 = vpop.f32.mrf.mxu0  ;;  %v604_v62 = vpop.f32.mrf.mxu1 }
 0x184   :  { %v647_v0 = vadd.f32 %v584_v61, %v3391_v63  ;;  %v648_v2 = vadd.f32 %v604_v62, %v3392_v1  ;;  %v2687_v1 = vld [vmem:[#allocation5 + $0x1e8] sm:$0xff] }
 0x186   :  { %v1769_v3 = vmul.f32 -1.442695, %v647_v0  ;;  %v1770_v4 = vmul.f32 -1.442695, %v648_v2  ;;  %v2693_v2 = vld [vmem:[#allocation5 + $0x1f8] sm:$0xff] }
 0x188   :  { %1829 = vpow2.f32 %v1769_v3  ;;  %v2696_v3 = vld [vmem:[#allocation5 + $0x1c0] sm:$0xff] }
 0x189   :  { %1831 = vpow2.f32 %v1770_v4  ;;  %v2699_v4 = vld [vmem:[#allocation5 + $0x1c8] sm:$0xff] }
 0x18a   :  { %v644_v5 = vpop.f32.mrf.mxu3  ;;  %v624_v58 = vpop.f32.mrf.mxu2 }
 0x18b   :  { %v650_v8 = vadd.f32 %v644_v5, %v3393_v6  ;;  %v649_v19 = vadd.f32 %v624_v58, %v3396_v7  ;;  %v2702_v5 = vld [vmem:[#allocation5 + $0x1d0] sm:$0xff]  ;;  %v2705_v6 = vld [vmem:[#allocation5 + $0x1d8] sm:$0xff]  ;;  %v2744_v7 = vld [vmem:[#allocation5 + $0x140] sm:$0xff] }
 0x18c   :  { %v2729_v58 = vld [vmem:[#allocation5 + $0x198] sm:$0xff] }
 0x18d   :  { %v1771_v9 = vmul.f32 -1.442695, %v650_v8  ;;  %v2708_v8 = vld [vmem:[#allocation5 + $0x1a0] sm:$0xff] }
 0x18e   :  { %v1830_v10 = vpop.eup %1829 }
 0x18f   :  { %v1832_v11 = vpop.eup %1831  ;;  %v654_v14 = vadd.f32 1.0, %v1830_v10  ;;  %1833 = vpow2.f32 %v1771_v9  ;;  %v2711_v9 = vld [vmem:[#allocation5 + $0x1a8] sm:$0xff]  ;;  %v2714_v10 = vld [vmem:[#allocation5 + $0x1b0] sm:$0xff] }
 0x190   :  { %v673_v32 = vadd.f32 1.0, %v1832_v11  ;;  %v2717_v11 = vld [vmem:[#allocation5 + $0x1b8] sm:$0xff] }
 0x191   :  { %1835 = vrcp.f32 %v654_v14  ;;  %v666_v28 = vand.u32 2147483648, %v654_v14  ;;  %v664_v25 = vand.u32 2147483647, %v654_v14  ;;  %vm660_vm6 = vweird.f32 %v654_v14 }
 0x192   :  { %1837 = vrcp.f32 %v673_v32  ;;  %v685_v26 = vand.u32 2147483648, %v673_v32  ;;  %v683_v33 = vand.u32 2147483647, %v673_v32  ;;  %vm679_vm5 = vweird.f32 %v673_v32 }
 0x193   :  { %v667_v36 = vor.u32 1.1754944e-38, %v666_v28  ;;  %vm665_vm10 = vcmp.eq.f32.partialorder %v664_v25, 8.507059e+37  ;;  %v2768_v28 = vld [vmem:[#allocation5 + $0x100] sm:$0xff]  ;;  %v2777_v25 = vld [vmem:[#allocation5 + $0x118] sm:$0xff] }
 0x194   :  { %v686_v39 = vor.u32 1.1754944e-38, %v685_v26  ;;  %vm684_vm11 = vcmp.eq.f32.partialorder %v683_v33, 8.507059e+37  ;;  %v2771_v26 = vld [vmem:[#allocation5 + $0x108] sm:$0xff] }
 0x195   :  { %v1834_v17 = vpop.eup %1833  ;;  %v2783_v33 = vld [vmem:[#allocation5 + $0xe8] sm:$0xff] }
 0x196   :  { %v693_v12 = vadd.f32 1.0, %v1834_v17  ;;  %v2735_v17 = vld [vmem:[#allocation5 + $0x168] sm:$0xff] }
 0x197   :  { %v1836_v13 = vpop.eup %1835 }
 0x198   :  { %v1838_v27 = vpop.eup %1837  ;;  %v656_v22 = vmul.f32 %v1836_v13, %v654_v14  ;;  %1839 = vrcp.f32 %v693_v12  ;;  %vm661_vm3 = vweird.f32 %v1836_v13  ;;  %v705_v54 = vand.u32 2147483648, %v693_v12  ;;  %v2720_v14 = vld [vmem:[#allocation5 + $0x180] sm:$0xff] }
 0x199   :  { %v675_v21 = vmul.f32 %v1838_v27, %v673_v32  ;;  %1841 = vtanh.f32 %v649_v19  ;;  %vm680_vm4 = vweird.f32 %v1838_v27  ;;  %vm662_vm7 = vmor %vm660_vm6, %vm661_vm3  ;;  %vm699_vm14 = vweird.f32 %v693_v12  ;;  %v2723_v32 = vld [vmem:[#allocation5 + $0x188] sm:$0xff] }
 0x19a   :  { %v657_v31 = vsub.f32 1.0, %v656_v22  ;;  %vm681_vm9 = vmor %vm679_vm5, %vm680_vm4  ;;  %v703_v56 = vand.u32 2147483647, %v693_v12  ;;  %v706_v59 = vor.u32 1.1754944e-38, %v705_v54  ;;  %v2747_v19 = vld [vmem:[#allocation5 + $0x148] sm:$0xff]  ;;  %v2753_v22 = vld [vmem:[#allocation5 + $0x158] sm:$0xff] }
 0x19b   :  { %v676_v24 = vsub.f32 1.0, %v675_v21  ;;  %v2756_v21 = vld [vmem:[#allocation5 + $0x120] sm:$0xff]  ;;  %v2843_v54 = vld [vmem:[#allocation5 + $0x48] sm:$0xff] }
 0x19c   :  { %v658_v30 = vmul.f32 %v1836_v13, %v657_v31  ;;  %vm704_vm0 = vcmp.eq.f32.partialorder %v703_v56, 8.507059e+37  ;;  %v2759_v31 = vld [vmem:[#allocation5 + $0x128] sm:$0xff]  ;;  %3414 = vst [vmem:[#allocation25_spill] sm:$0xff] %v2843_v54  ;;  %v2846_v56 = vld [vmem:[#allocation5 + $0x50] sm:$0xff] }
 0x19d   :  { %v677_v45 = vmul.f32 %v1838_v27, %v676_v24  ;;  %v2765_v24 = vld [vmem:[#allocation5 + $0x138] sm:$0xff]  ;;  %3415 = vst [vmem:[#allocation27_spill] sm:$0xff] %v2846_v56 }
 0x19e   :  { %v1840_v34 = vpop.eup %1839  ;;  %v659_v35 = vadd.f32 %v1836_v13, %v658_v30  ;;  %v2774_v30 = vld [vmem:[#allocation5 + $0x110] sm:$0xff] }
 0x19f   :  { %v678_v37 = vadd.f32 %v1838_v27, %v677_v45  ;;  %v695_v38 = vmul.f32 %v1840_v34, %v693_v12  ;;  %v1842_v41 = vpop.eup %1841  ;;  %vm700_vm13 = vweird.f32 %v1840_v34  ;;  %v2738_v12 = vld [vmem:[#allocation5 + $0x170] sm:$0xff]  ;;  %v2780_v45 = vld [vmem:[#allocation5 + $0xe0] sm:$0xff] }
 0x1a0   :  { %v663_v40 = vsel %vm662_vm7, %v1836_v13, %v659_v35  ;;  %vm701_vm15 = vmor %vm699_vm14, %vm700_vm13  ;;  %v2741_v13 = vld [vmem:[#allocation5 + $0x178] sm:$0xff] }
 0x1a1   :  { %v668_v42 = vsel %vm665_vm10, %v667_v36, %v663_v40  ;;  %v682_v43 = vsel %vm681_vm9, %v1838_v27, %v678_v37  ;;  %v696_v44 = vsub.f32 1.0, %v695_v38  ;;  %v2750_v27 = vld [vmem:[#allocation5 + $0x150] sm:$0xff]  ;;  %v2789_v35 = vld [vmem:[#allocation5 + $0xf8] sm:$0xff]  ;;  %v2792_v36 = vld [vmem:[#allocation5 + $0xc0] sm:$0xff] }
 0x1a2   :  { %v687_v46 = vsel %vm684_vm11, %v686_v39, %v682_v43  ;;  %v710_v47 = vmul.f32 %v1842_v41, %v668_v42  ;;  %3397 = vst [vmem:[#allocation10_spill] sm:$0xff] %v2792_v36  ;;  %v2795_v37 = vld [vmem:[#allocation5 + $0xc8] sm:$0xff]  ;;  %v2798_v38 = vld [vmem:[#allocation5 + $0xd0] sm:$0xff]  ;;  %v2801_v39 = vld [vmem:[#allocation5 + $0xd8] sm:$0xff] }
 0x1a3   :  { %v709_v49 = vmul.f32 %v687_v46, %v2580_v16  ;;  %v697_v50 = vmul.f32 %v1840_v34, %v696_v44  ;;  %3398 = vst [vmem:[#allocation9_spill] sm:$0xff] %v2795_v37  ;;  %v2804_v40 = vld [vmem:[#allocation5 + $0xa0] sm:$0xff]  ;;  %v2807_v41 = vld [vmem:[#allocation5 + $0xa8] sm:$0xff]  ;;  %v2810_v42 = vld [vmem:[#allocation5 + $0xb0] sm:$0xff] }
 0x1a4   :  { %3399 = vst [vmem:[#allocation11_spill] sm:$0xff] %v2798_v38  ;;  %v2813_v43 = vld [vmem:[#allocation5 + $0xb8] sm:$0xff]  ;;  %v2816_v44 = vld [vmem:[#allocation5 + $0x80] sm:$0xff]  ;;  %v2819_v46 = vld [vmem:[#allocation5 + $0x88] sm:$0xff] }
 0x1a5   :  { %v711_v52 = vadd.f32 %v710_v47, %v709_v49  ;;  %v698_v53 = vadd.f32 %v1840_v34, %v697_v50  ;;  %3400 = vst [vmem:[#allocation12_spill] sm:$0xff] %v2801_v39  ;;  %v2822_v47 = vld [vmem:[#allocation5 + $0x90] sm:$0xff]  ;;  %v2828_v49 = vld [vmem:[#allocation5 + $0x60] sm:$0xff]  ;;  %v2831_v50 = vld [vmem:[#allocation5 + $0x68] sm:$0xff] }
 0x1a6   :  { %3401 = vst [vmem:[#allocation14_spill] sm:$0xff] %v2804_v40 }
 0x1a7   :  { %1843 = vtanh.f32 %v711_v52  ;;  %v2670_v55 = vsel %vm721_vm12, %v711_v52, %v2580_v16  ;;  %v702_v57 = vsel %vm701_vm15, %v1840_v34, %v698_v53  ;;  %v2684_v16 = vld [vmem:[#allocation5 + $0x1e0] sm:$0xff]  ;;  %v2786_v34 = vld [vmem:[#allocation5 + $0xf0] sm:$0xff]  ;;  %3402 = vst [vmem:[#allocation13_spill] sm:$0xff] %v2807_v41  ;;  %v2837_v52 = vld [vmem:[#allocation5 + $0x78] sm:$0xff] }
 0x1a8   :  { %v707_v61 = vsel %vm704_vm0, %v706_v59, %v702_v57  ;;  %3403 = vst [vmem:[#allocation15_spill] sm:$0xff] %v2810_v42  ;;  %v2840_v53 = vld [vmem:[#allocation5 + $0x40] sm:$0xff]  ;;  %v2849_v57 = vld [vmem:[#allocation5 + $0x58] sm:$0xff] }
 0x1a9   :  { %3404 = vst [vmem:[#allocation16_spill] sm:$0xff] %v2813_v43  ;;  %v2852_v59 = vld [vmem:[#allocation5 + $0x20] sm:$0xff] }
 0x1aa   :  { %3405 = vst [vmem:[#allocation18_spill] sm:$0xff] %v2816_v44 }
 0x1ab   :  { %3406 = vst [vmem:[#allocation17_spill] sm:$0xff] %v2819_v46 }
 0x1ac   :  { %3407 = vst [vmem:[#allocation19_spill] sm:$0xff] %v2822_v47 }
 0x1ad   :  { %v1844_v60 = vpop.eup %1843  ;;  %3409 = vst [vmem:[#allocation22_spill] sm:$0xff] %v2828_v49 }
 0x1ae   :  { %v713_v62 = vmul.f32 %v1844_v60, %v707_v61  ;;  %3410 = vst [vmem:[#allocation21_spill] sm:$0xff] %v2831_v50  ;;  %v2855_v60 = vld [vmem:[#allocation5 + $0x28] sm:$0xff]  ;;  %v2858_v61 = vld [vmem:[#allocation5 + $0x30] sm:$0xff] }
 0x1af   :  { %3412 = vst [vmem:[#allocation24_spill] sm:$0xff] %v2837_v52 }
 0x1b0   :  { %v722_v63 = vsel %vm721_vm12, %v713_v62, 0.0  ;;  %v2675_v0 = vsel %vm721_vm12, %v713_v62, %v2583_v15  ;;  %v2690_v15 = vld [vmem:[#allocation5 + $0x1f0] sm:$0xff]  ;;  %3413 = vst [vmem:[#allocation26_spill] sm:$0xff] %v2840_v53  ;;  %v2861_v62 = vld [vmem:[#allocation5 + $0x38] sm:$0xff] }
 0x1b1   :  { %1773 = vst [vmem:[%s3202_s5 + $0x8] sm:$0xff] %v722_v63  ;;  %748 = vmatmul.f32.vlgmr.msrb.gmra.mxu0 %v2675_v0  ;;  %768 = vmatmul.f32.vlgmr.msrb.gmra.mxu1 %v2675_v0  ;;  %v2864_v63 = vld [vmem:[#allocation5] sm:$0xff] }
 0x1b2   :  { %788 = vmatmul.f32.vlgmr.msrb.gmra.mxu2 %v2675_v0  ;;  %808 = vmatmul.f32.vlgmr.msrb.gmra.mxu3 %v2675_v0  ;;  %3416 = vst [vmem:[#allocation28_spill] sm:$0xff] %v2849_v57 }
 0x1b3   :  { %1062 = vmatpush.msrb.mxu0 %v2684_v16  ;;  %1082 = vmatpush.msrb.mxu1 %v2687_v1  ;;  %3417 = vst [vmem:[#allocation29_spill] sm:$0xff] %v2852_v59 }
 0x1b4   :  { %1102 = vmatpush.msrb.mxu2 %v2690_v15  ;;  %1122 = vmatpush.msrb.mxu3 %v2693_v2  ;;  %3418 = vst [vmem:[#allocation30_spill] sm:$0xff] %v2855_v60 }
 0x1b5   :  { %1063 = vmatpush.msrb.mxu0 %v2696_v3  ;;  %1083 = vmatpush.msrb.mxu1 %v2699_v4  ;;  %3419 = vst [vmem:[#allocation32_spill] sm:$0xff] %v2858_v61 }
 0x1b6   :  { %1103 = vmatpush.msrb.mxu2 %v2702_v5  ;;  %1123 = vmatpush.msrb.mxu3 %v2705_v6  ;;  %3420 = vst [vmem:[#allocation33_spill] sm:$0xff] %v2861_v62 }
 0x1b7   :  { %1064 = vmatpush.msrb.mxu0 %v2708_v8  ;;  %1084 = vmatpush.msrb.mxu1 %v2711_v9  ;;  %3421 = vst [vmem:[#allocation34_spill] sm:$0xff] %v2864_v63 }
 0x1b8   :  { %1104 = vmatpush.msrb.mxu2 %v2714_v10  ;;  %1124 = vmatpush.msrb.mxu3 %v2717_v11 }
 0x1b9   :  { %1065 = vmatpush.msrb.mxu0 %v2720_v14  ;;  %1085 = vmatpush.msrb.mxu1 %v2723_v32 }
 0x1ba   :  { %1105 = vmatpush.msrb.mxu2 %v2726_v23  ;;  %1125 = vmatpush.msrb.mxu3 %v2729_v58 }
 0x1bb   :  { %1066 = vmatpush.msrb.mxu0 %v2732_v20  ;;  %1086 = vmatpush.msrb.mxu1 %v2735_v17 }
 0x1bc   :  { %1106 = vmatpush.msrb.mxu2 %v2738_v12  ;;  %1126 = vmatpush.msrb.mxu3 %v2741_v13 }
 0x1bd   :  { %1067 = vmatpush.msrb.mxu0 %v2744_v7  ;;  %1087 = vmatpush.msrb.mxu1 %v2747_v19 }
 0x1be   :  { %1107 = vmatpush.msrb.mxu2 %v2750_v27  ;;  %1127 = vmatpush.msrb.mxu3 %v2753_v22 }
 0x1bf   :  { %1068 = vmatpush.msrb.mxu0 %v2756_v21  ;;  %1088 = vmatpush.msrb.mxu1 %v2759_v31 }
 0x1c0   :  { %1108 = vmatpush.msrb.mxu2 %v2762_v29  ;;  %1128 = vmatpush.msrb.mxu3 %v2765_v24 }
 0x1c1   :  { %1069 = vmatpush.msrb.mxu0 %v2768_v28  ;;  %1089 = vmatpush.msrb.mxu1 %v2771_v26 }
 0x1c2   :  { %1109 = vmatpush.msrb.mxu2 %v2774_v30  ;;  %1129 = vmatpush.msrb.mxu3 %v2777_v25 }
 0x1c3   :  { %1070 = vmatpush.msrb.mxu0 %v2780_v45  ;;  %1090 = vmatpush.msrb.mxu1 %v2783_v33 }
 0x1c4   :  { %1110 = vmatpush.msrb.mxu2 %v2786_v34  ;;  %1130 = vmatpush.msrb.mxu3 %v2789_v35 }
 0x1c5   :  { %1071 = vmatpush.msrb.mxu0 %v2792_v36  ;;  %1091 = vmatpush.msrb.mxu1 %v2795_v37  ;;  %v885_v37 = vpop.permute.xlu1 %884 }
 0x1c6   :  { %1111 = vmatpush.msrb.mxu2 %v2798_v38  ;;  %1131 = vmatpush.msrb.mxu3 %v2801_v39  ;;  %vm886_vm9 = vcmp.eq.s32.totalorder %v885_v37, 1  ;;  %v3431_v37 = vld [vmem:[#allocation11_spill] sm:$0xff] }
 0x1c7   :  { %1072 = vmatpush.msrb.mxu0 %v2804_v40  ;;  %1092 = vmatpush.msrb.mxu1 %v2807_v41 }
 0x1c8   :  { %1112 = vmatpush.msrb.mxu2 %v2810_v42  ;;  %1132 = vmatpush.msrb.mxu3 %v2813_v43 }
 0x1c9   :  { %1073 = vmatpush.msrb.mxu0 %v2816_v44  ;;  %1093 = vmatpush.msrb.mxu1 %v2819_v46 }
 0x1ca   :  { %1113 = vmatpush.msrb.mxu2 %v2822_v47  ;;  %1133 = vmatpush.msrb.mxu3 %v2825_v48 }
 0x1cb   :  { %1074 = vmatpush.msrb.mxu0 %v2828_v49  ;;  %1094 = vmatpush.msrb.mxu1 %v2831_v50 }
 0x1cc   :  { %1114 = vmatpush.msrb.mxu2 %v2834_v51  ;;  %1134 = vmatpush.msrb.mxu3 %v2837_v52 }
 0x1cd   :  { %1075 = vmatpush.msrb.mxu0 %v2840_v53  ;;  %1095 = vmatpush.msrb.mxu1 %v2843_v54  ;;  %v3426_v54 = vld [vmem:[#allocation41_spill] sm:$0xff] }
 0x1ce   :  { %1115 = vmatpush.msrb.mxu2 %v2846_v56  ;;  %1135 = vmatpush.msrb.mxu3 %v2849_v57  ;;  %v3425_v56 = vld [vmem:[#allocation40_spill] sm:$0xff] }
 0x1cf   :  { %1076 = vmatpush.msrb.mxu0 %v2852_v59  ;;  %1096 = vmatpush.msrb.mxu1 %v2855_v60  ;;  %v2870_v59 = vld [vmem:[#allocation5 + $0x10] sm:$0xff]  ;;  %v2873_v60 = vld [vmem:[#allocation5 + $0x18] sm:$0xff] }
 0x1d0   :  { %1116 = vmatpush.msrb.mxu2 %v2858_v61  ;;  %1136 = vmatpush.msrb.mxu3 %v2861_v62  ;;  %3423 = vst [vmem:[#allocation36_spill] sm:$0xff] %v2870_v59 }
 0x1d1   :  { %1077 = vmatpush.msrb.mxu0 %v2864_v63  ;;  %1097 = vmatpush.msrb.mxu1 %v2867_v18  ;;  %3424 = vst [vmem:[#allocation37_spill] sm:$0xff] %v2873_v60  ;;  %v3427_v18 = vld [vmem:[#allocation43_spill] sm:$0xff] }
 0x1d2   :  { %1117 = vmatpush.msrb.mxu2 %v2870_v59  ;;  %1137 = vmatpush.msrb.mxu3 %v2873_v60 }
 0x22e   :  { %v749_v61 = vpop.f32.mrf.mxu0  ;;  %v769_v57 = vpop.f32.mrf.mxu1 }
 0x22f   :  { %v812_v62 = vadd.f32 %v749_v61, %v3425_v56  ;;  %v813_v53 = vadd.f32 %v769_v57, %v3426_v54  ;;  %v3428_v54 = vld [vmem:[#allocation42_spill] sm:$0xff] }
 0x231   :  { %v1774_v52 = vmul.f32 -1.442695, %v812_v62  ;;  %v1775_v63 = vmul.f32 -1.442695, %v813_v53 }
 0x233   :  { %1845 = vpow2.f32 %v1774_v52 }
 0x234   :  { %1847 = vpow2.f32 %v1775_v63 }
 0x235   :  { %v809_v51 = vpop.f32.mrf.mxu3  ;;  %v789_v60 = vpop.f32.mrf.mxu2 }
 0x236   :  { %v815_v50 = vadd.f32 %v809_v51, %v3427_v18  ;;  %v814_v57 = vadd.f32 %v789_v60, %v3428_v54 }
 0x238   :  { %v1776_v49 = vmul.f32 -1.442695, %v815_v50 }
 0x239   :  { %v1846_v48 = vpop.eup %1845 }
 0x23a   :  { %v1848_v59 = vpop.eup %1847  ;;  %v819_v47 = vadd.f32 1.0, %v1846_v48  ;;  %1849 = vpow2.f32 %v1776_v49 }
 0x23b   :  { %v838_v46 = vadd.f32 1.0, %v1848_v59 }
 0x23c   :  { %1851 = vrcp.f32 %v819_v47  ;;  %v831_v50 = vand.u32 2147483648, %v819_v47  ;;  %v829_v48 = vand.u32 2147483647, %v819_v47  ;;  %vm825_vm3 = vweird.f32 %v819_v47 }
 0x23d   :  { %1853 = vrcp.f32 %v838_v46  ;;  %v850_v49 = vand.u32 2147483648, %v838_v46  ;;  %v848_v43 = vand.u32 2147483647, %v838_v46  ;;  %vm844_vm5 = vweird.f32 %v838_v46 }
 0x23e   :  { %v832_v60 = vor.u32 1.1754944e-38, %v831_v50  ;;  %vm830_vm6 = vcmp.eq.f32.partialorder %v829_v48, 8.507059e+37 }
 0x23f   :  { %vm849_vm8 = vcmp.eq.f32.partialorder %v848_v43, 8.507059e+37 }
 0x240   :  { %v1850_v44 = vpop.eup %1849 }
 0x241   :  { %v858_v56 = vadd.f32 1.0, %v1850_v44 }
 0x242   :  { %v1852_v61 = vpop.eup %1851 }
 0x243   :  { %v1854_v53 = vpop.eup %1853  ;;  %v821_v52 = vmul.f32 %v1852_v61, %v819_v47  ;;  %1855 = vrcp.f32 %v858_v56  ;;  %vm826_vm1 = vweird.f32 %v1852_v61  ;;  %vm864_vm11 = vweird.f32 %v858_v56 }
 0x244   :  { %v840_v62 = vmul.f32 %v1854_v53, %v838_v46  ;;  %1857 = vtanh.f32 %v814_v57  ;;  %vm845_vm2 = vweird.f32 %v1854_v53  ;;  %vm827_vm4 = vmor %vm825_vm3, %vm826_vm1  ;;  %v870_v46 = vand.u32 2147483648, %v858_v56 }
 0x245   :  { %v822_v63 = vsub.f32 1.0, %v821_v52  ;;  %vm846_vm7 = vmor %vm844_vm5, %vm845_vm2  ;;  %v851_v52 = vor.u32 1.1754944e-38, %v850_v49  ;;  %v3434_v49 = vld [vmem:[#allocation13_spill] sm:$0xff] }
 0x246   :  { %v841_v18 = vsub.f32 1.0, %v840_v62  ;;  %v871_v43 = vor.u32 1.1754944e-38, %v870_v46  ;;  %v3447_v46 = vld [vmem:[#allocation27_spill] sm:$0xff] }
 0x247   :  { %v823_v51 = vmul.f32 %v1852_v61, %v822_v63 }
 0x248   :  { %v842_v59 = vmul.f32 %v1854_v53, %v841_v18 }
 0x249   :  { %v1856_v42 = vpop.eup %1855  ;;  %v824_v44 = vadd.f32 %v1852_v61, %v823_v51 }
 0x24a   :  { %v860_v54 = vmul.f32 %v1856_v42, %v858_v56  ;;  %v843_v41 = vadd.f32 %v1854_v53, %v842_v59  ;;  %v1858_v57 = vpop.eup %1857  ;;  %vm865_vm10 = vweird.f32 %v1856_v42  ;;  %v3435_v59 = vld [vmem:[#allocation15_spill] sm:$0xff] }
 0x24b   :  { %v828_v40 = vsel %vm827_vm4, %v1852_v61, %v824_v44  ;;  %vm866_vm12 = vmor %vm864_vm11, %vm865_vm10  ;;  %v3436_v44 = vld [vmem:[#allocation16_spill] sm:$0xff] }
 0x24c   :  { %v833_v62 = vsel %vm830_vm6, %v832_v60, %v828_v40  ;;  %v861_v63 = vsub.f32 1.0, %v860_v54  ;;  %v847_v39 = vsel %vm846_vm7, %v1854_v53, %v843_v41  ;;  %v868_v40 = vand.u32 2147483647, %v858_v56  ;;  %v3433_v56 = vld [vmem:[#allocation14_spill] sm:$0xff]  ;;  %v3438_v54 = vld [vmem:[#allocation17_spill] sm:$0xff] }
 0x24d   :  { %v875_v18 = vmul.f32 %v1858_v57, %v833_v62  ;;  %v852_v38 = vsel %vm849_vm8, %v851_v52, %v847_v39  ;;  %v3437_v60 = vld [vmem:[#allocation18_spill] sm:$0xff]  ;;  %v3439_v52 = vld [vmem:[#allocation19_spill] sm:$0xff]  ;;  %v3440_v57 = vld [vmem:[#allocation20_spill] sm:$0xff] }
 0x24e   :  { %v862_v36 = vmul.f32 %v1856_v42, %v861_v63  ;;  %v874_v47 = vmul.f32 %v852_v38, %v2670_v55  ;;  %vm869_vm13 = vcmp.eq.f32.partialorder %v868_v40, 8.507059e+37  ;;  %v3441_v62 = vld [vmem:[#allocation22_spill] sm:$0xff]  ;;  %v3442_v63 = vld [vmem:[#allocation21_spill] sm:$0xff]  ;;  %v3448_v40 = vld [vmem:[#allocation28_spill] sm:$0xff] }
 0x250   :  { %v876_v50 = vadd.f32 %v875_v18, %v874_v47  ;;  %v863_v51 = vadd.f32 %v1856_v42, %v862_v36  ;;  %v3443_v18 = vld [vmem:[#allocation23_spill] sm:$0xff]  ;;  %v3444_v47 = vld [vmem:[#allocation24_spill] sm:$0xff] }
 0x252   :  { %1859 = vtanh.f32 %v876_v50  ;;  %v2883_v61 = vsel %vm886_vm9, %v876_v50, %v2670_v55  ;;  %v867_v41 = vsel %vm866_vm12, %v1856_v42, %v863_v51  ;;  %v3429_v55 = vld [vmem:[#allocation10_spill] sm:$0xff]  ;;  %v3432_v42 = vld [vmem:[#allocation12_spill] sm:$0xff]  ;;  %v3446_v51 = vld [vmem:[#allocation25_spill] sm:$0xff] }
 0x253   :  { %v872_v53 = vsel %vm869_vm13, %v871_v43, %v867_v41  ;;  %v3445_v50 = vld [vmem:[#allocation26_spill] sm:$0xff]  ;;  %v3449_v41 = vld [vmem:[#allocation29_spill] sm:$0xff] }
 0x254   :  { %v3450_v43 = vld [vmem:[#allocation30_spill] sm:$0xff] }
 0x258   :  { %v1860_v39 = vpop.eup %1859 }
 0x259   :  { %v878_v48 = vmul.f32 %v1860_v39, %v872_v53  ;;  %v3451_v39 = vld [vmem:[#allocation32_spill] sm:$0xff]  ;;  %v3452_v53 = vld [vmem:[#allocation33_spill] sm:$0xff] }
 0x25b   :  { %v887_v38 = vsel %vm886_vm9, %v878_v48, 0.0  ;;  %v2888_v36 = vsel %vm886_vm9, %v878_v48, %v2675_v0  ;;  %v3430_v0 = vld [vmem:[#allocation9_spill] sm:$0xff]  ;;  %v3453_v48 = vld [vmem:[#allocation34_spill] sm:$0xff] }
 0x25c   :  { %1778 = vst [vmem:[%s3202_s5 + $0x10] sm:$0xff] %v887_v38  ;;  %913 = vmatmul.f32.vlgmr.msra.gmra.mxu0 %v2888_v36  ;;  %933 = vmatmul.f32.vlgmr.msra.gmra.mxu1 %v2888_v36  ;;  %v3454_v38 = vld [vmem:[#allocation35_spill] sm:$0xff] }
 0x25d   :  { %953 = vmatmul.f32.vlgmr.msra.gmra.mxu2 %v2888_v36  ;;  %973 = vmatmul.f32.vlgmr.msra.gmra.mxu3 %v2888_v36 }
 0x25e   :  { %1227 = vmatpush.msra.mxu0 %v2684_v16  ;;  %1247 = vmatpush.msra.mxu1 %v2687_v1 }
 0x25f   :  { %1267 = vmatpush.msra.mxu2 %v2690_v15  ;;  %1287 = vmatpush.msra.mxu3 %v2693_v2 }
 0x260   :  { %1228 = vmatpush.msra.mxu0 %v2696_v3  ;;  %1248 = vmatpush.msra.mxu1 %v2699_v4 }
 0x261   :  { %1268 = vmatpush.msra.mxu2 %v2702_v5  ;;  %1288 = vmatpush.msra.mxu3 %v2705_v6 }
 0x262   :  { %1229 = vmatpush.msra.mxu0 %v2708_v8  ;;  %1249 = vmatpush.msra.mxu1 %v2711_v9 }
 0x263   :  { %1269 = vmatpush.msra.mxu2 %v2714_v10  ;;  %1289 = vmatpush.msra.mxu3 %v2717_v11 }
 0x264   :  { %1230 = vmatpush.msra.mxu0 %v2720_v14  ;;  %1250 = vmatpush.msra.mxu1 %v2723_v32 }
 0x265   :  { %1270 = vmatpush.msra.mxu2 %v2726_v23  ;;  %1290 = vmatpush.msra.mxu3 %v2729_v58 }
 0x266   :  { %1231 = vmatpush.msra.mxu0 %v2732_v20  ;;  %1251 = vmatpush.msra.mxu1 %v2735_v17 }
 0x267   :  { %1271 = vmatpush.msra.mxu2 %v2738_v12  ;;  %1291 = vmatpush.msra.mxu3 %v2741_v13 }
 0x268   :  { %1232 = vmatpush.msra.mxu0 %v2744_v7  ;;  %1252 = vmatpush.msra.mxu1 %v2747_v19 }
 0x269   :  { %1272 = vmatpush.msra.mxu2 %v2750_v27  ;;  %1292 = vmatpush.msra.mxu3 %v2753_v22 }
 0x26a   :  { %1233 = vmatpush.msra.mxu0 %v2756_v21  ;;  %1253 = vmatpush.msra.mxu1 %v2759_v31 }
 0x26b   :  { %1273 = vmatpush.msra.mxu2 %v2762_v29  ;;  %1293 = vmatpush.msra.mxu3 %v2765_v24 }
 0x26c   :  { %1234 = vmatpush.msra.mxu0 %v2768_v28  ;;  %1254 = vmatpush.msra.mxu1 %v2771_v26 }
 0x26d   :  { %1274 = vmatpush.msra.mxu2 %v2774_v30  ;;  %1294 = vmatpush.msra.mxu3 %v2777_v25 }
 0x26e   :  { %1235 = vmatpush.msra.mxu0 %v2780_v45  ;;  %1255 = vmatpush.msra.mxu1 %v2783_v33 }
 0x26f   :  { %1275 = vmatpush.msra.mxu2 %v2786_v34  ;;  %1295 = vmatpush.msra.mxu3 %v2789_v35 }
 0x270   :  { %1236 = vmatpush.msra.mxu0 %v3429_v55  ;;  %1256 = vmatpush.msra.mxu1 %v3430_v0 }
 0x271   :  { %1276 = vmatpush.msra.mxu2 %v3431_v37  ;;  %1296 = vmatpush.msra.mxu3 %v3432_v42 }
 0x272   :  { %1237 = vmatpush.msra.mxu0 %v3433_v56  ;;  %1257 = vmatpush.msra.mxu1 %v3434_v49 }
 0x273   :  { %1277 = vmatpush.msra.mxu2 %v3435_v59  ;;  %1297 = vmatpush.msra.mxu3 %v3436_v44 }
 0x274   :  { %1238 = vmatpush.msra.mxu0 %v3437_v60  ;;  %1258 = vmatpush.msra.mxu1 %v3438_v54 }
 0x275   :  { %1278 = vmatpush.msra.mxu2 %v3439_v52  ;;  %1298 = vmatpush.msra.mxu3 %v3440_v57 }
 0x276   :  { %1239 = vmatpush.msra.mxu0 %v3441_v62  ;;  %1259 = vmatpush.msra.mxu1 %v3442_v63  ;;  %v3458_v63 = vld [vmem:[#allocation45_spill] sm:$0xff] }
 0x277   :  { %1279 = vmatpush.msra.mxu2 %v3443_v18  ;;  %1299 = vmatpush.msra.mxu3 %v3444_v47  ;;  %v3455_v47 = vld [vmem:[#allocation36_spill] sm:$0xff] }
 0x278   :  { %1240 = vmatpush.msra.mxu0 %v3445_v50  ;;  %1260 = vmatpush.msra.mxu1 %v3446_v51  ;;  %v3456_v50 = vld [vmem:[#allocation37_spill] sm:$0xff]  ;;  %v3457_v18 = vld [vmem:[#allocation44_spill] sm:$0xff] }
 0x279   :  { %1280 = vmatpush.msra.mxu2 %v3447_v46  ;;  %1300 = vmatpush.msra.mxu3 %v3448_v40 }
 0x27a   :  { %1241 = vmatpush.msra.mxu0 %v3449_v41  ;;  %1261 = vmatpush.msra.mxu1 %v3450_v43 }
 0x27b   :  { %1281 = vmatpush.msra.mxu2 %v3451_v39  ;;  %1301 = vmatpush.msra.mxu3 %v3452_v53  ;;  %v3459_v53 = vld [vmem:[#allocation47_spill] sm:$0xff] }
 0x27c   :  { %1242 = vmatpush.msra.mxu0 %v3453_v48  ;;  %1262 = vmatpush.msra.mxu1 %v3454_v38 }
 0x27d   :  { %1282 = vmatpush.msra.mxu2 %v3455_v47  ;;  %1302 = vmatpush.msra.mxu3 %v3456_v50 }
 0x2d9   :  { %v914_v51 = vpop.f32.mrf.mxu0  ;;  %v934_v46 = vpop.f32.mrf.mxu1 }
 0x2da   :  { %v977_v40 = vadd.f32 %v914_v51, %v3457_v18  ;;  %v978_v41 = vadd.f32 %v934_v46, %v3458_v63  ;;  %v2005_v18 = vld [vmem:[%s3198_s1] sm:$0xff]  ;;  %v3460_v51 = vmov 0  }
 0x2db   :  { %vm1787_vm14 = vcmp.gt.s32.totalorder %v2005_v18, 4  ;;  %vm1792_vm15 = vcmp.gt.s32.totalorder %v2005_v18, 5 }
 0x2dc   :  { %v1779_v62 = vmul.f32 -1.442695, %v977_v40  ;;  %v1780_v43 = vmul.f32 -1.442695, %v978_v41 }
 0x2de   :  { %1861 = vpow2.f32 %v1779_v62  ;;  %v1212_v62 = vsel %vm1787_vm14, 1, %v3460_v51 }
 0x2df   :  { %1863 = vpow2.f32 %v1780_v43  ;;  %1214 = vperm.xlu2 %1812, %v1212_v62  }
 0x2e0   :  { %v974_v39 = vpop.f32.mrf.mxu3  ;;  %v954_v63 = vpop.f32.mrf.mxu2 }
 0x2e1   :  { %v980_v57 = vadd.f32 %v974_v39, %v3459_v53 }
 0x2e3   :  { %v1781_v48 = vmul.f32 -1.442695, %v980_v57  ;;  %v3461_v57 = vld [vmem:[#allocation46_spill] sm:$0xff] }
 0x2e4   :  { %v1862_v52 = vpop.eup %1861  ;;  %v979_v43 = vadd.f32 %v954_v63, %v3461_v57 }
 0x2e5   :  { %v1864_v38 = vpop.eup %1863  ;;  %v984_v54 = vadd.f32 1.0, %v1862_v52  ;;  %1865 = vpow2.f32 %v1781_v48 }
 0x2e6   :  { %v1003_v47 = vadd.f32 1.0, %v1864_v38  ;;  %v1377_v38 = vsel %vm1792_vm15, 1, %v3460_v51 }
 0x2e7   :  { %1867 = vrcp.f32 %v984_v54  ;;  %v996_v60 = vand.u32 2147483648, %v984_v54  ;;  %v994_v49 = vand.u32 2147483647, %v984_v54  ;;  %1379 = vperm.xlu2 %1812, %v1377_v38   ;;  %vm990_vm2 = vweird.f32 %v984_v54 }
 0x2e8   :  { %1869 = vrcp.f32 %v1003_v47  ;;  %v1015_v44 = vand.u32 2147483648, %v1003_v47  ;;  %vm1009_vm3 = vweird.f32 %v1003_v47 }
 0x2e9   :  { %v997_v57 = vor.u32 1.1754944e-38, %v996_v60  ;;  %vm995_vm6 = vcmp.eq.f32.partialorder %v994_v49, 8.507059e+37 }
 0x2ea   :  { %v1016_v51 = vor.u32 1.1754944e-38, %v1015_v44 }
 0x2eb   :  { %v1866_v46 = vpop.eup %1865 }
 0x2ec   :  { %v1023_v40 = vadd.f32 1.0, %v1866_v46  ;;  %v1013_v46 = vand.u32 2147483647, %v1003_v47 }
 0x2ed   :  { %v1868_v41 = vpop.eup %1867 }
 0x2ee   :  { %v1870_v52 = vpop.eup %1869  ;;  %v986_v39 = vmul.f32 %v1868_v41, %v984_v54  ;;  %1871 = vrcp.f32 %v1023_v40  ;;  %vm991_vm0 = vweird.f32 %v1868_v41  ;;  %vm1014_vm7 = vcmp.eq.f32.partialorder %v1013_v46, 8.507059e+37  ;;  %v1050_v54 = vpop.permute.xlu1 %1049 }
 0x2ef   :  { %v1005_v53 = vmul.f32 %v1870_v52, %v1003_v47  ;;  %1873 = vtanh.f32 %v979_v43  ;;  %vm1010_vm1 = vweird.f32 %v1870_v52  ;;  %vm992_vm4 = vmor %vm990_vm2, %vm991_vm0  ;;  %vm1051_vm8 = vcmp.eq.s32.totalorder %v1050_v54, 1  ;;  %v3476_v54 = vld [vmem:[#allocation24_spill] sm:$0xff] }
 0x2f0   :  { %v987_v48 = vsub.f32 1.0, %v986_v39  ;;  %vm1011_vm5 = vmor %vm1009_vm3, %vm1010_vm1  ;;  %vm1029_vm10 = vweird.f32 %v1023_v40  ;;  %v1033_v44 = vand.u32 2147483647, %v1023_v40 }
 0x2f1   :  { %v1006_v50 = vsub.f32 1.0, %v1005_v53 }
 0x2f2   :  { %v988_v59 = vmul.f32 %v1868_v41, %v987_v48  ;;  %vm1034_vm12 = vcmp.eq.f32.partialorder %v1033_v44, 8.507059e+37  ;;  %v3480_v44 = vld [vmem:[#allocation28_spill] sm:$0xff] }
 0x2f3   :  { %v1007_v62 = vmul.f32 %v1870_v52, %v1006_v50 }
 0x2f4   :  { %v1872_v63 = vpop.eup %1871  ;;  %v989_v18 = vadd.f32 %v1868_v41, %v988_v59 }
 0x2f5   :  { %v1008_v39 = vadd.f32 %v1870_v52, %v1007_v62  ;;  %v1025_v56 = vmul.f32 %v1872_v63, %v1023_v40  ;;  %v1874_v43 = vpop.eup %1873  ;;  %vm1030_vm9 = vweird.f32 %v1872_v63  ;;  %v1035_v62 = vand.u32 2147483648, %v1023_v40  ;;  %v3464_v40 = vld [vmem:[#allocation12_spill] sm:$0xff] }
 0x2f6   :  { %v993_v53 = vsel %vm992_vm4, %v1868_v41, %v989_v18  ;;  %vm1031_vm11 = vmor %vm1029_vm10, %vm1030_vm9  ;;  %v3466_v18 = vld [vmem:[#allocation13_spill] sm:$0xff] }
 0x2f7   :  { %v998_v48 = vsel %vm995_vm6, %v997_v57, %v993_v53  ;;  %v1012_v42 = vsel %vm1011_vm5, %v1870_v52, %v1008_v39  ;;  %v1026_v50 = vsub.f32 1.0, %v1025_v56  ;;  %v3467_v57 = vld [vmem:[#allocation15_spill] sm:$0xff]  ;;  %v3468_v39 = vld [vmem:[#allocation16_spill] sm:$0xff]  ;;  %v3470_v53 = vld [vmem:[#allocation17_spill] sm:$0xff] }
 0x2f8   :  { %v1017_v37 = vsel %vm1014_vm7, %v1016_v51, %v1012_v42  ;;  %v1040_v0 = vmul.f32 %v1874_v43, %v998_v48  ;;  %v1036_v42 = vor.u32 1.1754944e-38, %v1035_v62  ;;  %v3469_v51 = vld [vmem:[#allocation18_spill] sm:$0xff]  ;;  %v3471_v43 = vld [vmem:[#allocation19_spill] sm:$0xff]  ;;  %v3472_v48 = vld [vmem:[#allocation20_spill] sm:$0xff] }
 0x2f9   :  { %v1039_v38 = vmul.f32 %v1017_v37, %v2883_v61  ;;  %v1027_v59 = vmul.f32 %v1872_v63, %v1026_v50  ;;  %v3473_v50 = vld [vmem:[#allocation22_spill] sm:$0xff]  ;;  %v3479_v62 = vld [vmem:[#allocation27_spill] sm:$0xff] }
 0x2fb   :  { %v1041_v47 = vadd.f32 %v1040_v0, %v1039_v38  ;;  %v1028_v60 = vadd.f32 %v1872_v63, %v1027_v59  ;;  %v3474_v38 = vld [vmem:[#allocation21_spill] sm:$0xff]  ;;  %v3475_v59 = vld [vmem:[#allocation23_spill] sm:$0xff] }
 0x2fd   :  { %1875 = vtanh.f32 %v1041_v47  ;;  %v2973_v49 = vsel %vm1051_vm8, %v1041_v47, %v2883_v61  ;;  %v1032_v56 = vsel %vm1031_vm11, %v1872_v63, %v1028_v60  ;;  %v3462_v61 = vld [vmem:[#allocation9_spill] sm:$0xff]  ;;  %v3465_v63 = vld [vmem:[#allocation14_spill] sm:$0xff] }
 0x2fe   :  { %v1037_v37 = vsel %vm1034_vm12, %v1036_v42, %v1032_v56  ;;  %v3477_v47 = vld [vmem:[#allocation26_spill] sm:$0xff]  ;;  %v3478_v60 = vld [vmem:[#allocation25_spill] sm:$0xff] }
 0x2ff   :  { %v3481_v56 = vld [vmem:[#allocation29_spill] sm:$0xff]  ;;  %v3482_v42 = vld [vmem:[#allocation30_spill] sm:$0xff] }
 0x303   :  { %v1876_v41 = vpop.eup %1875 }
 0x304   :  { %v1043_v52 = vmul.f32 %v1876_v41, %v1037_v37  ;;  %v3483_v41 = vld [vmem:[#allocation32_spill] sm:$0xff]  ;;  %v3484_v37 = vld [vmem:[#allocation33_spill] sm:$0xff] }
 0x306   :  { %v1052_v0 = vsel %vm1051_vm8, %v1043_v52, 0.0  ;;  %v2978_v46 = vsel %vm1051_vm8, %v1043_v52, %v2888_v36  ;;  %v3463_v36 = vld [vmem:[#allocation11_spill] sm:$0xff]  ;;  %v3485_v52 = vld [vmem:[#allocation34_spill] sm:$0xff] }
 0x307   :  { %1783 = vst [vmem:[%s3202_s5 + $0x18] sm:$0xff] %v1052_v0  ;;  %1078 = vmatmul.f32.vlgmr.msrb.gmra.mxu0 %v2978_v46  ;;  %1098 = vmatmul.f32.vlgmr.msrb.gmra.mxu1 %v2978_v46  ;;  %v3486_v0 = vld [vmem:[#allocation35_spill] sm:$0xff] }
 0x308   :  { %1118 = vmatmul.f32.vlgmr.msrb.gmra.mxu2 %v2978_v46  ;;  %1138 = vmatmul.f32.vlgmr.msrb.gmra.mxu3 %v2978_v46 }
 0x309   :  { %1392 = vmatpush.msrb.mxu0 %v2684_v16  ;;  %1412 = vmatpush.msrb.mxu1 %v2687_v1 }
 0x30a   :  { %1432 = vmatpush.msrb.mxu2 %v2690_v15  ;;  %1452 = vmatpush.msrb.mxu3 %v2693_v2 }
 0x30b   :  { %1393 = vmatpush.msrb.mxu0 %v2696_v3  ;;  %1413 = vmatpush.msrb.mxu1 %v2699_v4 }
 0x30c   :  { %1433 = vmatpush.msrb.mxu2 %v2702_v5  ;;  %1453 = vmatpush.msrb.mxu3 %v2705_v6 }
 0x30d   :  { %1394 = vmatpush.msrb.mxu0 %v2708_v8  ;;  %1414 = vmatpush.msrb.mxu1 %v2711_v9 }
 0x30e   :  { %1434 = vmatpush.msrb.mxu2 %v2714_v10  ;;  %1454 = vmatpush.msrb.mxu3 %v2717_v11 }
 0x30f   :  { %1395 = vmatpush.msrb.mxu0 %v2720_v14  ;;  %1415 = vmatpush.msrb.mxu1 %v2723_v32 }
 0x310   :  { %1435 = vmatpush.msrb.mxu2 %v2726_v23  ;;  %1455 = vmatpush.msrb.mxu3 %v2729_v58 }
 0x311   :  { %1396 = vmatpush.msrb.mxu0 %v2732_v20  ;;  %1416 = vmatpush.msrb.mxu1 %v2735_v17 }
 0x312   :  { %1436 = vmatpush.msrb.mxu2 %v2738_v12  ;;  %1456 = vmatpush.msrb.mxu3 %v2741_v13 }
 0x313   :  { %1397 = vmatpush.msrb.mxu0 %v2744_v7  ;;  %1417 = vmatpush.msrb.mxu1 %v2747_v19 }
 0x314   :  { %1437 = vmatpush.msrb.mxu2 %v2750_v27  ;;  %1457 = vmatpush.msrb.mxu3 %v2753_v22 }
 0x315   :  { %1398 = vmatpush.msrb.mxu0 %v2756_v21  ;;  %1418 = vmatpush.msrb.mxu1 %v2759_v31 }
 0x316   :  { %1438 = vmatpush.msrb.mxu2 %v2762_v29  ;;  %1458 = vmatpush.msrb.mxu3 %v2765_v24 }
 0x317   :  { %1399 = vmatpush.msrb.mxu0 %v2768_v28  ;;  %1419 = vmatpush.msrb.mxu1 %v2771_v26 }
 0x318   :  { %1439 = vmatpush.msrb.mxu2 %v2774_v30  ;;  %1459 = vmatpush.msrb.mxu3 %v2777_v25 }
 0x319   :  { %1400 = vmatpush.msrb.mxu0 %v2780_v45  ;;  %1420 = vmatpush.msrb.mxu1 %v2783_v33 }
 0x31a   :  { %1440 = vmatpush.msrb.mxu2 %v2786_v34  ;;  %1460 = vmatpush.msrb.mxu3 %v2789_v35 }
 0x31b   :  { %1401 = vmatpush.msrb.mxu0 %v3429_v55  ;;  %1421 = vmatpush.msrb.mxu1 %v3462_v61 }
 0x31c   :  { %1441 = vmatpush.msrb.mxu2 %v3463_v36  ;;  %1461 = vmatpush.msrb.mxu3 %v3464_v40 }
 0x31d   :  { %1402 = vmatpush.msrb.mxu0 %v3465_v63  ;;  %1422 = vmatpush.msrb.mxu1 %v3466_v18 }
 0x31e   :  { %1442 = vmatpush.msrb.mxu2 %v3467_v57  ;;  %1462 = vmatpush.msrb.mxu3 %v3468_v39 }
 0x31f   :  { %1403 = vmatpush.msrb.mxu0 %v3469_v51  ;;  %1423 = vmatpush.msrb.mxu1 %v3470_v53 }
 0x320   :  { %1443 = vmatpush.msrb.mxu2 %v3471_v43  ;;  %1463 = vmatpush.msrb.mxu3 %v3472_v48 }
 0x321   :  { %1404 = vmatpush.msrb.mxu0 %v3473_v50  ;;  %1424 = vmatpush.msrb.mxu1 %v3474_v38  ;;  %v3490_v38 = vld [vmem:[#allocation49_spill] sm:$0xff] }
 0x322   :  { %1444 = vmatpush.msrb.mxu2 %v3475_v59  ;;  %1464 = vmatpush.msrb.mxu3 %v3476_v54  ;;  %v3487_v54 = vld [vmem:[#allocation36_spill] sm:$0xff] }
 0x323   :  { %1405 = vmatpush.msrb.mxu0 %v3477_v47  ;;  %1425 = vmatpush.msrb.mxu1 %v3478_v60  ;;  %v3488_v47 = vld [vmem:[#allocation37_spill] sm:$0xff]  ;;  %v3489_v59 = vld [vmem:[#allocation48_spill] sm:$0xff] }
 0x324   :  { %1445 = vmatpush.msrb.mxu2 %v3479_v62  ;;  %1465 = vmatpush.msrb.mxu3 %v3480_v44 }
 0x325   :  { %1406 = vmatpush.msrb.mxu0 %v3481_v56  ;;  %1426 = vmatpush.msrb.mxu1 %v3482_v42 }
 0x326   :  { %1446 = vmatpush.msrb.mxu2 %v3483_v41  ;;  %1466 = vmatpush.msrb.mxu3 %v3484_v37  ;;  %v3491_v37 = vld [vmem:[#allocation51_spill] sm:$0xff] }
 0x327   :  { %1407 = vmatpush.msrb.mxu0 %v3485_v52  ;;  %1427 = vmatpush.msrb.mxu1 %v3486_v0 }
 0x328   :  { %1447 = vmatpush.msrb.mxu2 %v3487_v54  ;;  %1467 = vmatpush.msrb.mxu3 %v3488_v47 }
 0x339   :  { %v1215_v40 = vpop.permute.xlu2 %1214 }
 0x33a   :  { %vm1216_vm5 = vcmp.eq.s32.totalorder %v1215_v40, 1 }
 0x384   :  { %v1079_v60 = vpop.f32.mrf.mxu0  ;;  %v1099_v62 = vpop.f32.mrf.mxu1 }
 0x385   :  { %v1142_v44 = vadd.f32 %v1079_v60, %v3489_v59  ;;  %v1143_v56 = vadd.f32 %v1099_v62, %v3490_v38  ;;  %v3492_v38 = vld [vmem:[#allocation50_spill] sm:$0xff] }
 0x387   :  { %v1784_v50 = vmul.f32 -1.442695, %v1142_v44  ;;  %v1785_v42 = vmul.f32 -1.442695, %v1143_v56 }
 0x389   :  { %1877 = vpow2.f32 %v1784_v50 }
 0x38a   :  { %1879 = vpow2.f32 %v1785_v42 }
 0x38b   :  { %v1139_v41 = vpop.f32.mrf.mxu3  ;;  %v1119_v47 = vpop.f32.mrf.mxu2 }
 0x38c   :  { %v1145_v48 = vadd.f32 %v1139_v41, %v3491_v37  ;;  %v1144_v62 = vadd.f32 %v1119_v47, %v3492_v38 }
 0x38e   :  { %v1786_v52 = vmul.f32 -1.442695, %v1145_v48 }
 0x38f   :  { %v1878_v43 = vpop.eup %1877 }
 0x390   :  { %v1880_v0 = vpop.eup %1879  ;;  %v1149_v53 = vadd.f32 1.0, %v1878_v43  ;;  %1881 = vpow2.f32 %v1786_v52 }
 0x391   :  { %v1168_v54 = vadd.f32 1.0, %v1880_v0 }
 0x392   :  { %1883 = vrcp.f32 %v1149_v53  ;;  %v1161_v48 = vand.u32 2147483648, %v1149_v53  ;;  %v1159_v43 = vand.u32 2147483647, %v1149_v53  ;;  %vm1155_vm15 = vweird.f32 %v1149_v53 }
 0x393   :  { %1885 = vrcp.f32 %v1168_v54  ;;  %v1180_v52 = vand.u32 2147483648, %v1168_v54  ;;  %v1178_v39 = vand.u32 2147483647, %v1168_v54  ;;  %vm1174_vm1 = vweird.f32 %v1168_v54 }
 0x394   :  { %v1162_v47 = vor.u32 1.1754944e-38, %v1161_v48  ;;  %vm1160_vm2 = vcmp.eq.f32.partialorder %v1159_v43, 8.507059e+37 }
 0x395   :  { %vm1179_vm4 = vcmp.eq.f32.partialorder %v1178_v39, 8.507059e+37 }
 0x396   :  { %v1882_v51 = vpop.eup %1881 }
 0x397   :  { %v1188_v59 = vadd.f32 1.0, %v1882_v51 }
 0x398   :  { %v1884_v60 = vpop.eup %1883 }
 0x399   :  { %v1886_v44 = vpop.eup %1885  ;;  %v1151_v50 = vmul.f32 %v1884_v60, %v1149_v53  ;;  %1887 = vrcp.f32 %v1188_v59  ;;  %vm1156_vm13 = vweird.f32 %v1884_v60  ;;  %vm1194_vm7 = vweird.f32 %v1188_v59 }
 0x39a   :  { %v1170_v56 = vmul.f32 %v1886_v44, %v1168_v54  ;;  %1889 = vtanh.f32 %v1144_v62  ;;  %vm1175_vm14 = vweird.f32 %v1886_v44  ;;  %vm1157_vm0 = vmor %vm1155_vm15, %vm1156_vm13  ;;  %v1200_v54 = vand.u32 2147483648, %v1188_v59 }
 0x39b   :  { %v1152_v42 = vsub.f32 1.0, %v1151_v50  ;;  %vm1176_vm3 = vmor %vm1174_vm1, %vm1175_vm14  ;;  %v1181_v50 = vor.u32 1.1754944e-38, %v1180_v52 }
 0x39c   :  { %v1171_v41 = vsub.f32 1.0, %v1170_v56  ;;  %v1201_v39 = vor.u32 1.1754944e-38, %v1200_v54 }
 0x39d   :  { %v1153_v37 = vmul.f32 %v1884_v60, %v1152_v42 }
 0x39e   :  { %v1172_v0 = vmul.f32 %v1886_v44, %v1171_v41 }
 0x39f   :  { %v1888_v57 = vpop.eup %1887  ;;  %v1154_v51 = vadd.f32 %v1884_v60, %v1153_v37 }
 0x3a0   :  { %v1190_v38 = vmul.f32 %v1888_v57, %v1188_v59  ;;  %v1173_v18 = vadd.f32 %v1886_v44, %v1172_v0  ;;  %v1890_v62 = vpop.eup %1889  ;;  %vm1195_vm6 = vweird.f32 %v1888_v57 }
 0x3a1   :  { %v1158_v63 = vsel %vm1157_vm0, %v1884_v60, %v1154_v51  ;;  %vm1196_vm8 = vmor %vm1194_vm7, %vm1195_vm6 }
 0x3a2   :  { %v1163_v56 = vsel %vm1160_vm2, %v1162_v47, %v1158_v63  ;;  %v1191_v42 = vsub.f32 1.0, %v1190_v38  ;;  %v1177_v36 = vsel %vm1176_vm3, %v1886_v44, %v1173_v18  ;;  %v1198_v63 = vand.u32 2147483647, %v1188_v59 }
 0x3a3   :  { %v1205_v41 = vmul.f32 %v1890_v62, %v1163_v56  ;;  %v1182_v61 = vsel %vm1179_vm4, %v1181_v50, %v1177_v36  ;;  %v3524_v56 = vld [vmem:[#allocation54_spill] sm:$0xff] }
 0x3a4   :  { %v1192_v55 = vmul.f32 %v1888_v57, %v1191_v42  ;;  %v1204_v53 = vmul.f32 %v1182_v61, %v2973_v49  ;;  %vm1199_vm9 = vcmp.eq.f32.partialorder %v1198_v63, 8.507059e+37 }
 0x3a6   :  { %v1206_v48 = vadd.f32 %v1205_v41, %v1204_v53  ;;  %v1193_v37 = vadd.f32 %v1888_v57, %v1192_v55 }
 0x3a8   :  { %1891 = vtanh.f32 %v1206_v48  ;;  %v3058_v60 = vsel %vm1216_vm5, %v1206_v48, %v2973_v49  ;;  %v1197_v18 = vsel %vm1196_vm8, %v1888_v57, %v1193_v37 }
 0x3a9   :  { %v1202_v44 = vsel %vm1199_vm9, %v1201_v39, %v1197_v18 }
 0x3ae   :  { %v1892_v36 = vpop.eup %1891 }
 0x3af   :  { %v1208_v43 = vmul.f32 %v1892_v36, %v1202_v44 }
 0x3b1   :  { %v1217_v61 = vsel %vm1216_vm5, %v1208_v43, 0.0  ;;  %v3063_v55 = vsel %vm1216_vm5, %v1208_v43, %v2978_v46  ;;  %v3523_v46 = vld [vmem:[#allocation55_spill] sm:$0xff] }
 0x3b2   :  { %1788 = vst [vmem:[%s3202_s5 + $0x20] sm:$0xff] %v1217_v61  ;;  %1243 = vmatmul.f32.vlgmr.msra.gmra.mxu0 %v3063_v55  ;;  %1263 = vmatmul.f32.vlgmr.msra.gmra.mxu1 %v3063_v55 }
 0x3b3   :  { %1283 = vmatmul.f32.vlgmr.msra.gmra.mxu2 %v3063_v55  ;;  %1303 = vmatmul.f32.vlgmr.msra.gmra.mxu3 %v3063_v55 }
 0x3b4   :  { %1557 = vmatpush.msra.mxu0 %v2684_v16  ;;  %1577 = vmatpush.msra.mxu1 %v2687_v1  ;;  %v3493_v16 = vld [vmem:[#allocation10_spill] sm:$0xff]  ;;  %v3494_v1 = vld [vmem:[#allocation9_spill] sm:$0xff] }
 0x3b5   :  { %1597 = vmatpush.msra.mxu2 %v2690_v15  ;;  %1617 = vmatpush.msra.mxu3 %v2693_v2  ;;  %v3495_v15 = vld [vmem:[#allocation11_spill] sm:$0xff]  ;;  %v3496_v2 = vld [vmem:[#allocation12_spill] sm:$0xff] }
 0x3b6   :  { %1558 = vmatpush.msra.mxu0 %v2696_v3  ;;  %1578 = vmatpush.msra.mxu1 %v2699_v4  ;;  %v3497_v3 = vld [vmem:[#allocation14_spill] sm:$0xff]  ;;  %v3498_v4 = vld [vmem:[#allocation13_spill] sm:$0xff] }
 0x3b7   :  { %1598 = vmatpush.msra.mxu2 %v2702_v5  ;;  %1618 = vmatpush.msra.mxu3 %v2705_v6  ;;  %v3499_v5 = vld [vmem:[#allocation15_spill] sm:$0xff]  ;;  %v3500_v6 = vld [vmem:[#allocation16_spill] sm:$0xff] }
 0x3b8   :  { %1559 = vmatpush.msra.mxu0 %v2708_v8  ;;  %1579 = vmatpush.msra.mxu1 %v2711_v9  ;;  %v3501_v8 = vld [vmem:[#allocation18_spill] sm:$0xff]  ;;  %v3502_v9 = vld [vmem:[#allocation17_spill] sm:$0xff] }
 0x3b9   :  { %1599 = vmatpush.msra.mxu2 %v2714_v10  ;;  %1619 = vmatpush.msra.mxu3 %v2717_v11  ;;  %v3503_v10 = vld [vmem:[#allocation19_spill] sm:$0xff]  ;;  %v3504_v11 = vld [vmem:[#allocation20_spill] sm:$0xff] }
 0x3ba   :  { %1560 = vmatpush.msra.mxu0 %v2720_v14  ;;  %1580 = vmatpush.msra.mxu1 %v2723_v32  ;;  %v3505_v14 = vld [vmem:[#allocation22_spill] sm:$0xff]  ;;  %v3506_v32 = vld [vmem:[#allocation21_spill] sm:$0xff] }
 0x3bb   :  { %1600 = vmatpush.msra.mxu2 %v2726_v23  ;;  %1620 = vmatpush.msra.mxu3 %v2729_v58  ;;  %v3507_v23 = vld [vmem:[#allocation23_spill] sm:$0xff]  ;;  %v3508_v58 = vld [vmem:[#allocation24_spill] sm:$0xff] }
 0x3bc   :  { %1561 = vmatpush.msra.mxu0 %v2732_v20  ;;  %1581 = vmatpush.msra.mxu1 %v2735_v17  ;;  %v3509_v20 = vld [vmem:[#allocation26_spill] sm:$0xff]  ;;  %v3510_v17 = vld [vmem:[#allocation25_spill] sm:$0xff] }
 0x3bd   :  { %1601 = vmatpush.msra.mxu2 %v2738_v12  ;;  %1621 = vmatpush.msra.mxu3 %v2741_v13  ;;  %v3511_v12 = vld [vmem:[#allocation27_spill] sm:$0xff]  ;;  %v3512_v13 = vld [vmem:[#allocation28_spill] sm:$0xff] }
 0x3be   :  { %1562 = vmatpush.msra.mxu0 %v2744_v7  ;;  %1582 = vmatpush.msra.mxu1 %v2747_v19  ;;  %v3513_v7 = vld [vmem:[#allocation29_spill] sm:$0xff]  ;;  %v3514_v19 = vld [vmem:[#allocation30_spill] sm:$0xff] }
 0x3bf   :  { %1602 = vmatpush.msra.mxu2 %v2750_v27  ;;  %1622 = vmatpush.msra.mxu3 %v2753_v22  ;;  %v3515_v27 = vld [vmem:[#allocation32_spill] sm:$0xff]  ;;  %v3516_v22 = vld [vmem:[#allocation33_spill] sm:$0xff] }
 0x3c0   :  { %1563 = vmatpush.msra.mxu0 %v2756_v21  ;;  %1583 = vmatpush.msra.mxu1 %v2759_v31  ;;  %v3517_v21 = vld [vmem:[#allocation34_spill] sm:$0xff]  ;;  %v3518_v31 = vld [vmem:[#allocation35_spill] sm:$0xff] }
 0x3c1   :  { %1603 = vmatpush.msra.mxu2 %v2762_v29  ;;  %1623 = vmatpush.msra.mxu3 %v2765_v24  ;;  %v3519_v29 = vld [vmem:[#allocation36_spill] sm:$0xff]  ;;  %v3520_v24 = vld [vmem:[#allocation37_spill] sm:$0xff] }
 0x3c2   :  { %1564 = vmatpush.msra.mxu0 %v2768_v28  ;;  %1584 = vmatpush.msra.mxu1 %v2771_v26 }
 0x3c3   :  { %1604 = vmatpush.msra.mxu2 %v2774_v30  ;;  %1624 = vmatpush.msra.mxu3 %v2777_v25  ;;  %v3521_v30 = vld [vmem:[#allocation52_spill] sm:$0xff] }
 0x3c4   :  { %1565 = vmatpush.msra.mxu0 %v2780_v45  ;;  %1585 = vmatpush.msra.mxu1 %v2783_v33  ;;  %v3522_v45 = vld [vmem:[#allocation53_spill] sm:$0xff] }
 0x3c5   :  { %1605 = vmatpush.msra.mxu2 %v2786_v34  ;;  %1625 = vmatpush.msra.mxu3 %v2789_v35 }
 0x3c6   :  { %1566 = vmatpush.msra.mxu0 %v3493_v16  ;;  %1586 = vmatpush.msra.mxu1 %v3494_v1 }
 0x3c7   :  { %1606 = vmatpush.msra.mxu2 %v3495_v15  ;;  %1626 = vmatpush.msra.mxu3 %v3496_v2 }
 0x3c8   :  { %1567 = vmatpush.msra.mxu0 %v3497_v3  ;;  %1587 = vmatpush.msra.mxu1 %v3498_v4 }
 0x3c9   :  { %1607 = vmatpush.msra.mxu2 %v3499_v5  ;;  %1627 = vmatpush.msra.mxu3 %v3500_v6 }
 0x3ca   :  { %1568 = vmatpush.msra.mxu0 %v3501_v8  ;;  %1588 = vmatpush.msra.mxu1 %v3502_v9 }
 0x3cb   :  { %1608 = vmatpush.msra.mxu2 %v3503_v10  ;;  %1628 = vmatpush.msra.mxu3 %v3504_v11 }
 0x3cc   :  { %1569 = vmatpush.msra.mxu0 %v3505_v14  ;;  %1589 = vmatpush.msra.mxu1 %v3506_v32  ;;  %v1380_v14 = vpop.permute.xlu2 %1379 }
 0x3cd   :  { %1609 = vmatpush.msra.mxu2 %v3507_v23  ;;  %1629 = vmatpush.msra.mxu3 %v3508_v58  ;;  %vm1381_vm2 = vcmp.eq.s32.totalorder %v1380_v14, 1 }
 0x3ce   :  { %1570 = vmatpush.msra.mxu0 %v3509_v20  ;;  %1590 = vmatpush.msra.mxu1 %v3510_v17 }
 0x3cf   :  { %1610 = vmatpush.msra.mxu2 %v3511_v12  ;;  %1630 = vmatpush.msra.mxu3 %v3512_v13 }
 0x3d0   :  { %1571 = vmatpush.msra.mxu0 %v3513_v7  ;;  %1591 = vmatpush.msra.mxu1 %v3514_v19 }
 0x3d1   :  { %1611 = vmatpush.msra.mxu2 %v3515_v27  ;;  %1631 = vmatpush.msra.mxu3 %v3516_v22 }
 0x3d2   :  { %1572 = vmatpush.msra.mxu0 %v3517_v21  ;;  %1592 = vmatpush.msra.mxu1 %v3518_v31 }
 0x3d3   :  { %1612 = vmatpush.msra.mxu2 %v3519_v29  ;;  %1632 = vmatpush.msra.mxu3 %v3520_v24 }
 0x42f   :  { %v1244_v28 = vpop.f32.mrf.mxu0  ;;  %v1264_v26 = vpop.f32.mrf.mxu1 }
 0x430   :  { %v1307_v25 = vadd.f32 %v1244_v28, %v3521_v30  ;;  %v1308_v33 = vadd.f32 %v1264_v26, %v3522_v45  ;;  %v3525_v28 = vld [vmem:[#allocation56_spill] sm:$0xff]  ;;  %v3526_v30 = vld [vmem:[#allocation57_spill] sm:$0xff] }
 0x432   :  { %v1789_v34 = vmul.f32 -1.442695, %v1307_v25  ;;  %v1790_v35 = vmul.f32 -1.442695, %v1308_v33 }
 0x434   :  { %1893 = vpow2.f32 %v1789_v34  ;;  %v3527_v34 = vld [vmem:[#allocation59_spill] sm:$0xff] }
 0x435   :  { %1895 = vpow2.f32 %v1790_v35 }
 0x436   :  { %v1304_v49 = vpop.f32.mrf.mxu3  ;;  %v1284_v47 = vpop.f32.mrf.mxu2 }
 0x437   :  { %v1310_v40 = vadd.f32 %v1304_v49, %v3523_v46  ;;  %v1309_v42 = vadd.f32 %v1284_v47, %v3524_v56 }
 0x439   :  { %v1791_v57 = vmul.f32 -1.442695, %v1310_v40 }
 0x43a   :  { %v1894_v59 = vpop.eup %1893 }
 0x43b   :  { %v1896_v52 = vpop.eup %1895  ;;  %v1314_v0 = vadd.f32 1.0, %v1894_v59  ;;  %1897 = vpow2.f32 %v1791_v57 }
 0x43c   :  { %v1333_v51 = vadd.f32 1.0, %v1896_v52 }
 0x43d   :  { %1899 = vrcp.f32 %v1314_v0  ;;  %v1326_v63 = vand.u32 2147483648, %v1314_v0  ;;  %v1324_v36 = vand.u32 2147483647, %v1314_v0  ;;  %vm1320_vm12 = vweird.f32 %v1314_v0 }
 0x43e   :  { %1901 = vrcp.f32 %v1333_v51  ;;  %v1345_v18 = vand.u32 2147483648, %v1333_v51  ;;  %v1343_v43 = vand.u32 2147483647, %v1333_v51  ;;  %vm1339_vm13 = vweird.f32 %v1333_v51 }
 0x43f   :  { %v1327_v1 = vor.u32 1.1754944e-38, %v1326_v63  ;;  %vm1325_vm0 = vcmp.eq.f32.partialorder %v1324_v36, 8.507059e+37 }
 0x440   :  { %v1346_v3 = vor.u32 1.1754944e-38, %v1345_v18  ;;  %vm1344_vm1 = vcmp.eq.f32.partialorder %v1343_v43, 8.507059e+37 }
 0x441   :  { %v1898_v38 = vpop.eup %1897 }
 0x442   :  { %v1353_v50 = vadd.f32 1.0, %v1898_v38  ;;  %v3528_v38 = vld [vmem:[#allocation58_spill] sm:$0xff] }
 0x443   :  { %v1900_v62 = vpop.eup %1899 }
 0x444   :  { %v1902_v41 = vpop.eup %1901  ;;  %v1316_v53 = vmul.f32 %v1900_v62, %v1314_v0  ;;  %1903 = vrcp.f32 %v1353_v50  ;;  %vm1321_vm10 = vweird.f32 %v1900_v62  ;;  %v1365_v17 = vand.u32 2147483648, %v1353_v50 }
 0x445   :  { %v1335_v48 = vmul.f32 %v1902_v41, %v1333_v51  ;;  %1905 = vtanh.f32 %v1309_v42  ;;  %vm1340_vm11 = vweird.f32 %v1902_v41  ;;  %vm1322_vm14 = vmor %vm1320_vm12, %vm1321_vm10  ;;  %vm1359_vm4 = vweird.f32 %v1353_v50 }
 0x446   :  { %v1317_v37 = vsub.f32 1.0, %v1316_v53  ;;  %vm1341_vm15 = vmor %vm1339_vm13, %vm1340_vm11  ;;  %v1363_v13 = vand.u32 2147483647, %v1353_v50  ;;  %v1366_v19 = vor.u32 1.1754944e-38, %v1365_v17 }
 0x447   :  { %v1336_v54 = vsub.f32 1.0, %v1335_v48 }
 0x448   :  { %v1318_v39 = vmul.f32 %v1900_v62, %v1317_v37  ;;  %vm1364_vm6 = vcmp.eq.f32.partialorder %v1363_v13, 8.507059e+37 }
 0x449   :  { %v1337_v44 = vmul.f32 %v1902_v41, %v1336_v54 }
 0x44a   :  { %v1904_v61 = vpop.eup %1903  ;;  %v1319_v16 = vadd.f32 %v1900_v62, %v1318_v39 }
 0x44b   :  { %v1338_v15 = vadd.f32 %v1902_v41, %v1337_v44  ;;  %v1355_v2 = vmul.f32 %v1904_v61, %v1353_v50  ;;  %v1906_v5 = vpop.eup %1905  ;;  %vm1360_vm3 = vweird.f32 %v1904_v61 }
 0x44c   :  { %v1323_v4 = vsel %vm1322_vm14, %v1900_v62, %v1319_v16  ;;  %vm1361_vm5 = vmor %vm1359_vm4, %vm1360_vm3 }
 0x44d   :  { %v1328_v6 = vsel %vm1325_vm0, %v1327_v1, %v1323_v4  ;;  %v1342_v8 = vsel %vm1341_vm15, %v1902_v41, %v1338_v15  ;;  %v1356_v9 = vsub.f32 1.0, %v1355_v2 }
 0x44e   :  { %v1347_v10 = vsel %vm1344_vm1, %v1346_v3, %v1342_v8  ;;  %v1370_v11 = vmul.f32 %v1906_v5, %v1328_v6 }
 0x44f   :  { %v1369_v32 = vmul.f32 %v1347_v10, %v3058_v60  ;;  %v1357_v23 = vmul.f32 %v1904_v61, %v1356_v9  ;;  %v1545_v9 = vpop.permute.xlu0 %1544 }
 0x450   :  { %vm1546_vm15 = vcmp.eq.s32.totalorder %v1545_v9, 1 }
 0x451   :  { %v1371_v58 = vadd.f32 %v1370_v11, %v1369_v32  ;;  %v1358_v20 = vadd.f32 %v1904_v61, %v1357_v23 }
 0x453   :  { %1907 = vtanh.f32 %v1371_v58  ;;  %v3143_v12 = vsel %vm1381_vm2, %v1371_v58, %v3058_v60  ;;  %v1362_v7 = vsel %vm1361_vm5, %v1904_v61, %v1358_v20 }
 0x454   :  { %v1367_v22 = vsel %vm1364_vm6, %v1366_v19, %v1362_v7 }
 0x459   :  { %v1908_v27 = vpop.eup %1907 }
 0x45a   :  { %v1373_v21 = vmul.f32 %v1908_v27, %v1367_v22 }
 0x45c   :  { %v1382_v31 = vsel %vm1381_vm2, %v1373_v21, 0.0  ;;  %v3148_v29 = vsel %vm1381_vm2, %v1373_v21, %v3063_v55 }
 0x45d   :  { %1793 = vst [vmem:[%s3202_s5 + $0x28] sm:$0xff] %v1382_v31  ;;  %1408 = vmatmul.f32.vlgmr.msrb.gmra.mxu0 %v3148_v29  ;;  %1428 = vmatmul.f32.vlgmr.msrb.gmra.mxu1 %v3148_v29 }
 0x45e   :  { %1448 = vmatmul.f32.vlgmr.msrb.gmra.mxu2 %v3148_v29  ;;  %1468 = vmatmul.f32.vlgmr.msrb.gmra.mxu3 %v3148_v29 }
 0x4da   :  { %v1409_v60 = vpop.f32.mrf.mxu0  ;;  %v1429_v24 = vpop.f32.mrf.mxu1 }
 0x4db   :  { %v1472_v26 = vadd.f32 %v1409_v60, %v3525_v28  ;;  %v1473_v25 = vadd.f32 %v1429_v24, %v3526_v30  ;;  %v3529_v60 = vld [vmem:[#allocation60_spill] sm:$0xff]  ;;  %v3530_v28 = vld [vmem:[#allocation61_spill] sm:$0xff] }
 0x4dd   :  { %v1794_v55 = vmul.f32 -1.442695, %v1472_v26  ;;  %v1795_v45 = vmul.f32 -1.442695, %v1473_v25 }
 0x4df   :  { %1909 = vpow2.f32 %v1794_v55  ;;  %v3531_v55 = vld [vmem:[#allocation63_spill] sm:$0xff] }
 0x4e0   :  { %1911 = vpow2.f32 %v1795_v45 }
 0x4e1   :  { %v1469_v33 = vpop.f32.mrf.mxu3  ;;  %v1449_v52 = vpop.f32.mrf.mxu2 }
 0x4e2   :  { %v1475_v35 = vadd.f32 %v1469_v33, %v3527_v34  ;;  %v1474_v50 = vadd.f32 %v1449_v52, %v3528_v38 }
 0x4e4   :  { %v1796_v49 = vmul.f32 -1.442695, %v1475_v35 }
 0x4e5   :  { %v1910_v46 = vpop.eup %1909 }
 0x4e6   :  { %v1912_v40 = vpop.eup %1911  ;;  %v1479_v57 = vadd.f32 1.0, %v1910_v46  ;;  %1913 = vpow2.f32 %v1796_v49 }
 0x4e7   :  { %v1498_v59 = vadd.f32 1.0, %v1912_v40 }
 0x4e8   :  { %1915 = vrcp.f32 %v1479_v57  ;;  %v1491_v48 = vand.u32 2147483648, %v1479_v57  ;;  %v1489_v63 = vand.u32 2147483647, %v1479_v57  ;;  %vm1485_vm9 = vweird.f32 %v1479_v57 }
 0x4e9   :  { %1917 = vrcp.f32 %v1498_v59  ;;  %v1510_v37 = vand.u32 2147483648, %v1498_v59  ;;  %v1508_v39 = vand.u32 2147483647, %v1498_v59  ;;  %vm1504_vm10 = vweird.f32 %v1498_v59 }
 0x4ea   :  { %v1492_v43 = vor.u32 1.1754944e-38, %v1491_v48  ;;  %vm1490_vm13 = vcmp.eq.f32.partialorder %v1489_v63, 8.507059e+37 }
 0x4eb   :  { %v1511_v1 = vor.u32 1.1754944e-38, %v1510_v37  ;;  %vm1509_vm14 = vcmp.eq.f32.partialorder %v1508_v39, 8.507059e+37 }
 0x4ec   :  { %v1914_v0 = vpop.eup %1913 }
 0x4ed   :  { %v1518_v51 = vadd.f32 1.0, %v1914_v0  ;;  %v3532_v0 = vld [vmem:[#allocation62_spill] sm:$0xff] }
 0x4ee   :  { %v1916_v47 = vpop.eup %1915 }
 0x4ef   :  { %v1918_v62 = vpop.eup %1917  ;;  %v1481_v56 = vmul.f32 %v1916_v47, %v1479_v57  ;;  %1919 = vrcp.f32 %v1518_v51  ;;  %vm1486_vm7 = vweird.f32 %v1916_v47  ;;  %v1530_v23 = vand.u32 2147483648, %v1518_v51 }
 0x4f0   :  { %v1500_v42 = vmul.f32 %v1918_v62, %v1498_v59  ;;  %1921 = vtanh.f32 %v1474_v50  ;;  %vm1505_vm8 = vweird.f32 %v1918_v62  ;;  %vm1487_vm11 = vmor %vm1485_vm9, %vm1486_vm7  ;;  %vm1524_vm1 = vweird.f32 %v1518_v51 }
 0x4f1   :  { %v1482_v41 = vsub.f32 1.0, %v1481_v56  ;;  %vm1506_vm12 = vmor %vm1504_vm10, %vm1505_vm8  ;;  %v1528_v20 = vand.u32 2147483647, %v1518_v51  ;;  %v1531_v13 = vor.u32 1.1754944e-38, %v1530_v23 }
 0x4f2   :  { %v1501_v53 = vsub.f32 1.0, %v1500_v42 }
 0x4f3   :  { %v1483_v54 = vmul.f32 %v1916_v47, %v1482_v41  ;;  %vm1529_vm3 = vcmp.eq.f32.partialorder %v1528_v20, 8.507059e+37 }
 0x4f4   :  { %v1502_v18 = vmul.f32 %v1918_v62, %v1501_v53 }
 0x4f5   :  { %v1920_v36 = vpop.eup %1919  ;;  %v1484_v44 = vadd.f32 %v1916_v47, %v1483_v54 }
 0x4f6   :  { %v1503_v61 = vadd.f32 %v1918_v62, %v1502_v18  ;;  %v1520_v16 = vmul.f32 %v1920_v36, %v1518_v51  ;;  %v1922_v2 = vpop.eup %1921  ;;  %vm1525_vm0 = vweird.f32 %v1920_v36 }
 0x4f7   :  { %v1488_v15 = vsel %vm1487_vm11, %v1916_v47, %v1484_v44  ;;  %vm1526_vm2 = vmor %vm1524_vm1, %vm1525_vm0 }
 0x4f8   :  { %v1493_v3 = vsel %vm1490_vm13, %v1492_v43, %v1488_v15  ;;  %v1507_v4 = vsel %vm1506_vm12, %v1918_v62, %v1503_v61  ;;  %v1521_v5 = vsub.f32 1.0, %v1520_v16 }
 0x4f9   :  { %v1512_v6 = vsel %vm1509_vm14, %v1511_v1, %v1507_v4  ;;  %v1535_v8 = vmul.f32 %v1922_v2, %v1493_v3 }
 0x4fa   :  { %v1534_v10 = vmul.f32 %v1512_v6, %v3143_v12  ;;  %v1522_v11 = vmul.f32 %v1920_v36, %v1521_v5  ;;  %v1710_v5 = vpop.permute.xlu1 %1709 }
 0x4fb   :  { %vm1711_vm12 = vcmp.eq.s32.totalorder %v1710_v5, 1 }
 0x4fc   :  { %v1536_v14 = vadd.f32 %v1535_v8, %v1534_v10  ;;  %v1523_v32 = vadd.f32 %v1920_v36, %v1522_v11 }
 0x4fe   :  { %1923 = vtanh.f32 %v1536_v14  ;;  %v3164_v58 = vsel %vm1546_vm15, %v1536_v14, %v3143_v12  ;;  %v1527_v17 = vsel %vm1526_vm2, %v1920_v36, %v1523_v32 }
 0x4ff   :  { %v1532_v19 = vsel %vm1529_vm3, %v1531_v13, %v1527_v17 }
 0x504   :  { %v1924_v7 = vpop.eup %1923 }
 0x505   :  { %v1538_v27 = vmul.f32 %v1924_v7, %v1532_v19 }
 0x507   :  { %v1547_v22 = vsel %vm1546_vm15, %v1538_v27, 0.0  ;;  %v3169_v21 = vsel %vm1546_vm15, %v1538_v27, %v3148_v29 }
 0x508   :  { %1798 = vst [vmem:[%s3202_s5 + $0x30] sm:$0xff] %v1547_v22  ;;  %1573 = vmatmul.f32.vlgmr.msra.gmra.mxu0 %v3169_v21  ;;  %1593 = vmatmul.f32.vlgmr.msra.gmra.mxu1 %v3169_v21 }
 0x509   :  { %1613 = vmatmul.f32.vlgmr.msra.gmra.mxu2 %v3169_v21  ;;  %1633 = vmatmul.f32.vlgmr.msra.gmra.mxu3 %v3169_v21 }
 0x585   :  { %v1574_v12 = vpop.f32.mrf.mxu0  ;;  %v1594_v31 = vpop.f32.mrf.mxu1 }
 0x586   :  { %v1637_v24 = vadd.f32 %v1574_v12, %v3529_v60  ;;  %v1638_v26 = vadd.f32 %v1594_v31, %v3530_v28 }
 0x588   :  { %v1799_v29 = vmul.f32 -1.442695, %v1637_v24  ;;  %v1800_v30 = vmul.f32 -1.442695, %v1638_v26 }
 0x58a   :  { %1925 = vpow2.f32 %v1799_v29 }
 0x58b   :  { %1927 = vpow2.f32 %v1800_v30 }
 0x58c   :  { %v1634_v25 = vpop.f32.mrf.mxu3  ;;  %v1614_v40 = vpop.f32.mrf.mxu2 }
 0x58d   :  { %v1640_v45 = vadd.f32 %v1634_v25, %v3531_v55  ;;  %v1639_v51 = vadd.f32 %v1614_v40, %v3532_v0 }
 0x58f   :  { %v1801_v33 = vmul.f32 -1.442695, %v1640_v45 }
 0x590   :  { %v1926_v34 = vpop.eup %1925 }
 0x591   :  { %v1928_v35 = vpop.eup %1927  ;;  %v1644_v49 = vadd.f32 1.0, %v1926_v34  ;;  %1929 = vpow2.f32 %v1801_v33 }
 0x592   :  { %v1663_v46 = vadd.f32 1.0, %v1928_v35 }
 0x593   :  { %1931 = vrcp.f32 %v1644_v49  ;;  %v1656_v42 = vand.u32 2147483648, %v1644_v49  ;;  %v1654_v48 = vand.u32 2147483647, %v1644_v49  ;;  %vm1650_vm6 = vweird.f32 %v1644_v49 }
 0x594   :  { %1933 = vrcp.f32 %v1663_v46  ;;  %v1675_v41 = vand.u32 2147483648, %v1663_v46  ;;  %v1673_v54 = vand.u32 2147483647, %v1663_v46  ;;  %vm1669_vm7 = vweird.f32 %v1663_v46 }
 0x595   :  { %v1657_v39 = vor.u32 1.1754944e-38, %v1656_v42  ;;  %vm1655_vm10 = vcmp.eq.f32.partialorder %v1654_v48, 8.507059e+37 }
 0x596   :  { %v1676_v43 = vor.u32 1.1754944e-38, %v1675_v41  ;;  %vm1674_vm11 = vcmp.eq.f32.partialorder %v1673_v54, 8.507059e+37 }
 0x597   :  { %v1930_v57 = vpop.eup %1929 }
 0x598   :  { %v1683_v59 = vadd.f32 1.0, %v1930_v57 }
 0x599   :  { %v1932_v52 = vpop.eup %1931 }
 0x59a   :  { %v1934_v47 = vpop.eup %1933  ;;  %v1646_v38 = vmul.f32 %v1932_v52, %v1644_v49  ;;  %1935 = vrcp.f32 %v1683_v59  ;;  %vm1651_vm4 = vweird.f32 %v1932_v52  ;;  %v1695_v14 = vand.u32 2147483648, %v1683_v59 }
 0x59b   :  { %v1665_v50 = vmul.f32 %v1934_v47, %v1663_v46  ;;  %1937 = vtanh.f32 %v1639_v51  ;;  %vm1670_vm5 = vweird.f32 %v1934_v47  ;;  %vm1652_vm8 = vmor %vm1650_vm6, %vm1651_vm4  ;;  %vm1689_vm14 = vweird.f32 %v1683_v59 }
 0x59c   :  { %v1647_v62 = vsub.f32 1.0, %v1646_v38  ;;  %vm1671_vm9 = vmor %vm1669_vm7, %vm1670_vm5  ;;  %v1693_v32 = vand.u32 2147483647, %v1683_v59  ;;  %v1696_v20 = vor.u32 1.1754944e-38, %v1695_v14 }
 0x59d   :  { %v1666_v56 = vsub.f32 1.0, %v1665_v50 }
 0x59e   :  { %v1648_v53 = vmul.f32 %v1932_v52, %v1647_v62  ;;  %vm1694_vm0 = vcmp.eq.f32.partialorder %v1693_v32, 8.507059e+37 }
 0x59f   :  { %v1667_v37 = vmul.f32 %v1934_v47, %v1666_v56 }
 0x5a0   :  { %v1936_v63 = vpop.eup %1935  ;;  %v1649_v18 = vadd.f32 %v1932_v52, %v1648_v53 }
 0x5a1   :  { %v1668_v36 = vadd.f32 %v1934_v47, %v1667_v37  ;;  %v1685_v44 = vmul.f32 %v1936_v63, %v1683_v59  ;;  %v1938_v16 = vpop.eup %1937  ;;  %vm1690_vm13 = vweird.f32 %v1936_v63 }
 0x5a2   :  { %v1653_v61 = vsel %vm1652_vm8, %v1932_v52, %v1649_v18  ;;  %vm1691_vm15 = vmor %vm1689_vm14, %vm1690_vm13 }
 0x5a3   :  { %v1658_v1 = vsel %vm1655_vm10, %v1657_v39, %v1653_v61  ;;  %v1672_v15 = vsel %vm1671_vm9, %v1934_v47, %v1668_v36  ;;  %v1686_v2 = vsub.f32 1.0, %v1685_v44 }
 0x5a4   :  { %v1677_v3 = vsel %vm1674_vm11, %v1676_v43, %v1672_v15  ;;  %v1700_v4 = vmul.f32 %v1938_v16, %v1658_v1 }
 0x5a5   :  { %v1699_v6 = vmul.f32 %v1677_v3, %v3164_v58  ;;  %v1687_v8 = vmul.f32 %v1936_v63, %v1686_v2 }
 0x5a7   :  { %v1701_v9 = vadd.f32 %v1700_v4, %v1699_v6  ;;  %v1688_v10 = vadd.f32 %v1936_v63, %v1687_v8 }
 0x5a9   :  { %1939 = vtanh.f32 %v1701_v9  ;;  %v1716_v11 = vsel %vm1711_vm12, %v1701_v9, %v3164_v58  ;;  %v1692_v23 = vsel %vm1691_vm15, %v1936_v63, %v1688_v10 }
 0x5aa   :  { %1718 = vst [vmem:[%s3204_s7] sm:$0xff] %v1716_v11  ;;  %v1697_v13 = vsel %vm1694_vm0, %v1696_v20, %v1692_v23 }
 0x5af   :  { %v1940_v17 = vpop.eup %1939 }
 0x5b0   :  { %v1703_v7 = vmul.f32 %v1940_v17, %v1697_v13 }
 0x5b2   :  { %v1712_v19 = vsel %vm1711_vm12, %v1703_v7, 0.0  ;;  %v1715_v27 = vsel %vm1711_vm12, %v1703_v7, %v3169_v21 }
 0x5b3   :  { %1803 = vst [vmem:[%s3202_s5 + $0x38] sm:$0xff] %v1712_v19 }
 0x5b4   :  { %1717 = vst [vmem:[%s3203_s6] sm:$0xff] %v1715_v27 }
 0x5b5   :  { %1731 = vsyncpa [#allocation4], 1 }
 0x5b6   :  { %1732 = vsyncpa [#allocation6], 1 }

</bundles_post_ra>
